<compile_context>
chip_gen: v7x
topology: tpu7x:2x2x1
jax: 0.10.0
libtpu: 0.0.40
codegen_flags: <defaults>
</compile_context>

<pallas_src>
import functools
import math

import jax
import jax.numpy as jnp
from jax import lax
from jax.experimental import pallas as pl
from jax.experimental.pallas import tpu as pltpu


NEG_INF = -1e10  # matches torch masked_fill(mask == 0, -1e10)


# ----------------------------------------------------------------------------
# Fused decoder-layer kernel (one batch element per grid step)
# ----------------------------------------------------------------------------

def _decoder_layer_kernel(
        y_ref, enc_ref, ekv_ref,
        # masked self-attention: per-head stacked weights (nh, H, hd)/(nh, hd, H)
        wq_ref, bq_ref, wk_ref, bk_ref, wv_ref, bv_ref, wo_ref, bo_ref,
        g1_ref, be1_ref,
        # encoder-decoder cross attention
        cwq_ref, cbq_ref, cwk_ref, cbk_ref, cwv_ref, cbv_ref, cwo_ref, cbo_ref,
        g2_ref, be2_ref,
        # position-wise FFN
        w1_ref, b1_ref, w2_ref, b2_ref,
        g3_ref, be3_ref,
        o_ref, *, n_heads):
    L, H = y_ref.shape                       # leading batch dim is squeezed out

    def linear(x_bf16, w_ref, b_ref):
        # (M, K) bf16 @ (K, N) bf16 -> f32 accumulate, + f32 bias row.
        return jnp.dot(x_bf16, w_ref[...],
                       preferred_element_type=jnp.float32) + b_ref[...]

    def layer_norm(z, g_ref, b_ref):
        # LayerNorm over H, eps = 1e-5 (torch default), f32 statistics.
        mu = jnp.mean(z, axis=-1, keepdims=True)
        d = z - mu
        var = jnp.mean(d * d, axis=-1, keepdims=True)
        return d * lax.rsqrt(var + 1e-5) * g_ref[...] + b_ref[...]

    def mha(xq, xkv, keep, wq, bq, wk, bk, wv, bv, wo, bo):
        """Multi-head attention on one batch element.

        xq: (Lq, H) bf16, xkv: (Lkv, H) bf16, keep: bool broadcastable to
        (Lq, Lkv) (True = attend).  Heads are a static unroll over per-head
        weight slices stacked at prep time — no lane-dim slicing of the
        activations, no concat; each head's output accumulates straight into
        the f32 output-projection accumulator.  The 1/sqrt(hd) scale is
        already folded into wq / bq.
        """
        Lq = xq.shape[0]
        acc = jnp.zeros((Lq, H), jnp.float32)
        for h in range(n_heads):                       # static unroll
            qh = (jnp.dot(xq, wq[h], preferred_element_type=jnp.float32)
                  + bq[h]).astype(jnp.bfloat16)        # (Lq, hd)
            kh = (jnp.dot(xkv, wk[h], preferred_element_type=jnp.float32)
                  + bk[h]).astype(jnp.bfloat16)        # (Lkv, hd)
            vh = (jnp.dot(xkv, wv[h], preferred_element_type=jnp.float32)
                  + bv[h]).astype(jnp.bfloat16)        # (Lkv, hd)
            # scores: q @ k^T without materializing k^T
            e = lax.dot_general(qh, kh, (((1,), (1,)), ((), ())),
                                preferred_element_type=jnp.float32)  # (Lq, Lkv)
            e = jnp.where(keep, e, NEG_INF)
            e = e - jnp.max(e, axis=-1, keepdims=True)
            p = jnp.exp(e)
            # approx reciprocal runs on the EUP slot; use approx=False for
            # bit-level parity with the torch softmax divide.
            p = p * pl.reciprocal(jnp.sum(p, axis=-1, keepdims=True), approx=True)
            zh = jnp.dot(p.astype(jnp.bfloat16), vh,
                         preferred_element_type=jnp.float32)          # (Lq, hd)
            acc = acc + jnp.dot(zh.astype(jnp.bfloat16), wo[h],
                                preferred_element_type=jnp.float32)   # (Lq, H)
        return acc + bo[...]

    y_b = y_ref[...]                                   # (L, H)  bf16
    y0 = y_b.astype(jnp.float32)                       # f32 residual stream
    enc_b = enc_ref[...]                               # (Lk, H) bf16

    # Masks built in-kernel: causal lower-triangular for self-attention,
    # broadcast key-validity row for cross-attention — no HBM mask tensors.
    rows = lax.broadcasted_iota(jnp.int32, (L, L), 0)
    cols = lax.broadcasted_iota(jnp.int32, (L, L), 1)
    causal_keep = rows >= cols                         # (L, L) bool
    enc_keep = ekv_ref[...] != 0.0                     # (1, Lk) bool, broadcasts over Lq

    # 1) masked multi-head self-attention + AddNorm  (dropout = identity)
    a1 = mha(y_b, y_b, causal_keep,
             wq_ref, bq_ref, wk_ref, bk_ref, wv_ref, bv_ref, wo_ref, bo_ref)
    y1 = layer_norm(y0 + a1, g1_ref, be1_ref)

    # 2) encoder-decoder cross attention + AddNorm
    y1_b = y1.astype(jnp.bfloat16)
    a2 = mha(y1_b, enc_b, enc_keep,
             cwq_ref, cbq_ref, cwk_ref, cbk_ref, cwv_ref, cbv_ref, cwo_ref, cbo_ref)
    y2 = layer_norm(y1 + a2, g2_ref, be2_ref)

    # 3) position-wise FFN (ReLU; dropout = identity) + AddNorm
    y2_b = y2.astype(jnp.bfloat16)
    hact = jnp.maximum(linear(y2_b, w1_ref, b1_ref), 0.0)            # (L, F)
    f = linear(hact.astype(jnp.bfloat16), w2_ref, b2_ref)            # (L, H)
    y3 = layer_norm(y2 + f, g3_ref, be3_ref)

    o_ref[...] = y3.astype(o_ref.dtype)


# ----------------------------------------------------------------------------
# One-time parameter preparation (hoisted out of the per-step forward)
# ----------------------------------------------------------------------------

def prepare_params(params, *, n_heads):
    """torch (out, in) Linear weights -> (in, out), per-head stacking for
    Q/K/V/O, bf16 weight cast, f32 bias rows, and 1/sqrt(hd) folded into
    W_q / b_q.  Call ONCE at parameter-load time."""
    H = params['att']['wq'].shape[0]
    hd = H // n_heads
    scale = 1.0 / math.sqrt(hd)

    def t(w):                                           # (out, in) -> (in, out)
        return jnp.asarray(w, jnp.float32).T

    def stack_in_heads(w_t):                            # (in, out) -> (nh, in, hd)
        i, o = w_t.shape
        return w_t.reshape(i, o // hd, hd).transpose(1, 0, 2)

    def stack_out_heads(w_t):                           # (in, out) -> (nh, hd, out)
        i, o = w_t.shape
        return w_t.reshape(i // hd, hd, o)

    def row(b):
        return jnp.asarray(b, jnp.float32).reshape(1, -1)

    def mha_params(p):
        wq = stack_in_heads(t(p['wq']) * scale).astype(jnp.bfloat16)
        bq = (jnp.asarray(p['bq'], jnp.float32) * scale).reshape(n_heads, 1, hd)
        wk = stack_in_heads(t(p['wk'])).astype(jnp.bfloat16)
        bk = jnp.asarray(p['bk'], jnp.float32).reshape(n_heads, 1, hd)
        wv = stack_in_heads(t(p['wv'])).astype(jnp.bfloat16)
        bv = jnp.asarray(p['bv'], jnp.float32).reshape(n_heads, 1, hd)
        wo = stack_out_heads(t(p['wo'])).astype(jnp.bfloat16)
        bo = row(p['bo'])
        return (wq, bq, wk, bk, wv, bv, wo, bo)

    ffn = params['ffn']
    return (
        *mha_params(params['att']),
        row(params['att_norm']['g']), row(params['att_norm']['b']),
        *mha_params(params['attE']),
        row(params['attE_norm']['g']), row(params['attE_norm']['b']),
        t(ffn['w1']).astype(jnp.bfloat16), row(ffn['b1']),
        t(ffn['w2']).astype(jnp.bfloat16), row(ffn['b2']),
        row(params['ffn_norm']['g']), row(params['ffn_norm']['b']),
    )


# ----------------------------------------------------------------------------
# Wrapper
# ----------------------------------------------------------------------------

def decoder_layer_forward(prepped, y, enc_x, enc_key_valid, *, n_heads,
                          vmem_limit_bytes=64 * 1024 * 1024):
    """Pallas port of DecoderLayer.forward(y, enc_x, mask, enc_mask), eval mode.

    Self-attention uses the standard causal mask (generated in-kernel, ==
    torch's lower-triangular `mask`); cross-attention takes a (B, Lk) 0/1
    key-validity vector (== torch's `enc_mask` padding mask broadcast over the
    query axis).  Activations cross the kernel boundary in bf16.
    """
    B, L, H = y.shape
    Lk = enc_x.shape[1]
    assert H % n_heads == 0

    yb = jnp.asarray(y).astype(jnp.bfloat16)
    eb = jnp.asarray(enc_x).astype(jnp.bfloat16)
    ekv = jnp.asarray(enc_key_valid, jnp.float32).reshape(B, 1, Lk)

    def tiled(shape):   # batch-tiled activations: one batch element per step
        nrest = len(shape) - 1
        return pl.BlockSpec((None,) + tuple(shape[1:]),
                            lambda b, _n=nrest: (b,) + (0,) * _n)

    def const(shape):   # grid-invariant weights: constant block index -> fetched once
        n = len(shape)
        return pl.BlockSpec(tuple(shape), lambda b, _n=n: (0,) * _n)

    in_specs = [tiled(yb.shape), tiled(eb.shape), tiled(ekv.shape)]
    in_specs += [const(p.shape) for p in prepped]

    return pl.pallas_call(
        functools.partial(_decoder_layer_kernel, n_heads=n_heads),
        out_shape=jax.ShapeDtypeStruct((B, L, H), jnp.bfloat16),
        grid=(B,),
        in_specs=in_specs,
        out_specs=tiled((B, L, H)),
        compiler_params=pltpu.CompilerParams(
            dimension_semantics=("parallel",),       # megacore-shard batch steps
            vmem_limit_bytes=vmem_limit_bytes),
    )(yb, eb, ekv, *prepped)


# ----------------------------------------------------------------------------
# Pure-JAX f32 reference (torch DecoderLayer, eval mode)
# ----------------------------------------------------------------------------

def decoder_layer_reference(params, y, enc_x, mask, enc_mask, *, n_heads):
    def linear(x, w, b):                                  # torch layout (out, in)
        return x @ jnp.asarray(w).T + jnp.asarray(b)

    def mha(q_in, kv_in, p, m):
        B, Lq, H = q_in.shape
        hd = H // n_heads

        def split(x):
            b, l, _ = x.shape
            return x.reshape(b, l, n_heads, hd).transpose(0, 2, 1, 3)

        q = split(linear(q_in, p['wq'], p['bq']))
        k = split(linear(kv_in, p['wk'], p['bk']))
        v = split(linear(kv_in, p['wv'], p['bv']))
        e = jnp.einsum('bhqd,bhkd->bhqk', q, k) / math.sqrt(hd)
        e = jnp.where(m[:, None, :, :] == 0, -1e10, e)
        a = jax.nn.softmax(e, axis=-1)
        z = jnp.einsum('bhqk,bhkd->bhqd', a, v)
        z = z.transpose(0, 2, 1, 3).reshape(B, Lq, H)
        return linear(z, p['wo'], p['bo'])

    def addnorm(x, y_, p):
        z = x + y_
        mu = z.mean(-1, keepdims=True)
        var = ((z - mu) ** 2).mean(-1, keepdims=True)
        return (z - mu) / jnp.sqrt(var + 1e-5) * p['g'] + p['b']

    y1 = addnorm(y, mha(y, y, params['att'], mask), params['att_norm'])
    y2 = addnorm(y1, mha(y1, enc_x, params['attE'], enc_mask), params['attE_norm'])
    ffn = params['ffn']
    h = jax.nn.relu(linear(y2, ffn['w1'], ffn['b1']))
    f = linear(h, ffn['w2'], ffn['b2'])
    return addnorm(y2, f, params['ffn_norm'])


# ----------------------------------------------------------------------------
# main
# ----------------------------------------------------------------------------

if __name__ == "__main__":
    n_heads, n_hiddens, ff_hiddens = 4, 128, 256   # H multiple of 128 -> lane-dense
    B, Lq, Lk = 2, 8, 16

    key = jax.random.PRNGKey(0)
    k_att, k_attE, k_ffn, k_y, k_enc = jax.random.split(key, 5)

    def dense(k, out_f, in_f):
        kw, kb = jax.random.split(k)
        return (jax.random.normal(kw, (out_f, in_f), jnp.float32) * 0.02,
                jax.random.normal(kb, (out_f,), jnp.float32) * 0.02)

    def attn_params(k):
        kq, kk, kv, ko = jax.random.split(k, 4)
        wq, bq = dense(kq, n_hiddens, n_hiddens)
        wk, bk = dense(kk, n_hiddens, n_hiddens)
        wv, bv = dense(kv, n_hiddens, n_hiddens)
        wo, bo = dense(ko, n_hiddens, n_hiddens)
        return {'wq': wq, 'bq': bq, 'wk': wk, 'bk': bk,
                'wv': wv, 'bv': bv, 'wo': wo, 'bo': bo}

    k_f1, k_f2 = jax.random.split(k_ffn)
    w1, b1 = dense(k_f1, ff_hiddens, n_hiddens)
    w2, b2 = dense(k_f2, n_hiddens, ff_hiddens)

    def ln_params():
        return {'g': jnp.ones((n_hiddens,), jnp.float32),
                'b': jnp.zeros((n_hiddens,), jnp.float32)}

    params = {
        'att': attn_params(k_att), 'att_norm': ln_params(),
        'attE': attn_params(k_attE), 'attE_norm': ln_params(),
        'ffn': {'w1': w1, 'b1': b1, 'w2': w2, 'b2': b2},
        'ffn_norm': ln_params(),
    }

    y = jax.random.normal(k_y, (B, Lq, n_hiddens), jnp.float32)
    enc_x = jax.random.normal(k_enc, (B, Lk, n_hiddens), jnp.float32)

    # Cross-attention key padding: last 3 encoder positions of batch 1 padded.
    enc_key_valid = jnp.ones((B, Lk), jnp.float32).at[1, Lk - 3:].set(0.0)
    # Dense masks only for the f32 torch-style reference.
    mask = jnp.broadcast_to(jnp.tril(jnp.ones((Lq, Lq), jnp.float32))[None],
                            (B, Lq, Lq))
    enc_mask = jnp.broadcast_to(enc_key_valid[:, None, :], (B, Lq, Lk))

    prepped = prepare_params(params, n_heads=n_heads)      # once, at load time

    fwd = jax.jit(functools.partial(decoder_layer_forward, n_heads=n_heads))
    out = fwd(prepped, y, enc_x, enc_key_valid)
    jax.block_until_ready(out)

    ref = decoder_layer_reference(params, y, enc_x, mask, enc_mask,
                                  n_heads=n_heads)
    err = float(jnp.max(jnp.abs(out.astype(jnp.float32) - ref)))

    assert out.shape == (B, Lq, n_hiddens), out.shape
    assert bool(jnp.all(jnp.isfinite(out))), "non-finite output"
    assert err < 0.15, f"max |pallas - reference| too large: {err}"
    print("KERNEL_OK")
</pallas_src>

<mosaic_0001>
module attributes {stable_mosaic.version = 11 : i64} {
  func.func @_decoder_layer_kernel(%arg0: i32, %arg1: memref<1x8x128xbf16, #tpu.memory_space<vmem>>, %arg2: memref<1x16x128xbf16, #tpu.memory_space<vmem>>, %arg3: memref<1x1x16xf32, #tpu.memory_space<vmem>>, %arg4: memref<4x128x32xbf16, #tpu.memory_space<vmem>>, %arg5: memref<4x1x32xf32, #tpu.memory_space<vmem>>, %arg6: memref<4x128x32xbf16, #tpu.memory_space<vmem>>, %arg7: memref<4x1x32xf32, #tpu.memory_space<vmem>>, %arg8: memref<4x128x32xbf16, #tpu.memory_space<vmem>>, %arg9: memref<4x1x32xf32, #tpu.memory_space<vmem>>, %arg10: memref<4x32x128xbf16, #tpu.memory_space<vmem>>, %arg11: memref<1x128xf32, #tpu.memory_space<vmem>>, %arg12: memref<1x128xf32, #tpu.memory_space<vmem>>, %arg13: memref<1x128xf32, #tpu.memory_space<vmem>>, %arg14: memref<4x128x32xbf16, #tpu.memory_space<vmem>>, %arg15: memref<4x1x32xf32, #tpu.memory_space<vmem>>, %arg16: memref<4x128x32xbf16, #tpu.memory_space<vmem>>, %arg17: memref<4x1x32xf32, #tpu.memory_space<vmem>>, %arg18: memref<4x128x32xbf16, #tpu.memory_space<vmem>>, %arg19: memref<4x1x32xf32, #tpu.memory_space<vmem>>, %arg20: memref<4x32x128xbf16, #tpu.memory_space<vmem>>, %arg21: memref<1x128xf32, #tpu.memory_space<vmem>>, %arg22: memref<1x128xf32, #tpu.memory_space<vmem>>, %arg23: memref<1x128xf32, #tpu.memory_space<vmem>>, %arg24: memref<128x256xbf16, #tpu.memory_space<vmem>>, %arg25: memref<1x256xf32, #tpu.memory_space<vmem>>, %arg26: memref<256x128xbf16, #tpu.memory_space<vmem>>, %arg27: memref<1x128xf32, #tpu.memory_space<vmem>>, %arg28: memref<1x128xf32, #tpu.memory_space<vmem>>, %arg29: memref<1x128xf32, #tpu.memory_space<vmem>>, %arg30: memref<1x8x128xbf16, #tpu.memory_space<vmem>>) attributes {dimension_semantics = [#tpu.dimension_semantics<parallel>], iteration_bounds = array<i64: 2>, scalar_prefetch = 0 : i64, scratch_operands = 0 : i64, tpu.core_type = #tpu.core_type<tc>, window_params = [{transform_indices = @transform_0, window_bounds = array<i64: 1, 8, 128>}, {transform_indices = @transform_1, window_bounds = array<i64: 1, 16, 128>}, {transform_indices = @transform_2, window_bounds = array<i64: 1, 1, 16>}, {pipeline_mode = #tpu.pipeline_mode<synchronous>, transform_indices = @transform_3, window_bounds = array<i64: 4, 128, 32>}, {pipeline_mode = #tpu.pipeline_mode<synchronous>, transform_indices = @transform_4, window_bounds = array<i64: 4, 1, 32>}, {pipeline_mode = #tpu.pipeline_mode<synchronous>, transform_indices = @transform_5, window_bounds = array<i64: 4, 128, 32>}, {pipeline_mode = #tpu.pipeline_mode<synchronous>, transform_indices = @transform_6, window_bounds = array<i64: 4, 1, 32>}, {pipeline_mode = #tpu.pipeline_mode<synchronous>, transform_indices = @transform_7, window_bounds = array<i64: 4, 128, 32>}, {pipeline_mode = #tpu.pipeline_mode<synchronous>, transform_indices = @transform_8, window_bounds = array<i64: 4, 1, 32>}, {pipeline_mode = #tpu.pipeline_mode<synchronous>, transform_indices = @transform_9, window_bounds = array<i64: 4, 32, 128>}, {pipeline_mode = #tpu.pipeline_mode<synchronous>, transform_indices = @transform_10, window_bounds = array<i64: 1, 128>}, {pipeline_mode = #tpu.pipeline_mode<synchronous>, transform_indices = @transform_11, window_bounds = array<i64: 1, 128>}, {pipeline_mode = #tpu.pipeline_mode<synchronous>, transform_indices = @transform_12, window_bounds = array<i64: 1, 128>}, {pipeline_mode = #tpu.pipeline_mode<synchronous>, transform_indices = @transform_13, window_bounds = array<i64: 4, 128, 32>}, {pipeline_mode = #tpu.pipeline_mode<synchronous>, transform_indices = @transform_14, window_bounds = array<i64: 4, 1, 32>}, {pipeline_mode = #tpu.pipeline_mode<synchronous>, transform_indices = @transform_15, window_bounds = array<i64: 4, 128, 32>}, {pipeline_mode = #tpu.pipeline_mode<synchronous>, transform_indices = @transform_16, window_bounds = array<i64: 4, 1, 32>}, {pipeline_mode = #tpu.pipeline_mode<synchronous>, transform_indices = @transform_17, window_bounds = array<i64: 4, 128, 32>}, {pipeline_mode = #tpu.pipeline_mode<synchronous>, transform_indices = @transform_18, window_bounds = array<i64: 4, 1, 32>}, {pipeline_mode = #tpu.pipeline_mode<synchronous>, transform_indices = @transform_19, window_bounds = array<i64: 4, 32, 128>}, {pipeline_mode = #tpu.pipeline_mode<synchronous>, transform_indices = @transform_20, window_bounds = array<i64: 1, 128>}, {pipeline_mode = #tpu.pipeline_mode<synchronous>, transform_indices = @transform_21, window_bounds = array<i64: 1, 128>}, {pipeline_mode = #tpu.pipeline_mode<synchronous>, transform_indices = @transform_22, window_bounds = array<i64: 1, 128>}, {pipeline_mode = #tpu.pipeline_mode<synchronous>, transform_indices = @transform_23, window_bounds = array<i64: 128, 256>}, {pipeline_mode = #tpu.pipeline_mode<synchronous>, transform_indices = @transform_24, window_bounds = array<i64: 1, 256>}, {pipeline_mode = #tpu.pipeline_mode<synchronous>, transform_indices = @transform_25, window_bounds = array<i64: 256, 128>}, {pipeline_mode = #tpu.pipeline_mode<synchronous>, transform_indices = @transform_26, window_bounds = array<i64: 1, 128>}, {pipeline_mode = #tpu.pipeline_mode<synchronous>, transform_indices = @transform_27, window_bounds = array<i64: 1, 128>}, {pipeline_mode = #tpu.pipeline_mode<synchronous>, transform_indices = @transform_28, window_bounds = array<i64: 1, 128>}, {transform_indices = @transform_29, window_bounds = array<i64: 1, 8, 128>}]} {
    %c0 = arith.constant 0 : index
    %c0_0 = arith.constant 0 : index
    %c0_1 = arith.constant 0 : index
    %0 = vector.load %arg1[%c0, %c0_0, %c0_1] : memref<1x8x128xbf16, #tpu.memory_space<vmem>>, vector<1x8x128xbf16>
    %1 = vector.shape_cast %0 : vector<1x8x128xbf16> to vector<8x128xbf16>
    %2 = arith.extf %1 : vector<8x128xbf16> to vector<8x128xf32>
    %c0_2 = arith.constant 0 : index
    %c0_3 = arith.constant 0 : index
    %c0_4 = arith.constant 0 : index
    %3 = vector.load %arg2[%c0_2, %c0_3, %c0_4] : memref<1x16x128xbf16, #tpu.memory_space<vmem>>, vector<1x16x128xbf16>
    %4 = vector.shape_cast %3 : vector<1x16x128xbf16> to vector<16x128xbf16>
    %5 = tpu.iota {dimensions = array<i32: 0>} : vector<8x8xi32>
    %6 = tpu.iota {dimensions = array<i32: 1>} : vector<8x8xi32>
    %7 = arith.cmpi sge, %5, %6 : vector<8x8xi32>
    %c0_5 = arith.constant 0 : index
    %c0_6 = arith.constant 0 : index
    %c0_7 = arith.constant 0 : index
    %8 = vector.load %arg3[%c0_5, %c0_6, %c0_7] : memref<1x1x16xf32, #tpu.memory_space<vmem>>, vector<1x1x16xf32>
    %9 = vector.shape_cast %8 : vector<1x1x16xf32> to vector<1x16xf32>
    %cst = arith.constant 0.000000e+00 : f32
    %10 = vector.broadcast %cst : f32 to vector<1x16xf32>
    %11 = arith.cmpf one, %9, %10 : vector<1x16xf32>
    %cst_8 = arith.constant 0.000000e+00 : f32
    %12 = vector.broadcast %cst_8 : f32 to vector<8x128xf32>
    %c0_9 = arith.constant 0 : index
    %c0_10 = arith.constant 0 : index
    %c0_11 = arith.constant 0 : index
    %13 = vector.load %arg4[%c0_9, %c0_10, %c0_11] : memref<4x128x32xbf16, #tpu.memory_space<vmem>>, vector<1x128x32xbf16>
    %14 = vector.shape_cast %13 : vector<1x128x32xbf16> to vector<128x32xbf16>
    %cst_12 = arith.constant dense<0.000000e+00> : vector<8x32xf32>
    %15 = tpu.matmul %1, %14, %cst_12 {dimension_numbers = #tpu.dot_dimension_numbers<[1], [0], [0], [1], [0, 0, 1, 1], [], []>} : vector<8x128xbf16>, vector<128x32xbf16>, vector<8x32xf32> -> vector<8x32xf32>
    %c0_13 = arith.constant 0 : index
    %c0_14 = arith.constant 0 : index
    %c0_15 = arith.constant 0 : index
    %16 = vector.load %arg5[%c0_13, %c0_14, %c0_15] : memref<4x1x32xf32, #tpu.memory_space<vmem>>, vector<1x1x32xf32>
    %17 = vector.shape_cast %16 : vector<1x1x32xf32> to vector<1x32xf32>
    %18 = vector.broadcast %17 : vector<1x32xf32> to vector<8x32xf32>
    %19 = arith.addf %15, %18 : vector<8x32xf32>
    %20 = arith.truncf %19 : vector<8x32xf32> to vector<8x32xbf16>
    %c0_16 = arith.constant 0 : index
    %c0_17 = arith.constant 0 : index
    %c0_18 = arith.constant 0 : index
    %21 = vector.load %arg6[%c0_16, %c0_17, %c0_18] : memref<4x128x32xbf16, #tpu.memory_space<vmem>>, vector<1x128x32xbf16>
    %22 = vector.shape_cast %21 : vector<1x128x32xbf16> to vector<128x32xbf16>
    %cst_19 = arith.constant dense<0.000000e+00> : vector<8x32xf32>
    %23 = tpu.matmul %1, %22, %cst_19 {dimension_numbers = #tpu.dot_dimension_numbers<[1], [0], [0], [1], [0, 0, 1, 1], [], []>} : vector<8x128xbf16>, vector<128x32xbf16>, vector<8x32xf32> -> vector<8x32xf32>
    %c0_20 = arith.constant 0 : index
    %c0_21 = arith.constant 0 : index
    %c0_22 = arith.constant 0 : index
    %24 = vector.load %arg7[%c0_20, %c0_21, %c0_22] : memref<4x1x32xf32, #tpu.memory_space<vmem>>, vector<1x1x32xf32>
    %25 = vector.shape_cast %24 : vector<1x1x32xf32> to vector<1x32xf32>
    %26 = vector.broadcast %25 : vector<1x32xf32> to vector<8x32xf32>
    %27 = arith.addf %23, %26 : vector<8x32xf32>
    %28 = arith.truncf %27 : vector<8x32xf32> to vector<8x32xbf16>
    %c0_23 = arith.constant 0 : index
    %c0_24 = arith.constant 0 : index
    %c0_25 = arith.constant 0 : index
    %29 = vector.load %arg8[%c0_23, %c0_24, %c0_25] : memref<4x128x32xbf16, #tpu.memory_space<vmem>>, vector<1x128x32xbf16>
    %30 = vector.shape_cast %29 : vector<1x128x32xbf16> to vector<128x32xbf16>
    %cst_26 = arith.constant dense<0.000000e+00> : vector<8x32xf32>
    %31 = tpu.matmul %1, %30, %cst_26 {dimension_numbers = #tpu.dot_dimension_numbers<[1], [0], [0], [1], [0, 0, 1, 1], [], []>} : vector<8x128xbf16>, vector<128x32xbf16>, vector<8x32xf32> -> vector<8x32xf32>
    %c0_27 = arith.constant 0 : index
    %c0_28 = arith.constant 0 : index
    %c0_29 = arith.constant 0 : index
    %32 = vector.load %arg9[%c0_27, %c0_28, %c0_29] : memref<4x1x32xf32, #tpu.memory_space<vmem>>, vector<1x1x32xf32>
    %33 = vector.shape_cast %32 : vector<1x1x32xf32> to vector<1x32xf32>
    %34 = vector.broadcast %33 : vector<1x32xf32> to vector<8x32xf32>
    %35 = arith.addf %31, %34 : vector<8x32xf32>
    %36 = arith.truncf %35 : vector<8x32xf32> to vector<8x32xbf16>
    %cst_30 = arith.constant dense<0.000000e+00> : vector<8x8xf32>
    %37 = tpu.matmul %20, %28, %cst_30 {dimension_numbers = #tpu.dot_dimension_numbers<[1], [1], [0], [0], [0, 0, 1, 0], [], []>} : vector<8x32xbf16>, vector<8x32xbf16>, vector<8x8xf32> -> vector<8x8xf32>
    %cst_31 = arith.constant -1.000000e+10 : f32
    %38 = vector.broadcast %cst_31 : f32 to vector<8x8xf32>
    %39 = arith.select %7, %37, %38 : vector<8x8xi1>, vector<8x8xf32>
    %cst_32 = arith.constant dense<0xFF800000> : vector<8xf32>
    %40 = vector.multi_reduction <maximumf>, %39, %cst_32 [1] : vector<8x8xf32> to vector<8xf32>
    %41 = vector.shape_cast %40 : vector<8xf32> to vector<8x1xf32>
    %42 = vector.broadcast %41 : vector<8x1xf32> to vector<8x8xf32>
    %43 = arith.subf %39, %42 : vector<8x8xf32>
    %44 = math.exp %43 : vector<8x8xf32>
    %cst_33 = arith.constant dense<0.000000e+00> : vector<8xf32>
    %45 = vector.multi_reduction <add>, %44, %cst_33 [1] : vector<8x8xf32> to vector<8xf32>
    %46 = vector.shape_cast %45 : vector<8xf32> to vector<8x1xf32>
    %47 = tpu.reciprocal %46 {approx = true} : vector<8x1xf32> -> vector<8x1xf32>
    %48 = vector.broadcast %47 : vector<8x1xf32> to vector<8x8xf32>
    %49 = arith.mulf %44, %48 : vector<8x8xf32>
    %50 = arith.truncf %49 : vector<8x8xf32> to vector<8x8xbf16>
    %cst_34 = arith.constant dense<0.000000e+00> : vector<8x32xf32>
    %51 = tpu.matmul %50, %36, %cst_34 {dimension_numbers = #tpu.dot_dimension_numbers<[1], [0], [0], [1], [0, 0, 1, 1], [], []>} : vector<8x8xbf16>, vector<8x32xbf16>, vector<8x32xf32> -> vector<8x32xf32>
    %52 = arith.truncf %51 : vector<8x32xf32> to vector<8x32xbf16>
    %c0_35 = arith.constant 0 : index
    %c0_36 = arith.constant 0 : index
    %c0_37 = arith.constant 0 : index
    %53 = vector.load %arg10[%c0_35, %c0_36, %c0_37] : memref<4x32x128xbf16, #tpu.memory_space<vmem>>, vector<1x32x128xbf16>
    %54 = vector.shape_cast %53 : vector<1x32x128xbf16> to vector<32x128xbf16>
    %cst_38 = arith.constant dense<0.000000e+00> : vector<8x128xf32>
    %55 = tpu.matmul %52, %54, %cst_38 {dimension_numbers = #tpu.dot_dimension_numbers<[1], [0], [0], [1], [0, 0, 1, 1], [], []>} : vector<8x32xbf16>, vector<32x128xbf16>, vector<8x128xf32> -> vector<8x128xf32>
    %56 = arith.addf %12, %55 : vector<8x128xf32>
    %c1 = arith.constant 1 : index
    %c0_39 = arith.constant 0 : index
    %c0_40 = arith.constant 0 : index
    %57 = vector.load %arg4[%c1, %c0_39, %c0_40] : memref<4x128x32xbf16, #tpu.memory_space<vmem>>, vector<1x128x32xbf16>
    %58 = vector.shape_cast %57 : vector<1x128x32xbf16> to vector<128x32xbf16>
    %cst_41 = arith.constant dense<0.000000e+00> : vector<8x32xf32>
    %59 = tpu.matmul %1, %58, %cst_41 {dimension_numbers = #tpu.dot_dimension_numbers<[1], [0], [0], [1], [0, 0, 1, 1], [], []>} : vector<8x128xbf16>, vector<128x32xbf16>, vector<8x32xf32> -> vector<8x32xf32>
    %c1_42 = arith.constant 1 : index
    %c0_43 = arith.constant 0 : index
    %c0_44 = arith.constant 0 : index
    %60 = vector.load %arg5[%c1_42, %c0_43, %c0_44] : memref<4x1x32xf32, #tpu.memory_space<vmem>>, vector<1x1x32xf32>
    %61 = vector.shape_cast %60 : vector<1x1x32xf32> to vector<1x32xf32>
    %62 = vector.broadcast %61 : vector<1x32xf32> to vector<8x32xf32>
    %63 = arith.addf %59, %62 : vector<8x32xf32>
    %64 = arith.truncf %63 : vector<8x32xf32> to vector<8x32xbf16>
    %c1_45 = arith.constant 1 : index
    %c0_46 = arith.constant 0 : index
    %c0_47 = arith.constant 0 : index
    %65 = vector.load %arg6[%c1_45, %c0_46, %c0_47] : memref<4x128x32xbf16, #tpu.memory_space<vmem>>, vector<1x128x32xbf16>
    %66 = vector.shape_cast %65 : vector<1x128x32xbf16> to vector<128x32xbf16>
    %cst_48 = arith.constant dense<0.000000e+00> : vector<8x32xf32>
    %67 = tpu.matmul %1, %66, %cst_48 {dimension_numbers = #tpu.dot_dimension_numbers<[1], [0], [0], [1], [0, 0, 1, 1], [], []>} : vector<8x128xbf16>, vector<128x32xbf16>, vector<8x32xf32> -> vector<8x32xf32>
    %c1_49 = arith.constant 1 : index
    %c0_50 = arith.constant 0 : index
    %c0_51 = arith.constant 0 : index
    %68 = vector.load %arg7[%c1_49, %c0_50, %c0_51] : memref<4x1x32xf32, #tpu.memory_space<vmem>>, vector<1x1x32xf32>
    %69 = vector.shape_cast %68 : vector<1x1x32xf32> to vector<1x32xf32>
    %70 = vector.broadcast %69 : vector<1x32xf32> to vector<8x32xf32>
    %71 = arith.addf %67, %70 : vector<8x32xf32>
    %72 = arith.truncf %71 : vector<8x32xf32> to vector<8x32xbf16>
    %c1_52 = arith.constant 1 : index
    %c0_53 = arith.constant 0 : index
    %c0_54 = arith.constant 0 : index
    %73 = vector.load %arg8[%c1_52, %c0_53, %c0_54] : memref<4x128x32xbf16, #tpu.memory_space<vmem>>, vector<1x128x32xbf16>
    %74 = vector.shape_cast %73 : vector<1x128x32xbf16> to vector<128x32xbf16>
    %cst_55 = arith.constant dense<0.000000e+00> : vector<8x32xf32>
    %75 = tpu.matmul %1, %74, %cst_55 {dimension_numbers = #tpu.dot_dimension_numbers<[1], [0], [0], [1], [0, 0, 1, 1], [], []>} : vector<8x128xbf16>, vector<128x32xbf16>, vector<8x32xf32> -> vector<8x32xf32>
    %c1_56 = arith.constant 1 : index
    %c0_57 = arith.constant 0 : index
    %c0_58 = arith.constant 0 : index
    %76 = vector.load %arg9[%c1_56, %c0_57, %c0_58] : memref<4x1x32xf32, #tpu.memory_space<vmem>>, vector<1x1x32xf32>
    %77 = vector.shape_cast %76 : vector<1x1x32xf32> to vector<1x32xf32>
    %78 = vector.broadcast %77 : vector<1x32xf32> to vector<8x32xf32>
    %79 = arith.addf %75, %78 : vector<8x32xf32>
    %80 = arith.truncf %79 : vector<8x32xf32> to vector<8x32xbf16>
    %cst_59 = arith.constant dense<0.000000e+00> : vector<8x8xf32>
    %81 = tpu.matmul %64, %72, %cst_59 {dimension_numbers = #tpu.dot_dimension_numbers<[1], [1], [0], [0], [0, 0, 1, 0], [], []>} : vector<8x32xbf16>, vector<8x32xbf16>, vector<8x8xf32> -> vector<8x8xf32>
    %cst_60 = arith.constant -1.000000e+10 : f32
    %82 = vector.broadcast %cst_60 : f32 to vector<8x8xf32>
    %83 = arith.select %7, %81, %82 : vector<8x8xi1>, vector<8x8xf32>
    %cst_61 = arith.constant dense<0xFF800000> : vector<8xf32>
    %84 = vector.multi_reduction <maximumf>, %83, %cst_61 [1] : vector<8x8xf32> to vector<8xf32>
    %85 = vector.shape_cast %84 : vector<8xf32> to vector<8x1xf32>
    %86 = vector.broadcast %85 : vector<8x1xf32> to vector<8x8xf32>
    %87 = arith.subf %83, %86 : vector<8x8xf32>
    %88 = math.exp %87 : vector<8x8xf32>
    %cst_62 = arith.constant dense<0.000000e+00> : vector<8xf32>
    %89 = vector.multi_reduction <add>, %88, %cst_62 [1] : vector<8x8xf32> to vector<8xf32>
    %90 = vector.shape_cast %89 : vector<8xf32> to vector<8x1xf32>
    %91 = tpu.reciprocal %90 {approx = true} : vector<8x1xf32> -> vector<8x1xf32>
    %92 = vector.broadcast %91 : vector<8x1xf32> to vector<8x8xf32>
    %93 = arith.mulf %88, %92 : vector<8x8xf32>
    %94 = arith.truncf %93 : vector<8x8xf32> to vector<8x8xbf16>
    %cst_63 = arith.constant dense<0.000000e+00> : vector<8x32xf32>
    %95 = tpu.matmul %94, %80, %cst_63 {dimension_numbers = #tpu.dot_dimension_numbers<[1], [0], [0], [1], [0, 0, 1, 1], [], []>} : vector<8x8xbf16>, vector<8x32xbf16>, vector<8x32xf32> -> vector<8x32xf32>
    %96 = arith.truncf %95 : vector<8x32xf32> to vector<8x32xbf16>
    %c1_64 = arith.constant 1 : index
    %c0_65 = arith.constant 0 : index
    %c0_66 = arith.constant 0 : index
    %97 = vector.load %arg10[%c1_64, %c0_65, %c0_66] : memref<4x32x128xbf16, #tpu.memory_space<vmem>>, vector<1x32x128xbf16>
    %98 = vector.shape_cast %97 : vector<1x32x128xbf16> to vector<32x128xbf16>
    %cst_67 = arith.constant dense<0.000000e+00> : vector<8x128xf32>
    %99 = tpu.matmul %96, %98, %cst_67 {dimension_numbers = #tpu.dot_dimension_numbers<[1], [0], [0], [1], [0, 0, 1, 1], [], []>} : vector<8x32xbf16>, vector<32x128xbf16>, vector<8x128xf32> -> vector<8x128xf32>
    %100 = arith.addf %56, %99 : vector<8x128xf32>
    %c2 = arith.constant 2 : index
    %c0_68 = arith.constant 0 : index
    %c0_69 = arith.constant 0 : index
    %101 = vector.load %arg4[%c2, %c0_68, %c0_69] : memref<4x128x32xbf16, #tpu.memory_space<vmem>>, vector<1x128x32xbf16>
    %102 = vector.shape_cast %101 : vector<1x128x32xbf16> to vector<128x32xbf16>
    %cst_70 = arith.constant dense<0.000000e+00> : vector<8x32xf32>
    %103 = tpu.matmul %1, %102, %cst_70 {dimension_numbers = #tpu.dot_dimension_numbers<[1], [0], [0], [1], [0, 0, 1, 1], [], []>} : vector<8x128xbf16>, vector<128x32xbf16>, vector<8x32xf32> -> vector<8x32xf32>
    %c2_71 = arith.constant 2 : index
    %c0_72 = arith.constant 0 : index
    %c0_73 = arith.constant 0 : index
    %104 = vector.load %arg5[%c2_71, %c0_72, %c0_73] : memref<4x1x32xf32, #tpu.memory_space<vmem>>, vector<1x1x32xf32>
    %105 = vector.shape_cast %104 : vector<1x1x32xf32> to vector<1x32xf32>
    %106 = vector.broadcast %105 : vector<1x32xf32> to vector<8x32xf32>
    %107 = arith.addf %103, %106 : vector<8x32xf32>
    %108 = arith.truncf %107 : vector<8x32xf32> to vector<8x32xbf16>
    %c2_74 = arith.constant 2 : index
    %c0_75 = arith.constant 0 : index
    %c0_76 = arith.constant 0 : index
    %109 = vector.load %arg6[%c2_74, %c0_75, %c0_76] : memref<4x128x32xbf16, #tpu.memory_space<vmem>>, vector<1x128x32xbf16>
    %110 = vector.shape_cast %109 : vector<1x128x32xbf16> to vector<128x32xbf16>
    %cst_77 = arith.constant dense<0.000000e+00> : vector<8x32xf32>
    %111 = tpu.matmul %1, %110, %cst_77 {dimension_numbers = #tpu.dot_dimension_numbers<[1], [0], [0], [1], [0, 0, 1, 1], [], []>} : vector<8x128xbf16>, vector<128x32xbf16>, vector<8x32xf32> -> vector<8x32xf32>
    %c2_78 = arith.constant 2 : index
    %c0_79 = arith.constant 0 : index
    %c0_80 = arith.constant 0 : index
    %112 = vector.load %arg7[%c2_78, %c0_79, %c0_80] : memref<4x1x32xf32, #tpu.memory_space<vmem>>, vector<1x1x32xf32>
    %113 = vector.shape_cast %112 : vector<1x1x32xf32> to vector<1x32xf32>
    %114 = vector.broadcast %113 : vector<1x32xf32> to vector<8x32xf32>
    %115 = arith.addf %111, %114 : vector<8x32xf32>
    %116 = arith.truncf %115 : vector<8x32xf32> to vector<8x32xbf16>
    %c2_81 = arith.constant 2 : index
    %c0_82 = arith.constant 0 : index
    %c0_83 = arith.constant 0 : index
    %117 = vector.load %arg8[%c2_81, %c0_82, %c0_83] : memref<4x128x32xbf16, #tpu.memory_space<vmem>>, vector<1x128x32xbf16>
    %118 = vector.shape_cast %117 : vector<1x128x32xbf16> to vector<128x32xbf16>
    %cst_84 = arith.constant dense<0.000000e+00> : vector<8x32xf32>
    %119 = tpu.matmul %1, %118, %cst_84 {dimension_numbers = #tpu.dot_dimension_numbers<[1], [0], [0], [1], [0, 0, 1, 1], [], []>} : vector<8x128xbf16>, vector<128x32xbf16>, vector<8x32xf32> -> vector<8x32xf32>
    %c2_85 = arith.constant 2 : index
    %c0_86 = arith.constant 0 : index
    %c0_87 = arith.constant 0 : index
    %120 = vector.load %arg9[%c2_85, %c0_86, %c0_87] : memref<4x1x32xf32, #tpu.memory_space<vmem>>, vector<1x1x32xf32>
    %121 = vector.shape_cast %120 : vector<1x1x32xf32> to vector<1x32xf32>
    %122 = vector.broadcast %121 : vector<1x32xf32> to vector<8x32xf32>
    %123 = arith.addf %119, %122 : vector<8x32xf32>
    %124 = arith.truncf %123 : vector<8x32xf32> to vector<8x32xbf16>
    %cst_88 = arith.constant dense<0.000000e+00> : vector<8x8xf32>
    %125 = tpu.matmul %108, %116, %cst_88 {dimension_numbers = #tpu.dot_dimension_numbers<[1], [1], [0], [0], [0, 0, 1, 0], [], []>} : vector<8x32xbf16>, vector<8x32xbf16>, vector<8x8xf32> -> vector<8x8xf32>
    %cst_89 = arith.constant -1.000000e+10 : f32
    %126 = vector.broadcast %cst_89 : f32 to vector<8x8xf32>
    %127 = arith.select %7, %125, %126 : vector<8x8xi1>, vector<8x8xf32>
    %cst_90 = arith.constant dense<0xFF800000> : vector<8xf32>
    %128 = vector.multi_reduction <maximumf>, %127, %cst_90 [1] : vector<8x8xf32> to vector<8xf32>
    %129 = vector.shape_cast %128 : vector<8xf32> to vector<8x1xf32>
    %130 = vector.broadcast %129 : vector<8x1xf32> to vector<8x8xf32>
    %131 = arith.subf %127, %130 : vector<8x8xf32>
    %132 = math.exp %131 : vector<8x8xf32>
    %cst_91 = arith.constant dense<0.000000e+00> : vector<8xf32>
    %133 = vector.multi_reduction <add>, %132, %cst_91 [1] : vector<8x8xf32> to vector<8xf32>
    %134 = vector.shape_cast %133 : vector<8xf32> to vector<8x1xf32>
    %135 = tpu.reciprocal %134 {approx = true} : vector<8x1xf32> -> vector<8x1xf32>
    %136 = vector.broadcast %135 : vector<8x1xf32> to vector<8x8xf32>
    %137 = arith.mulf %132, %136 : vector<8x8xf32>
    %138 = arith.truncf %137 : vector<8x8xf32> to vector<8x8xbf16>
    %cst_92 = arith.constant dense<0.000000e+00> : vector<8x32xf32>
    %139 = tpu.matmul %138, %124, %cst_92 {dimension_numbers = #tpu.dot_dimension_numbers<[1], [0], [0], [1], [0, 0, 1, 1], [], []>} : vector<8x8xbf16>, vector<8x32xbf16>, vector<8x32xf32> -> vector<8x32xf32>
    %140 = arith.truncf %139 : vector<8x32xf32> to vector<8x32xbf16>
    %c2_93 = arith.constant 2 : index
    %c0_94 = arith.constant 0 : index
    %c0_95 = arith.constant 0 : index
    %141 = vector.load %arg10[%c2_93, %c0_94, %c0_95] : memref<4x32x128xbf16, #tpu.memory_space<vmem>>, vector<1x32x128xbf16>
    %142 = vector.shape_cast %141 : vector<1x32x128xbf16> to vector<32x128xbf16>
    %cst_96 = arith.constant dense<0.000000e+00> : vector<8x128xf32>
    %143 = tpu.matmul %140, %142, %cst_96 {dimension_numbers = #tpu.dot_dimension_numbers<[1], [0], [0], [1], [0, 0, 1, 1], [], []>} : vector<8x32xbf16>, vector<32x128xbf16>, vector<8x128xf32> -> vector<8x128xf32>
    %144 = arith.addf %100, %143 : vector<8x128xf32>
    %c3 = arith.constant 3 : index
    %c0_97 = arith.constant 0 : index
    %c0_98 = arith.constant 0 : index
    %145 = vector.load %arg4[%c3, %c0_97, %c0_98] : memref<4x128x32xbf16, #tpu.memory_space<vmem>>, vector<1x128x32xbf16>
    %146 = vector.shape_cast %145 : vector<1x128x32xbf16> to vector<128x32xbf16>
    %cst_99 = arith.constant dense<0.000000e+00> : vector<8x32xf32>
    %147 = tpu.matmul %1, %146, %cst_99 {dimension_numbers = #tpu.dot_dimension_numbers<[1], [0], [0], [1], [0, 0, 1, 1], [], []>} : vector<8x128xbf16>, vector<128x32xbf16>, vector<8x32xf32> -> vector<8x32xf32>
    %c3_100 = arith.constant 3 : index
    %c0_101 = arith.constant 0 : index
    %c0_102 = arith.constant 0 : index
    %148 = vector.load %arg5[%c3_100, %c0_101, %c0_102] : memref<4x1x32xf32, #tpu.memory_space<vmem>>, vector<1x1x32xf32>
    %149 = vector.shape_cast %148 : vector<1x1x32xf32> to vector<1x32xf32>
    %150 = vector.broadcast %149 : vector<1x32xf32> to vector<8x32xf32>
    %151 = arith.addf %147, %150 : vector<8x32xf32>
    %152 = arith.truncf %151 : vector<8x32xf32> to vector<8x32xbf16>
    %c3_103 = arith.constant 3 : index
    %c0_104 = arith.constant 0 : index
    %c0_105 = arith.constant 0 : index
    %153 = vector.load %arg6[%c3_103, %c0_104, %c0_105] : memref<4x128x32xbf16, #tpu.memory_space<vmem>>, vector<1x128x32xbf16>
    %154 = vector.shape_cast %153 : vector<1x128x32xbf16> to vector<128x32xbf16>
    %cst_106 = arith.constant dense<0.000000e+00> : vector<8x32xf32>
    %155 = tpu.matmul %1, %154, %cst_106 {dimension_numbers = #tpu.dot_dimension_numbers<[1], [0], [0], [1], [0, 0, 1, 1], [], []>} : vector<8x128xbf16>, vector<128x32xbf16>, vector<8x32xf32> -> vector<8x32xf32>
    %c3_107 = arith.constant 3 : index
    %c0_108 = arith.constant 0 : index
    %c0_109 = arith.constant 0 : index
    %156 = vector.load %arg7[%c3_107, %c0_108, %c0_109] : memref<4x1x32xf32, #tpu.memory_space<vmem>>, vector<1x1x32xf32>
    %157 = vector.shape_cast %156 : vector<1x1x32xf32> to vector<1x32xf32>
    %158 = vector.broadcast %157 : vector<1x32xf32> to vector<8x32xf32>
    %159 = arith.addf %155, %158 : vector<8x32xf32>
    %160 = arith.truncf %159 : vector<8x32xf32> to vector<8x32xbf16>
    %c3_110 = arith.constant 3 : index
    %c0_111 = arith.constant 0 : index
    %c0_112 = arith.constant 0 : index
    %161 = vector.load %arg8[%c3_110, %c0_111, %c0_112] : memref<4x128x32xbf16, #tpu.memory_space<vmem>>, vector<1x128x32xbf16>
    %162 = vector.shape_cast %161 : vector<1x128x32xbf16> to vector<128x32xbf16>
    %cst_113 = arith.constant dense<0.000000e+00> : vector<8x32xf32>
    %163 = tpu.matmul %1, %162, %cst_113 {dimension_numbers = #tpu.dot_dimension_numbers<[1], [0], [0], [1], [0, 0, 1, 1], [], []>} : vector<8x128xbf16>, vector<128x32xbf16>, vector<8x32xf32> -> vector<8x32xf32>
    %c3_114 = arith.constant 3 : index
    %c0_115 = arith.constant 0 : index
    %c0_116 = arith.constant 0 : index
    %164 = vector.load %arg9[%c3_114, %c0_115, %c0_116] : memref<4x1x32xf32, #tpu.memory_space<vmem>>, vector<1x1x32xf32>
    %165 = vector.shape_cast %164 : vector<1x1x32xf32> to vector<1x32xf32>
    %166 = vector.broadcast %165 : vector<1x32xf32> to vector<8x32xf32>
    %167 = arith.addf %163, %166 : vector<8x32xf32>
    %168 = arith.truncf %167 : vector<8x32xf32> to vector<8x32xbf16>
    %cst_117 = arith.constant dense<0.000000e+00> : vector<8x8xf32>
    %169 = tpu.matmul %152, %160, %cst_117 {dimension_numbers = #tpu.dot_dimension_numbers<[1], [1], [0], [0], [0, 0, 1, 0], [], []>} : vector<8x32xbf16>, vector<8x32xbf16>, vector<8x8xf32> -> vector<8x8xf32>
    %cst_118 = arith.constant -1.000000e+10 : f32
    %170 = vector.broadcast %cst_118 : f32 to vector<8x8xf32>
    %171 = arith.select %7, %169, %170 : vector<8x8xi1>, vector<8x8xf32>
    %cst_119 = arith.constant dense<0xFF800000> : vector<8xf32>
    %172 = vector.multi_reduction <maximumf>, %171, %cst_119 [1] : vector<8x8xf32> to vector<8xf32>
    %173 = vector.shape_cast %172 : vector<8xf32> to vector<8x1xf32>
    %174 = vector.broadcast %173 : vector<8x1xf32> to vector<8x8xf32>
    %175 = arith.subf %171, %174 : vector<8x8xf32>
    %176 = math.exp %175 : vector<8x8xf32>
    %cst_120 = arith.constant dense<0.000000e+00> : vector<8xf32>
    %177 = vector.multi_reduction <add>, %176, %cst_120 [1] : vector<8x8xf32> to vector<8xf32>
    %178 = vector.shape_cast %177 : vector<8xf32> to vector<8x1xf32>
    %179 = tpu.reciprocal %178 {approx = true} : vector<8x1xf32> -> vector<8x1xf32>
    %180 = vector.broadcast %179 : vector<8x1xf32> to vector<8x8xf32>
    %181 = arith.mulf %176, %180 : vector<8x8xf32>
    %182 = arith.truncf %181 : vector<8x8xf32> to vector<8x8xbf16>
    %cst_121 = arith.constant dense<0.000000e+00> : vector<8x32xf32>
    %183 = tpu.matmul %182, %168, %cst_121 {dimension_numbers = #tpu.dot_dimension_numbers<[1], [0], [0], [1], [0, 0, 1, 1], [], []>} : vector<8x8xbf16>, vector<8x32xbf16>, vector<8x32xf32> -> vector<8x32xf32>
    %184 = arith.truncf %183 : vector<8x32xf32> to vector<8x32xbf16>
    %c3_122 = arith.constant 3 : index
    %c0_123 = arith.constant 0 : index
    %c0_124 = arith.constant 0 : index
    %185 = vector.load %arg10[%c3_122, %c0_123, %c0_124] : memref<4x32x128xbf16, #tpu.memory_space<vmem>>, vector<1x32x128xbf16>
    %186 = vector.shape_cast %185 : vector<1x32x128xbf16> to vector<32x128xbf16>
    %cst_125 = arith.constant dense<0.000000e+00> : vector<8x128xf32>
    %187 = tpu.matmul %184, %186, %cst_125 {dimension_numbers = #tpu.dot_dimension_numbers<[1], [0], [0], [1], [0, 0, 1, 1], [], []>} : vector<8x32xbf16>, vector<32x128xbf16>, vector<8x128xf32> -> vector<8x128xf32>
    %188 = arith.addf %144, %187 : vector<8x128xf32>
    %c0_126 = arith.constant 0 : index
    %c0_127 = arith.constant 0 : index
    %189 = vector.load %arg11[%c0_126, %c0_127] : memref<1x128xf32, #tpu.memory_space<vmem>>, vector<1x128xf32>
    %190 = vector.broadcast %189 : vector<1x128xf32> to vector<8x128xf32>
    %191 = arith.addf %188, %190 : vector<8x128xf32>
    %192 = arith.addf %2, %191 : vector<8x128xf32>
    %cst_128 = arith.constant dense<0.000000e+00> : vector<8xf32>
    %193 = vector.multi_reduction <add>, %192, %cst_128 [1] : vector<8x128xf32> to vector<8xf32>
    %194 = vector.shape_cast %193 : vector<8xf32> to vector<8x1xf32>
    %cst_129 = arith.constant 1.280000e+02 : f32
    %195 = vector.broadcast %cst_129 : f32 to vector<8x1xf32>
    %196 = arith.divf %194, %195 : vector<8x1xf32>
    %197 = vector.broadcast %196 : vector<8x1xf32> to vector<8x128xf32>
    %198 = arith.subf %192, %197 : vector<8x128xf32>
    %199 = arith.mulf %198, %198 : vector<8x128xf32>
    %cst_130 = arith.constant dense<0.000000e+00> : vector<8xf32>
    %200 = vector.multi_reduction <add>, %199, %cst_130 [1] : vector<8x128xf32> to vector<8xf32>
    %201 = vector.shape_cast %200 : vector<8xf32> to vector<8x1xf32>
    %cst_131 = arith.constant 1.280000e+02 : f32
    %202 = vector.broadcast %cst_131 : f32 to vector<8x1xf32>
    %203 = arith.divf %201, %202 : vector<8x1xf32>
    %cst_132 = arith.constant 9.99999974E-6 : f32
    %204 = vector.broadcast %cst_132 : f32 to vector<8x1xf32>
    %205 = arith.addf %203, %204 : vector<8x1xf32>
    %206 = math.rsqrt %205 : vector<8x1xf32>
    %207 = vector.broadcast %206 : vector<8x1xf32> to vector<8x128xf32>
    %208 = arith.mulf %198, %207 : vector<8x128xf32>
    %c0_133 = arith.constant 0 : index
    %c0_134 = arith.constant 0 : index
    %209 = vector.load %arg12[%c0_133, %c0_134] : memref<1x128xf32, #tpu.memory_space<vmem>>, vector<1x128xf32>
    %210 = vector.broadcast %209 : vector<1x128xf32> to vector<8x128xf32>
    %211 = arith.mulf %208, %210 : vector<8x128xf32>
    %c0_135 = arith.constant 0 : index
    %c0_136 = arith.constant 0 : index
    %212 = vector.load %arg13[%c0_135, %c0_136] : memref<1x128xf32, #tpu.memory_space<vmem>>, vector<1x128xf32>
    %213 = vector.broadcast %212 : vector<1x128xf32> to vector<8x128xf32>
    %214 = arith.addf %211, %213 : vector<8x128xf32>
    %215 = arith.truncf %214 : vector<8x128xf32> to vector<8x128xbf16>
    %cst_137 = arith.constant 0.000000e+00 : f32
    %216 = vector.broadcast %cst_137 : f32 to vector<8x128xf32>
    %c0_138 = arith.constant 0 : index
    %c0_139 = arith.constant 0 : index
    %c0_140 = arith.constant 0 : index
    %217 = vector.load %arg14[%c0_138, %c0_139, %c0_140] : memref<4x128x32xbf16, #tpu.memory_space<vmem>>, vector<1x128x32xbf16>
    %218 = vector.shape_cast %217 : vector<1x128x32xbf16> to vector<128x32xbf16>
    %cst_141 = arith.constant dense<0.000000e+00> : vector<8x32xf32>
    %219 = tpu.matmul %215, %218, %cst_141 {dimension_numbers = #tpu.dot_dimension_numbers<[1], [0], [0], [1], [0, 0, 1, 1], [], []>} : vector<8x128xbf16>, vector<128x32xbf16>, vector<8x32xf32> -> vector<8x32xf32>
    %c0_142 = arith.constant 0 : index
    %c0_143 = arith.constant 0 : index
    %c0_144 = arith.constant 0 : index
    %220 = vector.load %arg15[%c0_142, %c0_143, %c0_144] : memref<4x1x32xf32, #tpu.memory_space<vmem>>, vector<1x1x32xf32>
    %221 = vector.shape_cast %220 : vector<1x1x32xf32> to vector<1x32xf32>
    %222 = vector.broadcast %221 : vector<1x32xf32> to vector<8x32xf32>
    %223 = arith.addf %219, %222 : vector<8x32xf32>
    %224 = arith.truncf %223 : vector<8x32xf32> to vector<8x32xbf16>
    %c0_145 = arith.constant 0 : index
    %c0_146 = arith.constant 0 : index
    %c0_147 = arith.constant 0 : index
    %225 = vector.load %arg16[%c0_145, %c0_146, %c0_147] : memref<4x128x32xbf16, #tpu.memory_space<vmem>>, vector<1x128x32xbf16>
    %226 = vector.shape_cast %225 : vector<1x128x32xbf16> to vector<128x32xbf16>
    %cst_148 = arith.constant dense<0.000000e+00> : vector<16x32xf32>
    %227 = tpu.matmul %4, %226, %cst_148 {dimension_numbers = #tpu.dot_dimension_numbers<[1], [0], [0], [1], [0, 0, 1, 1], [], []>} : vector<16x128xbf16>, vector<128x32xbf16>, vector<16x32xf32> -> vector<16x32xf32>
    %c0_149 = arith.constant 0 : index
    %c0_150 = arith.constant 0 : index
    %c0_151 = arith.constant 0 : index
    %228 = vector.load %arg17[%c0_149, %c0_150, %c0_151] : memref<4x1x32xf32, #tpu.memory_space<vmem>>, vector<1x1x32xf32>
    %229 = vector.shape_cast %228 : vector<1x1x32xf32> to vector<1x32xf32>
    %230 = vector.broadcast %229 : vector<1x32xf32> to vector<16x32xf32>
    %231 = arith.addf %227, %230 : vector<16x32xf32>
    %232 = arith.truncf %231 : vector<16x32xf32> to vector<16x32xbf16>
    %c0_152 = arith.constant 0 : index
    %c0_153 = arith.constant 0 : index
    %c0_154 = arith.constant 0 : index
    %233 = vector.load %arg18[%c0_152, %c0_153, %c0_154] : memref<4x128x32xbf16, #tpu.memory_space<vmem>>, vector<1x128x32xbf16>
    %234 = vector.shape_cast %233 : vector<1x128x32xbf16> to vector<128x32xbf16>
    %cst_155 = arith.constant dense<0.000000e+00> : vector<16x32xf32>
    %235 = tpu.matmul %4, %234, %cst_155 {dimension_numbers = #tpu.dot_dimension_numbers<[1], [0], [0], [1], [0, 0, 1, 1], [], []>} : vector<16x128xbf16>, vector<128x32xbf16>, vector<16x32xf32> -> vector<16x32xf32>
    %c0_156 = arith.constant 0 : index
    %c0_157 = arith.constant 0 : index
    %c0_158 = arith.constant 0 : index
    %236 = vector.load %arg19[%c0_156, %c0_157, %c0_158] : memref<4x1x32xf32, #tpu.memory_space<vmem>>, vector<1x1x32xf32>
    %237 = vector.shape_cast %236 : vector<1x1x32xf32> to vector<1x32xf32>
    %238 = vector.broadcast %237 : vector<1x32xf32> to vector<16x32xf32>
    %239 = arith.addf %235, %238 : vector<16x32xf32>
    %240 = arith.truncf %239 : vector<16x32xf32> to vector<16x32xbf16>
    %cst_159 = arith.constant dense<0.000000e+00> : vector<8x16xf32>
    %241 = tpu.matmul %224, %232, %cst_159 {dimension_numbers = #tpu.dot_dimension_numbers<[1], [1], [0], [0], [0, 0, 1, 0], [], []>} : vector<8x32xbf16>, vector<16x32xbf16>, vector<8x16xf32> -> vector<8x16xf32>
    %cst_160 = arith.constant -1.000000e+10 : f32
    %242 = vector.shape_cast %11 : vector<1x16xi1> to vector<1x16xi1>
    %243 = vector.broadcast %242 : vector<1x16xi1> to vector<8x16xi1>
    %244 = vector.broadcast %cst_160 : f32 to vector<8x16xf32>
    %245 = arith.select %243, %241, %244 : vector<8x16xi1>, vector<8x16xf32>
    %cst_161 = arith.constant dense<0xFF800000> : vector<8xf32>
    %246 = vector.multi_reduction <maximumf>, %245, %cst_161 [1] : vector<8x16xf32> to vector<8xf32>
    %247 = vector.shape_cast %246 : vector<8xf32> to vector<8x1xf32>
    %248 = vector.broadcast %247 : vector<8x1xf32> to vector<8x16xf32>
    %249 = arith.subf %245, %248 : vector<8x16xf32>
    %250 = math.exp %249 : vector<8x16xf32>
    %cst_162 = arith.constant dense<0.000000e+00> : vector<8xf32>
    %251 = vector.multi_reduction <add>, %250, %cst_162 [1] : vector<8x16xf32> to vector<8xf32>
    %252 = vector.shape_cast %251 : vector<8xf32> to vector<8x1xf32>
    %253 = tpu.reciprocal %252 {approx = true} : vector<8x1xf32> -> vector<8x1xf32>
    %254 = vector.broadcast %253 : vector<8x1xf32> to vector<8x16xf32>
    %255 = arith.mulf %250, %254 : vector<8x16xf32>
    %256 = arith.truncf %255 : vector<8x16xf32> to vector<8x16xbf16>
    %cst_163 = arith.constant dense<0.000000e+00> : vector<8x32xf32>
    %257 = tpu.matmul %256, %240, %cst_163 {dimension_numbers = #tpu.dot_dimension_numbers<[1], [0], [0], [1], [0, 0, 1, 1], [], []>} : vector<8x16xbf16>, vector<16x32xbf16>, vector<8x32xf32> -> vector<8x32xf32>
    %258 = arith.truncf %257 : vector<8x32xf32> to vector<8x32xbf16>
    %c0_164 = arith.constant 0 : index
    %c0_165 = arith.constant 0 : index
    %c0_166 = arith.constant 0 : index
    %259 = vector.load %arg20[%c0_164, %c0_165, %c0_166] : memref<4x32x128xbf16, #tpu.memory_space<vmem>>, vector<1x32x128xbf16>
    %260 = vector.shape_cast %259 : vector<1x32x128xbf16> to vector<32x128xbf16>
    %cst_167 = arith.constant dense<0.000000e+00> : vector<8x128xf32>
    %261 = tpu.matmul %258, %260, %cst_167 {dimension_numbers = #tpu.dot_dimension_numbers<[1], [0], [0], [1], [0, 0, 1, 1], [], []>} : vector<8x32xbf16>, vector<32x128xbf16>, vector<8x128xf32> -> vector<8x128xf32>
    %262 = arith.addf %216, %261 : vector<8x128xf32>
    %c1_168 = arith.constant 1 : index
    %c0_169 = arith.constant 0 : index
    %c0_170 = arith.constant 0 : index
    %263 = vector.load %arg14[%c1_168, %c0_169, %c0_170] : memref<4x128x32xbf16, #tpu.memory_space<vmem>>, vector<1x128x32xbf16>
    %264 = vector.shape_cast %263 : vector<1x128x32xbf16> to vector<128x32xbf16>
    %cst_171 = arith.constant dense<0.000000e+00> : vector<8x32xf32>
    %265 = tpu.matmul %215, %264, %cst_171 {dimension_numbers = #tpu.dot_dimension_numbers<[1], [0], [0], [1], [0, 0, 1, 1], [], []>} : vector<8x128xbf16>, vector<128x32xbf16>, vector<8x32xf32> -> vector<8x32xf32>
    %c1_172 = arith.constant 1 : index
    %c0_173 = arith.constant 0 : index
    %c0_174 = arith.constant 0 : index
    %266 = vector.load %arg15[%c1_172, %c0_173, %c0_174] : memref<4x1x32xf32, #tpu.memory_space<vmem>>, vector<1x1x32xf32>
    %267 = vector.shape_cast %266 : vector<1x1x32xf32> to vector<1x32xf32>
    %268 = vector.broadcast %267 : vector<1x32xf32> to vector<8x32xf32>
    %269 = arith.addf %265, %268 : vector<8x32xf32>
    %270 = arith.truncf %269 : vector<8x32xf32> to vector<8x32xbf16>
    %c1_175 = arith.constant 1 : index
    %c0_176 = arith.constant 0 : index
    %c0_177 = arith.constant 0 : index
    %271 = vector.load %arg16[%c1_175, %c0_176, %c0_177] : memref<4x128x32xbf16, #tpu.memory_space<vmem>>, vector<1x128x32xbf16>
    %272 = vector.shape_cast %271 : vector<1x128x32xbf16> to vector<128x32xbf16>
    %cst_178 = arith.constant dense<0.000000e+00> : vector<16x32xf32>
    %273 = tpu.matmul %4, %272, %cst_178 {dimension_numbers = #tpu.dot_dimension_numbers<[1], [0], [0], [1], [0, 0, 1, 1], [], []>} : vector<16x128xbf16>, vector<128x32xbf16>, vector<16x32xf32> -> vector<16x32xf32>
    %c1_179 = arith.constant 1 : index
    %c0_180 = arith.constant 0 : index
    %c0_181 = arith.constant 0 : index
    %274 = vector.load %arg17[%c1_179, %c0_180, %c0_181] : memref<4x1x32xf32, #tpu.memory_space<vmem>>, vector<1x1x32xf32>
    %275 = vector.shape_cast %274 : vector<1x1x32xf32> to vector<1x32xf32>
    %276 = vector.broadcast %275 : vector<1x32xf32> to vector<16x32xf32>
    %277 = arith.addf %273, %276 : vector<16x32xf32>
    %278 = arith.truncf %277 : vector<16x32xf32> to vector<16x32xbf16>
    %c1_182 = arith.constant 1 : index
    %c0_183 = arith.constant 0 : index
    %c0_184 = arith.constant 0 : index
    %279 = vector.load %arg18[%c1_182, %c0_183, %c0_184] : memref<4x128x32xbf16, #tpu.memory_space<vmem>>, vector<1x128x32xbf16>
    %280 = vector.shape_cast %279 : vector<1x128x32xbf16> to vector<128x32xbf16>
    %cst_185 = arith.constant dense<0.000000e+00> : vector<16x32xf32>
    %281 = tpu.matmul %4, %280, %cst_185 {dimension_numbers = #tpu.dot_dimension_numbers<[1], [0], [0], [1], [0, 0, 1, 1], [], []>} : vector<16x128xbf16>, vector<128x32xbf16>, vector<16x32xf32> -> vector<16x32xf32>
    %c1_186 = arith.constant 1 : index
    %c0_187 = arith.constant 0 : index
    %c0_188 = arith.constant 0 : index
    %282 = vector.load %arg19[%c1_186, %c0_187, %c0_188] : memref<4x1x32xf32, #tpu.memory_space<vmem>>, vector<1x1x32xf32>
    %283 = vector.shape_cast %282 : vector<1x1x32xf32> to vector<1x32xf32>
    %284 = vector.broadcast %283 : vector<1x32xf32> to vector<16x32xf32>
    %285 = arith.addf %281, %284 : vector<16x32xf32>
    %286 = arith.truncf %285 : vector<16x32xf32> to vector<16x32xbf16>
    %cst_189 = arith.constant dense<0.000000e+00> : vector<8x16xf32>
    %287 = tpu.matmul %270, %278, %cst_189 {dimension_numbers = #tpu.dot_dimension_numbers<[1], [1], [0], [0], [0, 0, 1, 0], [], []>} : vector<8x32xbf16>, vector<16x32xbf16>, vector<8x16xf32> -> vector<8x16xf32>
    %cst_190 = arith.constant -1.000000e+10 : f32
    %288 = vector.shape_cast %11 : vector<1x16xi1> to vector<1x16xi1>
    %289 = vector.broadcast %288 : vector<1x16xi1> to vector<8x16xi1>
    %290 = vector.broadcast %cst_190 : f32 to vector<8x16xf32>
    %291 = arith.select %289, %287, %290 : vector<8x16xi1>, vector<8x16xf32>
    %cst_191 = arith.constant dense<0xFF800000> : vector<8xf32>
    %292 = vector.multi_reduction <maximumf>, %291, %cst_191 [1] : vector<8x16xf32> to vector<8xf32>
    %293 = vector.shape_cast %292 : vector<8xf32> to vector<8x1xf32>
    %294 = vector.broadcast %293 : vector<8x1xf32> to vector<8x16xf32>
    %295 = arith.subf %291, %294 : vector<8x16xf32>
    %296 = math.exp %295 : vector<8x16xf32>
    %cst_192 = arith.constant dense<0.000000e+00> : vector<8xf32>
    %297 = vector.multi_reduction <add>, %296, %cst_192 [1] : vector<8x16xf32> to vector<8xf32>
    %298 = vector.shape_cast %297 : vector<8xf32> to vector<8x1xf32>
    %299 = tpu.reciprocal %298 {approx = true} : vector<8x1xf32> -> vector<8x1xf32>
    %300 = vector.broadcast %299 : vector<8x1xf32> to vector<8x16xf32>
    %301 = arith.mulf %296, %300 : vector<8x16xf32>
    %302 = arith.truncf %301 : vector<8x16xf32> to vector<8x16xbf16>
    %cst_193 = arith.constant dense<0.000000e+00> : vector<8x32xf32>
    %303 = tpu.matmul %302, %286, %cst_193 {dimension_numbers = #tpu.dot_dimension_numbers<[1], [0], [0], [1], [0, 0, 1, 1], [], []>} : vector<8x16xbf16>, vector<16x32xbf16>, vector<8x32xf32> -> vector<8x32xf32>
    %304 = arith.truncf %303 : vector<8x32xf32> to vector<8x32xbf16>
    %c1_194 = arith.constant 1 : index
    %c0_195 = arith.constant 0 : index
    %c0_196 = arith.constant 0 : index
    %305 = vector.load %arg20[%c1_194, %c0_195, %c0_196] : memref<4x32x128xbf16, #tpu.memory_space<vmem>>, vector<1x32x128xbf16>
    %306 = vector.shape_cast %305 : vector<1x32x128xbf16> to vector<32x128xbf16>
    %cst_197 = arith.constant dense<0.000000e+00> : vector<8x128xf32>
    %307 = tpu.matmul %304, %306, %cst_197 {dimension_numbers = #tpu.dot_dimension_numbers<[1], [0], [0], [1], [0, 0, 1, 1], [], []>} : vector<8x32xbf16>, vector<32x128xbf16>, vector<8x128xf32> -> vector<8x128xf32>
    %308 = arith.addf %262, %307 : vector<8x128xf32>
    %c2_198 = arith.constant 2 : index
    %c0_199 = arith.constant 0 : index
    %c0_200 = arith.constant 0 : index
    %309 = vector.load %arg14[%c2_198, %c0_199, %c0_200] : memref<4x128x32xbf16, #tpu.memory_space<vmem>>, vector<1x128x32xbf16>
    %310 = vector.shape_cast %309 : vector<1x128x32xbf16> to vector<128x32xbf16>
    %cst_201 = arith.constant dense<0.000000e+00> : vector<8x32xf32>
    %311 = tpu.matmul %215, %310, %cst_201 {dimension_numbers = #tpu.dot_dimension_numbers<[1], [0], [0], [1], [0, 0, 1, 1], [], []>} : vector<8x128xbf16>, vector<128x32xbf16>, vector<8x32xf32> -> vector<8x32xf32>
    %c2_202 = arith.constant 2 : index
    %c0_203 = arith.constant 0 : index
    %c0_204 = arith.constant 0 : index
    %312 = vector.load %arg15[%c2_202, %c0_203, %c0_204] : memref<4x1x32xf32, #tpu.memory_space<vmem>>, vector<1x1x32xf32>
    %313 = vector.shape_cast %312 : vector<1x1x32xf32> to vector<1x32xf32>
    %314 = vector.broadcast %313 : vector<1x32xf32> to vector<8x32xf32>
    %315 = arith.addf %311, %314 : vector<8x32xf32>
    %316 = arith.truncf %315 : vector<8x32xf32> to vector<8x32xbf16>
    %c2_205 = arith.constant 2 : index
    %c0_206 = arith.constant 0 : index
    %c0_207 = arith.constant 0 : index
    %317 = vector.load %arg16[%c2_205, %c0_206, %c0_207] : memref<4x128x32xbf16, #tpu.memory_space<vmem>>, vector<1x128x32xbf16>
    %318 = vector.shape_cast %317 : vector<1x128x32xbf16> to vector<128x32xbf16>
    %cst_208 = arith.constant dense<0.000000e+00> : vector<16x32xf32>
    %319 = tpu.matmul %4, %318, %cst_208 {dimension_numbers = #tpu.dot_dimension_numbers<[1], [0], [0], [1], [0, 0, 1, 1], [], []>} : vector<16x128xbf16>, vector<128x32xbf16>, vector<16x32xf32> -> vector<16x32xf32>
    %c2_209 = arith.constant 2 : index
    %c0_210 = arith.constant 0 : index
    %c0_211 = arith.constant 0 : index
    %320 = vector.load %arg17[%c2_209, %c0_210, %c0_211] : memref<4x1x32xf32, #tpu.memory_space<vmem>>, vector<1x1x32xf32>
    %321 = vector.shape_cast %320 : vector<1x1x32xf32> to vector<1x32xf32>
    %322 = vector.broadcast %321 : vector<1x32xf32> to vector<16x32xf32>
    %323 = arith.addf %319, %322 : vector<16x32xf32>
    %324 = arith.truncf %323 : vector<16x32xf32> to vector<16x32xbf16>
    %c2_212 = arith.constant 2 : index
    %c0_213 = arith.constant 0 : index
    %c0_214 = arith.constant 0 : index
    %325 = vector.load %arg18[%c2_212, %c0_213, %c0_214] : memref<4x128x32xbf16, #tpu.memory_space<vmem>>, vector<1x128x32xbf16>
    %326 = vector.shape_cast %325 : vector<1x128x32xbf16> to vector<128x32xbf16>
    %cst_215 = arith.constant dense<0.000000e+00> : vector<16x32xf32>
    %327 = tpu.matmul %4, %326, %cst_215 {dimension_numbers = #tpu.dot_dimension_numbers<[1], [0], [0], [1], [0, 0, 1, 1], [], []>} : vector<16x128xbf16>, vector<128x32xbf16>, vector<16x32xf32> -> vector<16x32xf32>
    %c2_216 = arith.constant 2 : index
    %c0_217 = arith.constant 0 : index
    %c0_218 = arith.constant 0 : index
    %328 = vector.load %arg19[%c2_216, %c0_217, %c0_218] : memref<4x1x32xf32, #tpu.memory_space<vmem>>, vector<1x1x32xf32>
    %329 = vector.shape_cast %328 : vector<1x1x32xf32> to vector<1x32xf32>
    %330 = vector.broadcast %329 : vector<1x32xf32> to vector<16x32xf32>
    %331 = arith.addf %327, %330 : vector<16x32xf32>
    %332 = arith.truncf %331 : vector<16x32xf32> to vector<16x32xbf16>
    %cst_219 = arith.constant dense<0.000000e+00> : vector<8x16xf32>
    %333 = tpu.matmul %316, %324, %cst_219 {dimension_numbers = #tpu.dot_dimension_numbers<[1], [1], [0], [0], [0, 0, 1, 0], [], []>} : vector<8x32xbf16>, vector<16x32xbf16>, vector<8x16xf32> -> vector<8x16xf32>
    %cst_220 = arith.constant -1.000000e+10 : f32
    %334 = vector.shape_cast %11 : vector<1x16xi1> to vector<1x16xi1>
    %335 = vector.broadcast %334 : vector<1x16xi1> to vector<8x16xi1>
    %336 = vector.broadcast %cst_220 : f32 to vector<8x16xf32>
    %337 = arith.select %335, %333, %336 : vector<8x16xi1>, vector<8x16xf32>
    %cst_221 = arith.constant dense<0xFF800000> : vector<8xf32>
    %338 = vector.multi_reduction <maximumf>, %337, %cst_221 [1] : vector<8x16xf32> to vector<8xf32>
    %339 = vector.shape_cast %338 : vector<8xf32> to vector<8x1xf32>
    %340 = vector.broadcast %339 : vector<8x1xf32> to vector<8x16xf32>
    %341 = arith.subf %337, %340 : vector<8x16xf32>
    %342 = math.exp %341 : vector<8x16xf32>
    %cst_222 = arith.constant dense<0.000000e+00> : vector<8xf32>
    %343 = vector.multi_reduction <add>, %342, %cst_222 [1] : vector<8x16xf32> to vector<8xf32>
    %344 = vector.shape_cast %343 : vector<8xf32> to vector<8x1xf32>
    %345 = tpu.reciprocal %344 {approx = true} : vector<8x1xf32> -> vector<8x1xf32>
    %346 = vector.broadcast %345 : vector<8x1xf32> to vector<8x16xf32>
    %347 = arith.mulf %342, %346 : vector<8x16xf32>
    %348 = arith.truncf %347 : vector<8x16xf32> to vector<8x16xbf16>
    %cst_223 = arith.constant dense<0.000000e+00> : vector<8x32xf32>
    %349 = tpu.matmul %348, %332, %cst_223 {dimension_numbers = #tpu.dot_dimension_numbers<[1], [0], [0], [1], [0, 0, 1, 1], [], []>} : vector<8x16xbf16>, vector<16x32xbf16>, vector<8x32xf32> -> vector<8x32xf32>
    %350 = arith.truncf %349 : vector<8x32xf32> to vector<8x32xbf16>
    %c2_224 = arith.constant 2 : index
    %c0_225 = arith.constant 0 : index
    %c0_226 = arith.constant 0 : index
    %351 = vector.load %arg20[%c2_224, %c0_225, %c0_226] : memref<4x32x128xbf16, #tpu.memory_space<vmem>>, vector<1x32x128xbf16>
    %352 = vector.shape_cast %351 : vector<1x32x128xbf16> to vector<32x128xbf16>
    %cst_227 = arith.constant dense<0.000000e+00> : vector<8x128xf32>
    %353 = tpu.matmul %350, %352, %cst_227 {dimension_numbers = #tpu.dot_dimension_numbers<[1], [0], [0], [1], [0, 0, 1, 1], [], []>} : vector<8x32xbf16>, vector<32x128xbf16>, vector<8x128xf32> -> vector<8x128xf32>
    %354 = arith.addf %308, %353 : vector<8x128xf32>
    %c3_228 = arith.constant 3 : index
    %c0_229 = arith.constant 0 : index
    %c0_230 = arith.constant 0 : index
    %355 = vector.load %arg14[%c3_228, %c0_229, %c0_230] : memref<4x128x32xbf16, #tpu.memory_space<vmem>>, vector<1x128x32xbf16>
    %356 = vector.shape_cast %355 : vector<1x128x32xbf16> to vector<128x32xbf16>
    %cst_231 = arith.constant dense<0.000000e+00> : vector<8x32xf32>
    %357 = tpu.matmul %215, %356, %cst_231 {dimension_numbers = #tpu.dot_dimension_numbers<[1], [0], [0], [1], [0, 0, 1, 1], [], []>} : vector<8x128xbf16>, vector<128x32xbf16>, vector<8x32xf32> -> vector<8x32xf32>
    %c3_232 = arith.constant 3 : index
    %c0_233 = arith.constant 0 : index
    %c0_234 = arith.constant 0 : index
    %358 = vector.load %arg15[%c3_232, %c0_233, %c0_234] : memref<4x1x32xf32, #tpu.memory_space<vmem>>, vector<1x1x32xf32>
    %359 = vector.shape_cast %358 : vector<1x1x32xf32> to vector<1x32xf32>
    %360 = vector.broadcast %359 : vector<1x32xf32> to vector<8x32xf32>
    %361 = arith.addf %357, %360 : vector<8x32xf32>
    %362 = arith.truncf %361 : vector<8x32xf32> to vector<8x32xbf16>
    %c3_235 = arith.constant 3 : index
    %c0_236 = arith.constant 0 : index
    %c0_237 = arith.constant 0 : index
    %363 = vector.load %arg16[%c3_235, %c0_236, %c0_237] : memref<4x128x32xbf16, #tpu.memory_space<vmem>>, vector<1x128x32xbf16>
    %364 = vector.shape_cast %363 : vector<1x128x32xbf16> to vector<128x32xbf16>
    %cst_238 = arith.constant dense<0.000000e+00> : vector<16x32xf32>
    %365 = tpu.matmul %4, %364, %cst_238 {dimension_numbers = #tpu.dot_dimension_numbers<[1], [0], [0], [1], [0, 0, 1, 1], [], []>} : vector<16x128xbf16>, vector<128x32xbf16>, vector<16x32xf32> -> vector<16x32xf32>
    %c3_239 = arith.constant 3 : index
    %c0_240 = arith.constant 0 : index
    %c0_241 = arith.constant 0 : index
    %366 = vector.load %arg17[%c3_239, %c0_240, %c0_241] : memref<4x1x32xf32, #tpu.memory_space<vmem>>, vector<1x1x32xf32>
    %367 = vector.shape_cast %366 : vector<1x1x32xf32> to vector<1x32xf32>
    %368 = vector.broadcast %367 : vector<1x32xf32> to vector<16x32xf32>
    %369 = arith.addf %365, %368 : vector<16x32xf32>
    %370 = arith.truncf %369 : vector<16x32xf32> to vector<16x32xbf16>
    %c3_242 = arith.constant 3 : index
    %c0_243 = arith.constant 0 : index
    %c0_244 = arith.constant 0 : index
    %371 = vector.load %arg18[%c3_242, %c0_243, %c0_244] : memref<4x128x32xbf16, #tpu.memory_space<vmem>>, vector<1x128x32xbf16>
    %372 = vector.shape_cast %371 : vector<1x128x32xbf16> to vector<128x32xbf16>
    %cst_245 = arith.constant dense<0.000000e+00> : vector<16x32xf32>
    %373 = tpu.matmul %4, %372, %cst_245 {dimension_numbers = #tpu.dot_dimension_numbers<[1], [0], [0], [1], [0, 0, 1, 1], [], []>} : vector<16x128xbf16>, vector<128x32xbf16>, vector<16x32xf32> -> vector<16x32xf32>
    %c3_246 = arith.constant 3 : index
    %c0_247 = arith.constant 0 : index
    %c0_248 = arith.constant 0 : index
    %374 = vector.load %arg19[%c3_246, %c0_247, %c0_248] : memref<4x1x32xf32, #tpu.memory_space<vmem>>, vector<1x1x32xf32>
    %375 = vector.shape_cast %374 : vector<1x1x32xf32> to vector<1x32xf32>
    %376 = vector.broadcast %375 : vector<1x32xf32> to vector<16x32xf32>
    %377 = arith.addf %373, %376 : vector<16x32xf32>
    %378 = arith.truncf %377 : vector<16x32xf32> to vector<16x32xbf16>
    %cst_249 = arith.constant dense<0.000000e+00> : vector<8x16xf32>
    %379 = tpu.matmul %362, %370, %cst_249 {dimension_numbers = #tpu.dot_dimension_numbers<[1], [1], [0], [0], [0, 0, 1, 0], [], []>} : vector<8x32xbf16>, vector<16x32xbf16>, vector<8x16xf32> -> vector<8x16xf32>
    %cst_250 = arith.constant -1.000000e+10 : f32
    %380 = vector.shape_cast %11 : vector<1x16xi1> to vector<1x16xi1>
    %381 = vector.broadcast %380 : vector<1x16xi1> to vector<8x16xi1>
    %382 = vector.broadcast %cst_250 : f32 to vector<8x16xf32>
    %383 = arith.select %381, %379, %382 : vector<8x16xi1>, vector<8x16xf32>
    %cst_251 = arith.constant dense<0xFF800000> : vector<8xf32>
    %384 = vector.multi_reduction <maximumf>, %383, %cst_251 [1] : vector<8x16xf32> to vector<8xf32>
    %385 = vector.shape_cast %384 : vector<8xf32> to vector<8x1xf32>
    %386 = vector.broadcast %385 : vector<8x1xf32> to vector<8x16xf32>
    %387 = arith.subf %383, %386 : vector<8x16xf32>
    %388 = math.exp %387 : vector<8x16xf32>
    %cst_252 = arith.constant dense<0.000000e+00> : vector<8xf32>
    %389 = vector.multi_reduction <add>, %388, %cst_252 [1] : vector<8x16xf32> to vector<8xf32>
    %390 = vector.shape_cast %389 : vector<8xf32> to vector<8x1xf32>
    %391 = tpu.reciprocal %390 {approx = true} : vector<8x1xf32> -> vector<8x1xf32>
    %392 = vector.broadcast %391 : vector<8x1xf32> to vector<8x16xf32>
    %393 = arith.mulf %388, %392 : vector<8x16xf32>
    %394 = arith.truncf %393 : vector<8x16xf32> to vector<8x16xbf16>
    %cst_253 = arith.constant dense<0.000000e+00> : vector<8x32xf32>
    %395 = tpu.matmul %394, %378, %cst_253 {dimension_numbers = #tpu.dot_dimension_numbers<[1], [0], [0], [1], [0, 0, 1, 1], [], []>} : vector<8x16xbf16>, vector<16x32xbf16>, vector<8x32xf32> -> vector<8x32xf32>
    %396 = arith.truncf %395 : vector<8x32xf32> to vector<8x32xbf16>
    %c3_254 = arith.constant 3 : index
    %c0_255 = arith.constant 0 : index
    %c0_256 = arith.constant 0 : index
    %397 = vector.load %arg20[%c3_254, %c0_255, %c0_256] : memref<4x32x128xbf16, #tpu.memory_space<vmem>>, vector<1x32x128xbf16>
    %398 = vector.shape_cast %397 : vector<1x32x128xbf16> to vector<32x128xbf16>
    %cst_257 = arith.constant dense<0.000000e+00> : vector<8x128xf32>
    %399 = tpu.matmul %396, %398, %cst_257 {dimension_numbers = #tpu.dot_dimension_numbers<[1], [0], [0], [1], [0, 0, 1, 1], [], []>} : vector<8x32xbf16>, vector<32x128xbf16>, vector<8x128xf32> -> vector<8x128xf32>
    %400 = arith.addf %354, %399 : vector<8x128xf32>
    %c0_258 = arith.constant 0 : index
    %c0_259 = arith.constant 0 : index
    %401 = vector.load %arg21[%c0_258, %c0_259] : memref<1x128xf32, #tpu.memory_space<vmem>>, vector<1x128xf32>
    %402 = vector.broadcast %401 : vector<1x128xf32> to vector<8x128xf32>
    %403 = arith.addf %400, %402 : vector<8x128xf32>
    %404 = arith.addf %214, %403 : vector<8x128xf32>
    %cst_260 = arith.constant dense<0.000000e+00> : vector<8xf32>
    %405 = vector.multi_reduction <add>, %404, %cst_260 [1] : vector<8x128xf32> to vector<8xf32>
    %406 = vector.shape_cast %405 : vector<8xf32> to vector<8x1xf32>
    %cst_261 = arith.constant 1.280000e+02 : f32
    %407 = vector.broadcast %cst_261 : f32 to vector<8x1xf32>
    %408 = arith.divf %406, %407 : vector<8x1xf32>
    %409 = vector.broadcast %408 : vector<8x1xf32> to vector<8x128xf32>
    %410 = arith.subf %404, %409 : vector<8x128xf32>
    %411 = arith.mulf %410, %410 : vector<8x128xf32>
    %cst_262 = arith.constant dense<0.000000e+00> : vector<8xf32>
    %412 = vector.multi_reduction <add>, %411, %cst_262 [1] : vector<8x128xf32> to vector<8xf32>
    %413 = vector.shape_cast %412 : vector<8xf32> to vector<8x1xf32>
    %cst_263 = arith.constant 1.280000e+02 : f32
    %414 = vector.broadcast %cst_263 : f32 to vector<8x1xf32>
    %415 = arith.divf %413, %414 : vector<8x1xf32>
    %cst_264 = arith.constant 9.99999974E-6 : f32
    %416 = vector.broadcast %cst_264 : f32 to vector<8x1xf32>
    %417 = arith.addf %415, %416 : vector<8x1xf32>
    %418 = math.rsqrt %417 : vector<8x1xf32>
    %419 = vector.broadcast %418 : vector<8x1xf32> to vector<8x128xf32>
    %420 = arith.mulf %410, %419 : vector<8x128xf32>
    %c0_265 = arith.constant 0 : index
    %c0_266 = arith.constant 0 : index
    %421 = vector.load %arg22[%c0_265, %c0_266] : memref<1x128xf32, #tpu.memory_space<vmem>>, vector<1x128xf32>
    %422 = vector.broadcast %421 : vector<1x128xf32> to vector<8x128xf32>
    %423 = arith.mulf %420, %422 : vector<8x128xf32>
    %c0_267 = arith.constant 0 : index
    %c0_268 = arith.constant 0 : index
    %424 = vector.load %arg23[%c0_267, %c0_268] : memref<1x128xf32, #tpu.memory_space<vmem>>, vector<1x128xf32>
    %425 = vector.broadcast %424 : vector<1x128xf32> to vector<8x128xf32>
    %426 = arith.addf %423, %425 : vector<8x128xf32>
    %427 = arith.truncf %426 : vector<8x128xf32> to vector<8x128xbf16>
    %c0_269 = arith.constant 0 : index
    %c0_270 = arith.constant 0 : index
    %428 = vector.load %arg24[%c0_269, %c0_270] : memref<128x256xbf16, #tpu.memory_space<vmem>>, vector<128x256xbf16>
    %cst_271 = arith.constant dense<0.000000e+00> : vector<8x256xf32>
    %429 = tpu.matmul %427, %428, %cst_271 {dimension_numbers = #tpu.dot_dimension_numbers<[1], [0], [0], [1], [0, 0, 1, 1], [], []>} : vector<8x128xbf16>, vector<128x256xbf16>, vector<8x256xf32> -> vector<8x256xf32>
    %c0_272 = arith.constant 0 : index
    %c0_273 = arith.constant 0 : index
    %430 = vector.load %arg25[%c0_272, %c0_273] : memref<1x256xf32, #tpu.memory_space<vmem>>, vector<1x256xf32>
    %431 = vector.broadcast %430 : vector<1x256xf32> to vector<8x256xf32>
    %432 = arith.addf %429, %431 : vector<8x256xf32>
    %cst_274 = arith.constant 0.000000e+00 : f32
    %433 = vector.broadcast %cst_274 : f32 to vector<8x256xf32>
    %434 = arith.maximumf %432, %433 : vector<8x256xf32>
    %435 = arith.truncf %434 : vector<8x256xf32> to vector<8x256xbf16>
    %c0_275 = arith.constant 0 : index
    %c0_276 = arith.constant 0 : index
    %436 = vector.load %arg26[%c0_275, %c0_276] : memref<256x128xbf16, #tpu.memory_space<vmem>>, vector<256x128xbf16>
    %cst_277 = arith.constant dense<0.000000e+00> : vector<8x128xf32>
    %437 = tpu.matmul %435, %436, %cst_277 {dimension_numbers = #tpu.dot_dimension_numbers<[1], [0], [0], [1], [0, 0, 1, 1], [], []>} : vector<8x256xbf16>, vector<256x128xbf16>, vector<8x128xf32> -> vector<8x128xf32>
    %c0_278 = arith.constant 0 : index
    %c0_279 = arith.constant 0 : index
    %438 = vector.load %arg27[%c0_278, %c0_279] : memref<1x128xf32, #tpu.memory_space<vmem>>, vector<1x128xf32>
    %439 = vector.broadcast %438 : vector<1x128xf32> to vector<8x128xf32>
    %440 = arith.addf %437, %439 : vector<8x128xf32>
    %441 = arith.addf %426, %440 : vector<8x128xf32>
    %cst_280 = arith.constant dense<0.000000e+00> : vector<8xf32>
    %442 = vector.multi_reduction <add>, %441, %cst_280 [1] : vector<8x128xf32> to vector<8xf32>
    %443 = vector.shape_cast %442 : vector<8xf32> to vector<8x1xf32>
    %cst_281 = arith.constant 1.280000e+02 : f32
    %444 = vector.broadcast %cst_281 : f32 to vector<8x1xf32>
    %445 = arith.divf %443, %444 : vector<8x1xf32>
    %446 = vector.broadcast %445 : vector<8x1xf32> to vector<8x128xf32>
    %447 = arith.subf %441, %446 : vector<8x128xf32>
    %448 = arith.mulf %447, %447 : vector<8x128xf32>
    %cst_282 = arith.constant dense<0.000000e+00> : vector<8xf32>
    %449 = vector.multi_reduction <add>, %448, %cst_282 [1] : vector<8x128xf32> to vector<8xf32>
    %450 = vector.shape_cast %449 : vector<8xf32> to vector<8x1xf32>
    %cst_283 = arith.constant 1.280000e+02 : f32
    %451 = vector.broadcast %cst_283 : f32 to vector<8x1xf32>
    %452 = arith.divf %450, %451 : vector<8x1xf32>
    %cst_284 = arith.constant 9.99999974E-6 : f32
    %453 = vector.broadcast %cst_284 : f32 to vector<8x1xf32>
    %454 = arith.addf %452, %453 : vector<8x1xf32>
    %455 = math.rsqrt %454 : vector<8x1xf32>
    %456 = vector.broadcast %455 : vector<8x1xf32> to vector<8x128xf32>
    %457 = arith.mulf %447, %456 : vector<8x128xf32>
    %c0_285 = arith.constant 0 : index
    %c0_286 = arith.constant 0 : index
    %458 = vector.load %arg28[%c0_285, %c0_286] : memref<1x128xf32, #tpu.memory_space<vmem>>, vector<1x128xf32>
    %459 = vector.broadcast %458 : vector<1x128xf32> to vector<8x128xf32>
    %460 = arith.mulf %457, %459 : vector<8x128xf32>
    %c0_287 = arith.constant 0 : index
    %c0_288 = arith.constant 0 : index
    %461 = vector.load %arg29[%c0_287, %c0_288] : memref<1x128xf32, #tpu.memory_space<vmem>>, vector<1x128xf32>
    %462 = vector.broadcast %461 : vector<1x128xf32> to vector<8x128xf32>
    %463 = arith.addf %460, %462 : vector<8x128xf32>
    %464 = arith.truncf %463 : vector<8x128xf32> to vector<8x128xbf16>
    %c0_289 = arith.constant 0 : index
    %c0_290 = arith.constant 0 : index
    %c0_291 = arith.constant 0 : index
    %465 = vector.load %arg30[%c0_289, %c0_290, %c0_291] : memref<1x8x128xbf16, #tpu.memory_space<vmem>>, vector<1x8x128xbf16>
    %466 = vector.shape_cast %465 : vector<1x8x128xbf16> to vector<8x128xbf16>
    %467 = vector.shape_cast %464 : vector<8x128xbf16> to vector<1x8x128xbf16>
    tpu.vector_store %arg30[%c0_289, %c0_290, %c0_291], %467 {strides = array<i32>} : memref<1x8x128xbf16, #tpu.memory_space<vmem>>, vector<1x8x128xbf16>,
    return
  }
  func.func @transform_0(%arg0: i32) -> (i32, i32, i32) {
    %c0_i32 = arith.constant 0 : i32
    %c0_i32_0 = arith.constant 0 : i32
    %c0_i32_1 = arith.constant 0 : i32
    return %arg0, %c0_i32, %c0_i32_0 : i32, i32, i32
  }
  func.func @transform_1(%arg0: i32) -> (i32, i32, i32) {
    %c0_i32 = arith.constant 0 : i32
    %c0_i32_0 = arith.constant 0 : i32
    %c0_i32_1 = arith.constant 0 : i32
    return %arg0, %c0_i32, %c0_i32_0 : i32, i32, i32
  }
  func.func @transform_2(%arg0: i32) -> (i32, i32, i32) {
    %c0_i32 = arith.constant 0 : i32
    %c0_i32_0 = arith.constant 0 : i32
    %c0_i32_1 = arith.constant 0 : i32
    return %arg0, %c0_i32, %c0_i32_0 : i32, i32, i32
  }
  func.func @transform_3(%arg0: i32) -> (i32, i32, i32) {
    %c0_i32 = arith.constant 0 : i32
    %c0_i32_0 = arith.constant 0 : i32
    %c0_i32_1 = arith.constant 0 : i32
    %c0_i32_2 = arith.constant 0 : i32
    return %c0_i32, %c0_i32_0, %c0_i32_1 : i32, i32, i32
  }
  func.func @transform_4(%arg0: i32) -> (i32, i32, i32) {
    %c0_i32 = arith.constant 0 : i32
    %c0_i32_0 = arith.constant 0 : i32
    %c0_i32_1 = arith.constant 0 : i32
    %c0_i32_2 = arith.constant 0 : i32
    return %c0_i32, %c0_i32_0, %c0_i32_1 : i32, i32, i32
  }
  func.func @transform_5(%arg0: i32) -> (i32, i32, i32) {
    %c0_i32 = arith.constant 0 : i32
    %c0_i32_0 = arith.constant 0 : i32
    %c0_i32_1 = arith.constant 0 : i32
    %c0_i32_2 = arith.constant 0 : i32
    return %c0_i32, %c0_i32_0, %c0_i32_1 : i32, i32, i32
  }
  func.func @transform_6(%arg0: i32) -> (i32, i32, i32) {
    %c0_i32 = arith.constant 0 : i32
    %c0_i32_0 = arith.constant 0 : i32
    %c0_i32_1 = arith.constant 0 : i32
    %c0_i32_2 = arith.constant 0 : i32
    return %c0_i32, %c0_i32_0, %c0_i32_1 : i32, i32, i32
  }
  func.func @transform_7(%arg0: i32) -> (i32, i32, i32) {
    %c0_i32 = arith.constant 0 : i32
    %c0_i32_0 = arith.constant 0 : i32
    %c0_i32_1 = arith.constant 0 : i32
    %c0_i32_2 = arith.constant 0 : i32
    return %c0_i32, %c0_i32_0, %c0_i32_1 : i32, i32, i32
  }
  func.func @transform_8(%arg0: i32) -> (i32, i32, i32) {
    %c0_i32 = arith.constant 0 : i32
    %c0_i32_0 = arith.constant 0 : i32
    %c0_i32_1 = arith.constant 0 : i32
    %c0_i32_2 = arith.constant 0 : i32
    return %c0_i32, %c0_i32_0, %c0_i32_1 : i32, i32, i32
  }
  func.func @transform_9(%arg0: i32) -> (i32, i32, i32) {
    %c0_i32 = arith.constant 0 : i32
    %c0_i32_0 = arith.constant 0 : i32
    %c0_i32_1 = arith.constant 0 : i32
    %c0_i32_2 = arith.constant 0 : i32
    return %c0_i32, %c0_i32_0, %c0_i32_1 : i32, i32, i32
  }
  func.func @transform_10(%arg0: i32) -> (i32, i32) {
    %c0_i32 = arith.constant 0 : i32
    %c0_i32_0 = arith.constant 0 : i32
    %c0_i32_1 = arith.constant 0 : i32
    return %c0_i32, %c0_i32_0 : i32, i32
  }
  func.func @transform_11(%arg0: i32) -> (i32, i32) {
    %c0_i32 = arith.constant 0 : i32
    %c0_i32_0 = arith.constant 0 : i32
    %c0_i32_1 = arith.constant 0 : i32
    return %c0_i32, %c0_i32_0 : i32, i32
  }
  func.func @transform_12(%arg0: i32) -> (i32, i32) {
    %c0_i32 = arith.constant 0 : i32
    %c0_i32_0 = arith.constant 0 : i32
    %c0_i32_1 = arith.constant 0 : i32
    return %c0_i32, %c0_i32_0 : i32, i32
  }
  func.func @transform_13(%arg0: i32) -> (i32, i32, i32) {
    %c0_i32 = arith.constant 0 : i32
    %c0_i32_0 = arith.constant 0 : i32
    %c0_i32_1 = arith.constant 0 : i32
    %c0_i32_2 = arith.constant 0 : i32
    return %c0_i32, %c0_i32_0, %c0_i32_1 : i32, i32, i32
  }
  func.func @transform_14(%arg0: i32) -> (i32, i32, i32) {
    %c0_i32 = arith.constant 0 : i32
    %c0_i32_0 = arith.constant 0 : i32
    %c0_i32_1 = arith.constant 0 : i32
    %c0_i32_2 = arith.constant 0 : i32
    return %c0_i32, %c0_i32_0, %c0_i32_1 : i32, i32, i32
  }
  func.func @transform_15(%arg0: i32) -> (i32, i32, i32) {
    %c0_i32 = arith.constant 0 : i32
    %c0_i32_0 = arith.constant 0 : i32
    %c0_i32_1 = arith.constant 0 : i32
    %c0_i32_2 = arith.constant 0 : i32
    return %c0_i32, %c0_i32_0, %c0_i32_1 : i32, i32, i32
  }
  func.func @transform_16(%arg0: i32) -> (i32, i32, i32) {
    %c0_i32 = arith.constant 0 : i32
    %c0_i32_0 = arith.constant 0 : i32
    %c0_i32_1 = arith.constant 0 : i32
    %c0_i32_2 = arith.constant 0 : i32
    return %c0_i32, %c0_i32_0, %c0_i32_1 : i32, i32, i32
  }
  func.func @transform_17(%arg0: i32) -> (i32, i32, i32) {
    %c0_i32 = arith.constant 0 : i32
    %c0_i32_0 = arith.constant 0 : i32
    %c0_i32_1 = arith.constant 0 : i32
    %c0_i32_2 = arith.constant 0 : i32
    return %c0_i32, %c0_i32_0, %c0_i32_1 : i32, i32, i32
  }
  func.func @transform_18(%arg0: i32) -> (i32, i32, i32) {
    %c0_i32 = arith.constant 0 : i32
    %c0_i32_0 = arith.constant 0 : i32
    %c0_i32_1 = arith.constant 0 : i32
    %c0_i32_2 = arith.constant 0 : i32
    return %c0_i32, %c0_i32_0, %c0_i32_1 : i32, i32, i32
  }
  func.func @transform_19(%arg0: i32) -> (i32, i32, i32) {
    %c0_i32 = arith.constant 0 : i32
    %c0_i32_0 = arith.constant 0 : i32
    %c0_i32_1 = arith.constant 0 : i32
    %c0_i32_2 = arith.constant 0 : i32
    return %c0_i32, %c0_i32_0, %c0_i32_1 : i32, i32, i32
  }
  func.func @transform_20(%arg0: i32) -> (i32, i32) {
    %c0_i32 = arith.constant 0 : i32
    %c0_i32_0 = arith.constant 0 : i32
    %c0_i32_1 = arith.constant 0 : i32
    return %c0_i32, %c0_i32_0 : i32, i32
  }
  func.func @transform_21(%arg0: i32) -> (i32, i32) {
    %c0_i32 = arith.constant 0 : i32
    %c0_i32_0 = arith.constant 0 : i32
    %c0_i32_1 = arith.constant 0 : i32
    return %c0_i32, %c0_i32_0 : i32, i32
  }
  func.func @transform_22(%arg0: i32) -> (i32, i32) {
    %c0_i32 = arith.constant 0 : i32
    %c0_i32_0 = arith.constant 0 : i32
    %c0_i32_1 = arith.constant 0 : i32
    return %c0_i32, %c0_i32_0 : i32, i32
  }
  func.func @transform_23(%arg0: i32) -> (i32, i32) {
    %c0_i32 = arith.constant 0 : i32
    %c0_i32_0 = arith.constant 0 : i32
    %c0_i32_1 = arith.constant 0 : i32
    return %c0_i32, %c0_i32_0 : i32, i32
  }
  func.func @transform_24(%arg0: i32) -> (i32, i32) {
    %c0_i32 = arith.constant 0 : i32
    %c0_i32_0 = arith.constant 0 : i32
    %c0_i32_1 = arith.constant 0 : i32
    return %c0_i32, %c0_i32_0 : i32, i32
  }
  func.func @transform_25(%arg0: i32) -> (i32, i32) {
    %c0_i32 = arith.constant 0 : i32
    %c0_i32_0 = arith.constant 0 : i32
    %c0_i32_1 = arith.constant 0 : i32
    return %c0_i32, %c0_i32_0 : i32, i32
  }
  func.func @transform_26(%arg0: i32) -> (i32, i32) {
    %c0_i32 = arith.constant 0 : i32
    %c0_i32_0 = arith.constant 0 : i32
    %c0_i32_1 = arith.constant 0 : i32
    return %c0_i32, %c0_i32_0 : i32, i32
  }
  func.func @transform_27(%arg0: i32) -> (i32, i32) {
    %c0_i32 = arith.constant 0 : i32
    %c0_i32_0 = arith.constant 0 : i32
    %c0_i32_1 = arith.constant 0 : i32
    return %c0_i32, %c0_i32_0 : i32, i32
  }
  func.func @transform_28(%arg0: i32) -> (i32, i32) {
    %c0_i32 = arith.constant 0 : i32
    %c0_i32_0 = arith.constant 0 : i32
    %c0_i32_1 = arith.constant 0 : i32
    return %c0_i32, %c0_i32_0 : i32, i32
  }
  func.func @transform_29(%arg0: i32) -> (i32, i32, i32) {
    %c0_i32 = arith.constant 0 : i32
    %c0_i32_0 = arith.constant 0 : i32
    %c0_i32_1 = arith.constant 0 : i32
    return %arg0, %c0_i32, %c0_i32_0 : i32, i32, i32
  }
}

</mosaic_0001>

<bundles_post_ra>
// kernel: decoder_layer_forward.1
= control target key start
LH: loop header
LB: loop body
LE: loop exit
PB: predicated region body
PF: predicated region fallthrough
CT: control target
= control target key end

     0   :  { %s9145_s6 = smov 1   ;;  %s9146_s10 = smov 2   ;;  %s10480_s0 = inlined_call_operand.smem [shape: u32[30], index: -1, kind: input, shape index: {}] }
   0x1   :  { %s9221_s5 = sld [smem:[%s10480_s0]]   ;;  %s9147_s14 = smov 3  }
   0x2   :  { %s9226_s9 = sld [smem:[%s10480_s0 + %s9145_s6]]   ;;  %s9148_s18 = smov 4  }
   0x3   :  { %s9231_s13 = sld [smem:[%s10480_s0 + %s9146_s10]]   ;;  %s9149_s22 = smov 5  }
   0x4   :  { %s9236_s17 = sld [smem:[%s10480_s0 + %s9147_s14]]   ;;  %s9150_s26 = smov 6  }
   0x5   :  { %s9241_s21 = sld [smem:[%s10480_s0 + %s9148_s18]]   ;;  %s9151_s30 = smov 7  }
   0x6   :  { %s9246_s25 = sld [smem:[%s10480_s0 + %s9149_s22]]   ;;  %s9152_s4 = smov 8  }
   0x7   :  { %10537 = sst [smem:[#allocation64_spill]] %s9221_s5  ;;  %s9153_s10 = smov 9  }
   0x8   :  { %10538 = sst [smem:[#allocation65_spill]] %s9226_s9  ;;  %s9154_s15 = smov 10  }
   0x9   :  { %10539 = sst [smem:[#allocation66_spill]] %s9231_s13  ;;  %s9155_s20 = smov 11  }
   0xa   :  { %10540 = sst [smem:[#allocation67_spill]] %s9236_s17  ;;  %s9157_s1 = smov 13  }
   0xb   :  { %10541 = sst [smem:[#allocation68_spill]] %s9241_s21  ;;  %s9158_s7 = smov 14  }
   0xc   :  { %10542 = sst [smem:[#allocation69_spill]] %s9246_s25  ;;  %s9160_s22 = smov 16  }
   0xd   :  { %s9251_s29 = sld [smem:[%s10480_s0 + %s9150_s26]]   ;;  %s9156_s26 = smov 12  }
   0xe   :  { %s9256_s3 = sld [smem:[%s10480_s0 + %s9151_s30]]   ;;  %s9161_s28 = smov 17  }
   0xf   :  { %s9261_s8 = sld [smem:[%s10480_s0 + %s9152_s4]]  }
  0x10   :  { %s9266_s14 = sld [smem:[%s10480_s0 + %s9153_s10]]  }
  0x11   :  { %s9271_s19 = sld [smem:[%s10480_s0 + %s9154_s15]]   ;;  %s9159_s15 = smov 15  }
  0x12   :  { %s9276_s24 = sld [smem:[%s10480_s0 + %s9155_s20]]  }
  0x13   :  { %10543 = sst [smem:[#allocation70_spill]] %s9251_s29 }
  0x14   :  { %10544 = sst [smem:[#allocation71_spill]] %s9256_s3 }
  0x15   :  { %10545 = sst [smem:[#allocation72_spill]] %s9261_s8 }
  0x16   :  { %10546 = sst [smem:[#allocation73_spill]] %s9266_s14 }
  0x17   :  { %10547 = sst [smem:[#allocation74_spill]] %s9271_s19 }
  0x18   :  { %10548 = sst [smem:[#allocation75_spill]] %s9276_s24 }
  0x19   :  { %s9281_s30 = sld [smem:[%s10480_s0 + %s9156_s26]]  }
  0x1a   :  { %s9286_s6 = sld [smem:[%s10480_s0 + %s9157_s1]]  }
  0x1b   :  { %s9291_s12 = sld [smem:[%s10480_s0 + %s9158_s7]]   ;;  %s9162_s7 = smov 18  }
  0x1c   :  { %s9296_s20 = sld [smem:[%s10480_s0 + %s9159_s15]]   ;;  %s9163_s15 = smov 19  }
  0x1d   :  { %s9301_s27 = sld [smem:[%s10480_s0 + %s9160_s22]]   ;;  %s9164_s22 = smov 20  }
  0x1e   :  { %s9306_s4 = sld [smem:[%s10480_s0 + %s9161_s28]]   ;;  %s9165_s28 = smov 21  }
  0x1f   :  { %10549 = sst [smem:[#allocation76_spill]] %s9281_s30 }
  0x20   :  { %10550 = sst [smem:[#allocation77_spill]] %s9286_s6 }
  0x21   :  { %10551 = sst [smem:[#allocation78_spill]] %s9291_s12 }
  0x22   :  { %10552 = sst [smem:[#allocation79_spill]] %s9296_s20 }
  0x23   :  { %10553 = sst [smem:[#allocation80_spill]] %s9301_s27 }
  0x24   :  { %10554 = sst [smem:[#allocation81_spill]] %s9306_s4 }
  0x25   :  { %s9311_s13 = sld [smem:[%s10480_s0 + %s9162_s7]]   ;;  %s9166_s7 = smov 22  }
  0x26   :  { %s9316_s5 = sld [smem:[%s10480_s0 + %s9163_s15]]   ;;  %s9167_s15 = smov 23  }
  0x27   :  { %s9321_s27 = sld [smem:[%s10480_s0 + %s9164_s22]]   ;;  %s9168_s22 = smov 24  }
  0x28   :  { %s9326_s12 = sld [smem:[%s10480_s0 + %s9165_s28]]   ;;  %s9169_s28 = smov 25  }
  0x29   :  { %s9336_s30 = sld [smem:[%s10480_s0 + %s9167_s15]]   ;;  %s9171_s15 = smov 27  }
  0x2a   :  { %s9346_s19 = sld [smem:[%s10480_s0 + %s9169_s28]]   ;;  %s9173_s28 = smov 29  }
  0x2b   :  { %10555 = sst [smem:[#allocation82_spill]] %s9311_s13 }
  0x2c   :  { %10556 = sst [smem:[#allocation83_spill]] %s9316_s5 }
  0x2d   :  { %10557 = sst [smem:[#allocation84_spill]] %s9321_s27 }
  0x2e   :  { %10558 = sst [smem:[#allocation85_spill]] %s9326_s12 }
  0x2f   :  { %s9331_s13 = sld [smem:[%s10480_s0 + %s9166_s7]]   ;;  %s9170_s7 = smov 26  }
  0x30   :  { %s9341_s27 = sld [smem:[%s10480_s0 + %s9168_s22]]   ;;  %s9172_s22 = smov 28  }
  0x31   :  { %10561 = sst [smem:[#allocation88_spill]] %s9346_s19 }
  0x32   :  { %s9356_s8 = sld [smem:[%s10480_s0 + %s9171_s15]]  }
  0x33   :  { %s9366_s29 = sld [smem:[%s10480_s0 + %s9173_s28]]  }
  0x35   :  { %10559 = sst [smem:[#allocation86_spill]] %s9331_s13 }
  0x36   :  { %10560 = sst [smem:[#allocation87_spill]] %s9341_s27 }
  0x37   :  { %s9351_s13 = sld [smem:[%s10480_s0 + %s9170_s7]]  }
  0x38   :  { %10562 = sst [smem:[#allocation89_spill]] %s9356_s8 }
  0x39   :  { %s9361_s27 = sld [smem:[%s10480_s0 + %s9172_s22]]  }
  0x3a   :  { %10563 = sst [smem:[#allocation90_spill]] %s9366_s29 }
  0x3b   :  { %64 = vsyncpa [#allocation3], 0 }
  0x3c   :  { %66 = vsyncpa [#allocation3 + $0x1], 0 }
  0x3d   :  { %67 = vsyncpa [#allocation6], 0 }
  0x3e   :  { %69 = vsyncpa [#allocation6 + $0x1], 0 }
  0x3f   :  { %70 = vsyncpa [#allocation9], 0 }
  0x40   :  { %71 = vsyncpa [#allocation12], 0 }
  0x41   :  { %72 = vsyncpa [#allocation15], 0 }
  0x42   :  { %73 = vsyncpa [#allocation18], 0 }
  0x43   :  { %74 = vsyncpa [#allocation21], 0 }
  0x44   :  { %75 = vsyncpa [#allocation24], 0 }
  0x45   :  { %76 = vsyncpa [#allocation27], 0 }
  0x46   :  { %77 = vsyncpa [#allocation30], 0 }
  0x47   :  { %78 = vsyncpa [#allocation33], 0 }
  0x48   :  { %79 = vsyncpa [#allocation36], 0 }
  0x49   :  { %80 = vsyncpa [#allocation39], 0 }
  0x4a   :  { %81 = vsyncpa [#allocation42], 0 }
  0x4b   :  { %82 = vsyncpa [#allocation45], 0 }
  0x4c   :  { %83 = vsyncpa [#allocation4], 0 }
  0x4d   :  { %85 = vsyncpa [#allocation4 + $0x1], 0  ;;  %s9368_s0 = smov 0   ;;  %s9370_s7 = smov 0  }
  0x4e   :  { %s9372_s10 = smov 0   ;;  %s9374_s11 = smov 0  }
  0x4f LB: > { %s10564_s21 = sld [smem:[#allocation68_spill]]  ;;  %s10565_s9 = sld [smem:[#allocation65_spill]]  ;;  %s9135_s7 = sphi %s9370_s7, %s10642_s7   ;;  %s9131_s0 = sphi %s9368_s0, %s10641_s0   ;;  %s9143_s11 = sphi %s9374_s11, %s10644_s11   ;;  %s9139_s10 = sphi %s9372_s10, %s10643_s10  }
  0x50   : > { %s10566_s24 = sld [smem:[#allocation75_spill]]  ;;  %s10567_s20 = sld [smem:[#allocation79_spill]] }
  0x51   : > { %s10568_s19 = sld [smem:[#allocation88_spill]]  ;;  %s10569_s14 = sld [smem:[#allocation73_spill]] }
  0x52   : > { %s10570_s12 = sld [smem:[#allocation85_spill]]  ;;  %s10571_s8 = sld [smem:[#allocation89_spill]] }
  0x53   : > { %s10572_s6 = sld [smem:[#allocation77_spill]]  ;;  %s10573_s5 = sld [smem:[#allocation83_spill]] }
  0x54   : > { %s10574_s4 = sld [smem:[#allocation81_spill]]  ;;  %s10575_s3 = sld [smem:[#allocation71_spill]] }
  0x55   : > { %s10576_s25 = sld [smem:[#allocation69_spill]]  ;;  %s10577_s17 = sld [smem:[#allocation67_spill]] }
  0x56   : > { %s9174_s15 = smov [#allocation8]   ;;  %s9389_s18 = sadd.s32 4294967295, %s9143_s11  }
  0x57   : > { %s758_s16 = sshll.u32 %s9174_s15, 4  ;;  %p6258_p0 = scmp.ge.s32.totalorder %s9143_s11, 1  ;;  %s9394_s16 = int_to_ptr.vmem [resolvable:$true] %s758_s16 }
  0x58   : > { %p10494_p1 = scmp.eq.s32.totalorder %s9389_s18, 0  ;;  %p746_p2 = scmp.lt.s32.totalorder %s9143_s11, 3 }
  0x59   : > { %s9175_s23 = smov [#allocation11]   ;;  %s9176_s1 = smov [#allocation14]  }
  0x5a   : > { %p9396_p3 = pnand %p6258_p0, %p746_p2  ;;  %s784_s26 = sshll.u32 %s9175_s23, 4  ;;  %s9409_s26 = int_to_ptr.vmem [resolvable:$true] %s784_s26 }
  0x5b   : > { %s810_s2 = sshll.u32 %s9176_s1, 4  ;;  %s8203_s15 = scalar_lea.hbm %s10577_s17, 4096  ;;  %s9411_s2 = int_to_ptr.vmem [resolvable:$true] %s810_s2 }
  0x5c   : > { %s10578_s22 = scalar_select %p9396_p3, 1, 0 }
  0x5d   : > { %p7671_p5 = pneg %p9396_p3  ;;  %p8204_p7 = scmp.ne.s32.totalorder %s10577_s17, %s8203_s15 }
  0x5e   : > { %10579 = sst [smem:[#allocation91_spill]] %s10578_s22  ;;  %p8210_p11 = scmp.lt.u32.totalorder %s8203_s15, %s10577_s17 }
  0x5f   : > { %p9405_p6 = pnand %p7671_p5, %p10494_p1 }
  0x61   : > { %s10580_s28 = scalar_select %p9405_p6, 1, 0 }
  0x62   : > { %p9417_p8 = pneg %p9405_p6 }
  0x64   : > { %s10581_s29 = scalar_select %p9417_p8, 1, 0 }
  0x65   : > { %p8206_p9 = pnand %p9417_p8, %p8204_p7 }
  0x67   : > { %p8207_p10 = pneg %p8206_p9 }
  0x69   : > { %p8212_p12 = pnand %p8210_p11, %p8207_p10 }
  0x6b   : > { %8215 = shalt.err (!%p8212_p12)
}
  0x6c   : > { %s8216_s23 = scalar_lea.vmem %s9394_s16, 4096  ;;  %p8224_p5 = scmp.lt.s32.totalorder %s9394_s16, %s9394_s16 }
  0x6d   : > { %p8217_p13 = scmp.ne.s32.totalorder %s9394_s16, %s8216_s23  ;;  %p8225_p4 = scmp.lt.s32.totalorder %s8216_s23, %s8216_s23 }
  0x6f   : > { %p8219_p0 = pnand %p8217_p13, %p9417_p8  ;;  %p8226_p1 = por %p8225_p4, %p8224_p5 }
  0x71   : > { %p8220_p2 = pneg %p8219_p0 }
  0x73   : > { %p8227_p3 = pnand %p8226_p1, %p8220_p2 }
  0x75   : > { %8230 = shalt.err (!%p8227_p3)
}
  0x76   : > { %s10499_s1 = smov 64   ;;  %s10501_s15 = smov 4  }
  0x77   : > { %7674 = dma.hbm_to_vmem [thread:$0]  (!%p9405_p6), %s10577_s17, 4096, %s9394_s16, [#allocation9], %s10499_s1, %s10499_s1, %s10501_s15  }
  0x78   : > { %s8231_s22 = scalar_lea.hbm %s10576_s25, 4096 }
  0x79   : > { %p8232_p7 = scmp.ne.s32.totalorder %s10576_s25, %s8231_s22  ;;  %p8238_p3 = scmp.lt.u32.totalorder %s8231_s22, %s10576_s25 }
  0x7b   : > { %p8234_p4 = pnand %p8232_p7, %p9417_p8 }
  0x7d   : > { %p8235_p1 = pneg %p8234_p4 }
  0x7f   : > { %p8240_p9 = pnand %p8238_p3, %p8235_p1 }
  0x81   : > { %8243 = shalt.err (!%p8240_p9)
}
  0x82   : > { %s8244_s23 = scalar_lea.vmem %s9409_s26, 4096  ;;  %p8252_p13 = scmp.lt.s32.totalorder %s9409_s26, %s9409_s26 }
  0x83   : > { %p8245_p10 = scmp.ne.s32.totalorder %s9409_s26, %s8244_s23  ;;  %p8253_p0 = scmp.lt.s32.totalorder %s8244_s23, %s8244_s23 }
  0x85   : > { %p8247_p11 = pnand %p8245_p10, %p9417_p8  ;;  %p8254_p2 = por %p8253_p0, %p8252_p13 }
  0x87   : > { %p8248_p12 = pneg %p8247_p11 }
  0x89   : > { %p8255_p5 = pnand %p8254_p2, %p8248_p12 }
  0x8b   : > { %8258 = shalt.err (!%p8255_p5)
}
  0x8c   : > { %7680 = dma.hbm_to_vmem [thread:$0]  (!%p9405_p6), %s10576_s25, 4096, %s9409_s26, [#allocation12], %s10499_s1, %s10499_s1, %s10501_s15  }
  0x8d   : > { %s8259_s16 = scalar_lea.hbm %s10575_s3, 4096 }
  0x8e   : > { %p8260_p7 = scmp.ne.s32.totalorder %s10575_s3, %s8259_s16  ;;  %p8266_p3 = scmp.lt.u32.totalorder %s8259_s16, %s10575_s3 }
  0x90   : > { %p8262_p4 = pnand %p8260_p7, %p9417_p8 }
  0x92   : > { %p8263_p1 = pneg %p8262_p4 }
  0x94   : > { %p8268_p9 = pnand %p8266_p3, %p8263_p1 }
  0x96   : > { %8271 = shalt.err (!%p8268_p9)
}
  0x97   : > { %s8272_s22 = scalar_lea.vmem %s9411_s2, 4096  ;;  %p8280_p13 = scmp.lt.s32.totalorder %s9411_s2, %s9411_s2 }
  0x98   : > { %p8273_p10 = scmp.ne.s32.totalorder %s9411_s2, %s8272_s22  ;;  %p8281_p0 = scmp.lt.s32.totalorder %s8272_s22, %s8272_s22 }
  0x9a   : > { %p8275_p11 = pnand %p8273_p10, %p9417_p8  ;;  %p8282_p2 = por %p8281_p0, %p8280_p13 }
  0x9c   : > { %p8276_p12 = pneg %p8275_p11 }
  0x9e   : > { %p8283_p5 = pnand %p8282_p2, %p8276_p12 }
  0xa0   : > { %8286 = shalt.err (!%p8283_p5)
}
  0xa1   : > { %7686 = dma.hbm_to_vmem [thread:$0]  (!%p9405_p6), %s10575_s3, 4096, %s9411_s2, [#allocation15], %s10499_s1, %s10499_s1, %s10501_s15  }
  0xa2   : > { %s9179_s26 = smov [#allocation17]   ;;  %s9180_s16 = smov [#allocation20]  }
  0xa3   : > { %s836_s23 = sshll.u32 %s9179_s26, 4  ;;  %s861_s22 = sshll.u32 %s9180_s16, 4  ;;  %s837_s23 = int_to_ptr.vmem [resolvable:$true] %s836_s23  ;;  %s862_s22 = int_to_ptr.vmem [resolvable:$true] %s861_s22 }
  0xa4   : > { %s8287_s17 = scalar_lea.hbm %s10569_s14, 1024 }
  0xa5   : > { %p8288_p7 = scmp.ne.s32.totalorder %s10569_s14, %s8287_s17  ;;  %p8294_p3 = scmp.lt.u32.totalorder %s8287_s17, %s10569_s14 }
  0xa7   : > { %p8290_p4 = pnand %p8288_p7, %p9417_p8 }
  0xa9   : > { %p8291_p1 = pneg %p8290_p4 }
  0xab   : > { %p8296_p9 = pnand %p8294_p3, %p8291_p1 }
  0xad   : > { %8299 = shalt.err (!%p8296_p9)
}
  0xae   : > { %s8300_s25 = scalar_lea.vmem %s837_s23, 1024  ;;  %p8308_p13 = scmp.lt.s32.totalorder %s837_s23, %s837_s23 }
  0xaf   : > { %p8301_p10 = scmp.ne.s32.totalorder %s837_s23, %s8300_s25  ;;  %p8309_p0 = scmp.lt.s32.totalorder %s8300_s25, %s8300_s25 }
  0xb1   : > { %p8303_p11 = pnand %p8301_p10, %p9417_p8  ;;  %p8310_p2 = por %p8309_p0, %p8308_p13 }
  0xb3   : > { %p8304_p12 = pneg %p8303_p11 }
  0xb5   : > { %p8311_p5 = pnand %p8310_p2, %p8304_p12 }
  0xb7   : > { %8314 = shalt.err (!%p8311_p5)
}
  0xb8   : > { %7692 = dma.hbm_to_vmem [thread:$0]  (!%p9405_p6), %s10569_s14, 1024, %s837_s23, [#allocation18], %s10499_s1, %s10499_s1, %s10501_s15  }
  0xb9   : > { %s8315_s17 = scalar_lea.hbm %s10566_s24, 16 }
  0xba   : > { %p8316_p7 = scmp.ne.s32.totalorder %s10566_s24, %s8315_s17  ;;  %p8322_p3 = scmp.lt.u32.totalorder %s8315_s17, %s10566_s24 }
  0xbc   : > { %p8318_p4 = pnand %p8316_p7, %p9417_p8 }
  0xbe   : > { %p8319_p1 = pneg %p8318_p4 }
  0xc0   : > { %p8324_p9 = pnand %p8322_p3, %p8319_p1 }
  0xc2   : > { %8327 = shalt.err (!%p8324_p9)
}
  0xc3   : > { %s8328_s25 = scalar_lea.vmem %s862_s22, 16  ;;  %s8335_s2 = scalar_lea.vmem %s862_s22, 32 }
  0xc4   : > { %p8329_p10 = scmp.ne.s32.totalorder %s862_s22, %s8328_s25  ;;  %p8336_p13 = scmp.lt.s32.totalorder %s862_s22, %s862_s22 }
  0xc5   : > { %p8337_p0 = scmp.lt.s32.totalorder %s8335_s2, %s8328_s25 }
  0xc6   : > { %p8331_p11 = pnand %p8329_p10, %p9417_p8 }
  0xc7   : > { %p8338_p2 = por %p8337_p0, %p8336_p13 }
  0xc8   : > { %p8332_p12 = pneg %p8331_p11 }
  0xca   : > { %p8339_p5 = pnand %p8338_p2, %p8332_p12 }
  0xcc   : > { %8342 = shalt.err (!%p8339_p5)
}
  0xcd   : > { %7698 = dma.hbm_to_vmem [thread:$0]  (!%p9405_p6), %s10566_s24, 16, %s862_s22, [#allocation21]  }
  0xce   : > { %s9181_s26 = smov [#allocation23]   ;;  %s9182_s16 = smov [#allocation26]  }
  0xcf   : > { %s882_s23 = sshll.u32 %s9181_s26, 4  ;;  %s908_s17 = sshll.u32 %s9182_s16, 4  ;;  %s883_s23 = int_to_ptr.vmem [resolvable:$true] %s882_s23  ;;  %s909_s17 = int_to_ptr.vmem [resolvable:$true] %s908_s17 }
  0xd0   : > { %s8343_s1 = scalar_lea.hbm %s10572_s6, 4096 }
  0xd1   : > { %p8344_p7 = scmp.ne.s32.totalorder %s10572_s6, %s8343_s1  ;;  %p8350_p3 = scmp.lt.u32.totalorder %s8343_s1, %s10572_s6 }
  0xd3   : > { %p8346_p4 = pnand %p8344_p7, %p9417_p8 }
  0xd5   : > { %p8347_p1 = pneg %p8346_p4 }
  0xd7   : > { %p8352_p9 = pnand %p8350_p3, %p8347_p1 }
  0xd9   : > { %8355 = shalt.err (!%p8352_p9)
}
  0xda   : > { %s8356_s25 = scalar_lea.vmem %s883_s23, 4096  ;;  %p8364_p13 = scmp.lt.s32.totalorder %s883_s23, %s883_s23 }
  0xdb   : > { %p8357_p10 = scmp.ne.s32.totalorder %s883_s23, %s8356_s25  ;;  %p8365_p0 = scmp.lt.s32.totalorder %s8356_s25, %s8356_s25 }
  0xdd   : > { %p8359_p11 = pnand %p8357_p10, %p9417_p8  ;;  %p8366_p2 = por %p8365_p0, %p8364_p13 }
  0xdf   : > { %p8360_p12 = pneg %p8359_p11 }
  0xe1   : > { %p8367_p5 = pnand %p8366_p2, %p8360_p12 }
  0xe3   : > { %8370 = shalt.err (!%p8367_p5)
}
  0xe4   : > { %s10582_s22 = smov 64   ;;  %s8371_s1 = scalar_lea.hbm %s10567_s20, 4096 }
  0xe5   : > { %7704 = dma.hbm_to_vmem [thread:$0]  (!%p9405_p6), %s10572_s6, 4096, %s883_s23, [#allocation24], %s10582_s22, %s10582_s22, %s10501_s15  }
  0xe6   : > { %p8372_p7 = scmp.ne.s32.totalorder %s10567_s20, %s8371_s1  ;;  %p8378_p3 = scmp.lt.u32.totalorder %s8371_s1, %s10567_s20 }
  0xe8   : > { %p8374_p4 = pnand %p8372_p7, %p9417_p8 }
  0xea   : > { %p8375_p1 = pneg %p8374_p4 }
  0xec   : > { %p8380_p9 = pnand %p8378_p3, %p8375_p1 }
  0xee   : > { %8383 = shalt.err (!%p8380_p9)
}
  0xef   : > { %s8384_s2 = scalar_lea.vmem %s909_s17, 4096  ;;  %p8392_p13 = scmp.lt.s32.totalorder %s909_s17, %s909_s17 }
  0xf0   : > { %p8385_p10 = scmp.ne.s32.totalorder %s909_s17, %s8384_s2  ;;  %p8393_p0 = scmp.lt.s32.totalorder %s8384_s2, %s8384_s2 }
  0xf2   : > { %p8387_p11 = pnand %p8385_p10, %p9417_p8  ;;  %p8394_p2 = por %p8393_p0, %p8392_p13 }
  0xf4   : > { %p8388_p12 = pneg %p8387_p11 }
  0xf6   : > { %p8395_p5 = pnand %p8394_p2, %p8388_p12 }
  0xf8   : > { %8398 = shalt.err (!%p8395_p5)
}
  0xf9   : > { %7710 = dma.hbm_to_vmem [thread:$0]  (!%p9405_p6), %s10567_s20, 4096, %s909_s17, [#allocation27], %s10582_s22, %s10582_s22, %s10501_s15  }
  0xfa   : > { %s9183_s26 = smov [#allocation29]   ;;  %s9184_s16 = smov [#allocation32]  }
  0xfb   : > { %s934_s23 = sshll.u32 %s9183_s26, 4  ;;  %s960_s25 = sshll.u32 %s9184_s16, 4  ;;  %s935_s23 = int_to_ptr.vmem [resolvable:$true] %s934_s23  ;;  %s961_s25 = int_to_ptr.vmem [resolvable:$true] %s960_s25 }
  0xfc   : > { %s8399_s1 = scalar_lea.hbm %s10574_s4, 4096 }
  0xfd   : > { %p8400_p7 = scmp.ne.s32.totalorder %s10574_s4, %s8399_s1  ;;  %p8406_p3 = scmp.lt.u32.totalorder %s8399_s1, %s10574_s4 }
  0xff   : > { %p8402_p4 = pnand %p8400_p7, %p9417_p8 }
 0x101   : > { %p8403_p1 = pneg %p8402_p4 }
 0x103   : > { %p8408_p9 = pnand %p8406_p3, %p8403_p1 }
 0x105   : > { %8411 = shalt.err (!%p8408_p9)
}
 0x106   : > { %s8412_s2 = scalar_lea.vmem %s935_s23, 4096  ;;  %p8420_p13 = scmp.lt.s32.totalorder %s935_s23, %s935_s23 }
 0x107   : > { %p8413_p10 = scmp.ne.s32.totalorder %s935_s23, %s8412_s2  ;;  %p8421_p0 = scmp.lt.s32.totalorder %s8412_s2, %s8412_s2 }
 0x109   : > { %p8415_p11 = pnand %p8413_p10, %p9417_p8  ;;  %p8422_p2 = por %p8421_p0, %p8420_p13 }
 0x10b   : > { %p8416_p12 = pneg %p8415_p11 }
 0x10d   : > { %p8423_p5 = pnand %p8422_p2, %p8416_p12 }
 0x10f   : > { %8426 = shalt.err (!%p8423_p5)
}
 0x110   : > { %7716 = dma.hbm_to_vmem [thread:$0]  (!%p9405_p6), %s10574_s4, 4096, %s935_s23, [#allocation30], %s10582_s22, %s10582_s22, %s10501_s15  }
 0x111   : > { %s8427_s17 = scalar_lea.hbm %s10573_s5, 1024 }
 0x112   : > { %p8428_p7 = scmp.ne.s32.totalorder %s10573_s5, %s8427_s17  ;;  %p8434_p3 = scmp.lt.u32.totalorder %s8427_s17, %s10573_s5 }
 0x114   : > { %p8430_p4 = pnand %p8428_p7, %p9417_p8 }
 0x116   : > { %p8431_p1 = pneg %p8430_p4 }
 0x118   : > { %p8436_p9 = pnand %p8434_p3, %p8431_p1 }
 0x11a   : > { %8439 = shalt.err (!%p8436_p9)
}
 0x11b   : > { %s8440_s26 = scalar_lea.vmem %s961_s25, 1024  ;;  %p8448_p13 = scmp.lt.s32.totalorder %s961_s25, %s961_s25 }
 0x11c   : > { %p8441_p10 = scmp.ne.s32.totalorder %s961_s25, %s8440_s26  ;;  %p8449_p0 = scmp.lt.s32.totalorder %s8440_s26, %s8440_s26 }
 0x11e   : > { %p8443_p11 = pnand %p8441_p10, %p9417_p8  ;;  %p8450_p2 = por %p8449_p0, %p8448_p13 }
 0x120   : > { %p8444_p12 = pneg %p8443_p11 }
 0x122   : > { %p8451_p5 = pnand %p8450_p2, %p8444_p12 }
 0x124   : > { %8454 = shalt.err (!%p8451_p5)
}
 0x125   : > { %7722 = dma.hbm_to_vmem [thread:$0]  (!%p9405_p6), %s10573_s5, 1024, %s961_s25, [#allocation33], %s10582_s22, %s10582_s22, %s10501_s15  }
 0x126   : > { %s9185_s23 = smov [#allocation35]   ;;  %s9186_s1 = smov [#allocation38]  }
 0x127   : > { %s985_s16 = sshll.u32 %s9185_s23, 4  ;;  %s1006_s2 = sshll.u32 %s9186_s1, 4  ;;  %s986_s16 = int_to_ptr.vmem [resolvable:$true] %s985_s16  ;;  %s1007_s2 = int_to_ptr.vmem [resolvable:$true] %s1006_s2 }
 0x128   : > { %s8455_s17 = scalar_lea.hbm %s10570_s12, 16 }
 0x129   : > { %p8456_p7 = scmp.ne.s32.totalorder %s10570_s12, %s8455_s17  ;;  %p8462_p3 = scmp.lt.u32.totalorder %s8455_s17, %s10570_s12 }
 0x12b   : > { %p8458_p4 = pnand %p8456_p7, %p9417_p8 }
 0x12d   : > { %p8459_p1 = pneg %p8458_p4 }
 0x12f   : > { %p8464_p9 = pnand %p8462_p3, %p8459_p1 }
 0x131   : > { %8467 = shalt.err (!%p8464_p9)
}
 0x132   : > { %s8468_s26 = scalar_lea.vmem %s986_s16, 16  ;;  %s8475_s25 = scalar_lea.vmem %s986_s16, 32 }
 0x133   : > { %p8469_p10 = scmp.ne.s32.totalorder %s986_s16, %s8468_s26  ;;  %p8476_p13 = scmp.lt.s32.totalorder %s986_s16, %s986_s16 }
 0x134   : > { %p8477_p0 = scmp.lt.s32.totalorder %s8475_s25, %s8468_s26 }
 0x135   : > { %p8471_p11 = pnand %p8469_p10, %p9417_p8 }
 0x136   : > { %p8478_p2 = por %p8477_p0, %p8476_p13 }
 0x137   : > { %p8472_p12 = pneg %p8471_p11 }
 0x139   : > { %p8479_p5 = pnand %p8478_p2, %p8472_p12 }
 0x13b   : > { %8482 = shalt.err (!%p8479_p5)
}
 0x13c   : > { %7728 = dma.hbm_to_vmem [thread:$0]  (!%p9405_p6), %s10570_s12, 16, %s986_s16, [#allocation36]  }
 0x13d   : > { %s8483_s23 = scalar_lea.hbm %s9336_s30, 2048 }
 0x13e   : > { %p8484_p7 = scmp.ne.s32.totalorder %s9336_s30, %s8483_s23  ;;  %p8490_p3 = scmp.lt.u32.totalorder %s8483_s23, %s9336_s30 }
 0x140   : > { %p8486_p4 = pnand %p8484_p7, %p9417_p8 }
 0x142   : > { %p8487_p1 = pneg %p8486_p4 }
 0x144   : > { %p8492_p9 = pnand %p8490_p3, %p8487_p1 }
 0x146   : > { %8495 = shalt.err (!%p8492_p9)
}
 0x147   : > { %s8496_s1 = scalar_lea.vmem %s1007_s2, 2048  ;;  %p8504_p13 = scmp.lt.s32.totalorder %s1007_s2, %s1007_s2 }
 0x148   : > { %p8497_p10 = scmp.ne.s32.totalorder %s1007_s2, %s8496_s1  ;;  %p8505_p0 = scmp.lt.s32.totalorder %s8496_s1, %s8496_s1 }
 0x14a   : > { %p8499_p11 = pnand %p8497_p10, %p9417_p8  ;;  %p8506_p2 = por %p8505_p0, %p8504_p13 }
 0x14c   : > { %p8500_p12 = pneg %p8499_p11 }
 0x14e   : > { %p8507_p5 = pnand %p8506_p2, %p8500_p12 }
 0x150   : > { %8510 = shalt.err (!%p8507_p5)
}
 0x151   : > { %s9187_s16 = smov 128   ;;  %s9188_s17 = smov 8  }
 0x152   : > { %7734 = dma.hbm_to_vmem [thread:$0]  (!%p9405_p6), %s9336_s30, 2048, %s1007_s2, [#allocation39], %s9187_s16, %s9187_s16, %s9188_s17  }
 0x153   : > { %s9189_s26 = smov [#allocation41]   ;;  %s9190_s23 = smov [#allocation44]  }
 0x154   : > { %s1030_s25 = sshll.u32 %s9189_s26, 4  ;;  %s1055_s15 = sshll.u32 %s9190_s23, 4  ;;  %s1031_s25 = int_to_ptr.vmem [resolvable:$true] %s1030_s25  ;;  %s1056_s15 = int_to_ptr.vmem [resolvable:$true] %s1055_s15 }
 0x155   : > { %s8511_s3 = scalar_lea.hbm %s10568_s19, 2048 }
 0x156   : > { %p8512_p7 = scmp.ne.s32.totalorder %s10568_s19, %s8511_s3  ;;  %p8518_p3 = scmp.lt.u32.totalorder %s8511_s3, %s10568_s19 }
 0x158   : > { %p8514_p4 = pnand %p8512_p7, %p9417_p8 }
 0x15a   : > { %p8515_p1 = pneg %p8514_p4 }
 0x15c   : > { %p8520_p9 = pnand %p8518_p3, %p8515_p1 }
 0x15e   : > { %8523 = shalt.err (!%p8520_p9)
}
 0x15f   : > { %s8524_s1 = scalar_lea.vmem %s1031_s25, 2048  ;;  %p8532_p13 = scmp.lt.s32.totalorder %s1031_s25, %s1031_s25 }
 0x160   : > { %p8525_p10 = scmp.ne.s32.totalorder %s1031_s25, %s8524_s1  ;;  %p8533_p0 = scmp.lt.s32.totalorder %s8524_s1, %s8524_s1 }
 0x162   : > { %p8527_p11 = pnand %p8525_p10, %p9417_p8  ;;  %p8534_p2 = por %p8533_p0, %p8532_p13 }
 0x164   : > { %p8528_p12 = pneg %p8527_p11 }
 0x166   : > { %p8535_p5 = pnand %p8534_p2, %p8528_p12 }
 0x168   : > { %8538 = shalt.err (!%p8535_p5)
}
 0x169   : > { %s10583_s2 = smov 4   ;;  %s8539_s3 = scalar_lea.hbm %s10571_s8, 16 }
 0x16a   : > { %7740 = dma.hbm_to_vmem [thread:$0]  (!%p9405_p6), %s10568_s19, 2048, %s1031_s25, [#allocation42], %s10582_s22, %s10582_s22, %s10583_s2  }
 0x16b   : > { %p8540_p7 = scmp.ne.s32.totalorder %s10571_s8, %s8539_s3  ;;  %p8546_p3 = scmp.lt.u32.totalorder %s8539_s3, %s10571_s8 }
 0x16d   : > { %p8542_p4 = pnand %p8540_p7, %p9417_p8 }
 0x16f   : > { %p8543_p1 = pneg %p8542_p4 }
 0x171   : > { %p8548_p9 = pnand %p8546_p3, %p8543_p1 }
 0x173   : > { %8551 = shalt.err (!%p8548_p9)
}
 0x174   : > { %s8552_s16 = scalar_lea.vmem %s1056_s15, 16  ;;  %s8559_s17 = scalar_lea.vmem %s1056_s15, 32 }
 0x175   : > { %p8553_p10 = scmp.ne.s32.totalorder %s1056_s15, %s8552_s16  ;;  %p8560_p13 = scmp.lt.s32.totalorder %s1056_s15, %s1056_s15 }
 0x176   : > { %p8561_p0 = scmp.lt.s32.totalorder %s8559_s17, %s8552_s16 }
 0x177   : > { %p8555_p11 = pnand %p8553_p10, %p9417_p8 }
 0x178   : > { %p8562_p2 = por %p8561_p0, %p8560_p13 }
 0x179   : > { %p8556_p12 = pneg %p8555_p11 }
 0x17b   : > { %p8563_p5 = pnand %p8562_p2, %p8556_p12 }
 0x17d   : > { %8566 = shalt.err (!%p8563_p5)
}
 0x17e   : > { %7746 = dma.hbm_to_vmem [thread:$0]  (!%p9405_p6), %s10571_s8, 16, %s1056_s15, [#allocation45]  }
 0x17f   : > { %s6257_s26 = sadd.s32 4294967294, %s9143_s11   ;;  %s9593_s25 = sadd.s32 1, %s9143_s11  }
 0x180   : > { %s98_s23 = sadd.s32 1, %s9139_s10  ;;  %s95_s1 = ssub.s32 %s9143_s11, %s9593_s25 }
 0x181   : > { %p105_p7 = scmp.ne.s32.totalorder %s9139_s10, %s9135_s7  ;;  %p96_p4 = scmp.eq.s32.totalorder %s95_s1, 0 }
 0x182   : > { %p106_p1 = scmp.eq.s32.totalorder %s9143_s11, 0  ;;  %p111_p3 = scmp.ne.s32.totalorder %s9135_s7, %s9131_s0 }
 0x183   : > { %p733_p9 = scmp.eq.s32.totalorder %s9389_s18, 1  ;;  %p10584_p11 = scmp.eq.s32.totalorder %s9389_s18, 0 }
 0x184   : > { %s9605_s3 = scalar_select %p96_p4, %s9139_s10, %s98_s23  }
 0x185   : > { %p107_p10 = por %p106_p1, %p105_p7  ;;  %p9609_p12 = por %p10584_p11, %p111_p3 }
 0x186   : > { %p9613_p13 = por %p733_p9, %p105_p7  ;;  %p739_p0 = scmp.eq.s32.totalorder %s6257_s26, 1 }
 0x187   : > { %s10585_s15 = scalar_select %p9609_p12, 1, 0 }
 0x188   : > { %s10586_s16 = scalar_select %p9613_p13, 1, 0 }
 0x189   : > { %p7790_p2 = scmp.lt.s32.totalorder %s9143_s11, 2  ;;  %s9619_s17 = sand.u32 1, %s9139_s10  }
 0x18a   : > { %p9621_p5 = por %p739_p0, %p111_p3  ;;  %s1095_s23 = sand.u32 1, %s9143_s11  }
 0x18b   : > { %p9626_p4 = pnand %p7790_p2, %p107_p10  ;;  %s6288_s5 = sshll.u32 %s9619_s17, 3 }
 0x18c   : > { %s10587_s1 = scalar_select %p9621_p5, 1, 0 }
 0x18d   : > { %s10588_s4 = scalar_select %p9626_p4, 1, 0 }
 0x18e   : > { %s6624_s6 = sshll.u32 %s9143_s11, 7  ;;  %s1099_s26 = scalar_lea.vmem [#allocation5], %s6288_s5 }
 0x18f   : > { %s9633_s8 = scalar_lea.hbm %s10565_s9, %s6624_s6  ;;  %s1106_s12 = sshll.u32 %s1099_s26, 4  ;;  %s9635_s12 = int_to_ptr.vmem [resolvable:$true] %s1106_s12 }
 0x190   : > { %s9637_s14 = scalar_lea.sflag [#allocation6], %s1095_s23  ;;  %s8567_s19 = scalar_lea.hbm %s9633_s8, 128 }
 0x191   : > { %p8568_p7 = scmp.ne.s32.totalorder %s9633_s8, %s8567_s19  ;;  %p9643_p1 = pneg %p9626_p4 }
 0x192   : > { %s8572_s6 = scalar_lea.hbm %s10565_s9, 256  ;;  %p8573_p10 = scmp.lt.u32.totalorder %s9633_s8, %s10565_s9 }
 0x193   : > { %s10589_s20 = scalar_select %p9643_p1, 1, 0 }
 0x194   : > { %p8570_p3 = pnand %p9643_p1, %p8568_p7  ;;  %p8574_p11 = scmp.lt.u32.totalorder %s8572_s6, %s8567_s19 }
 0x195   : > { %p8576_p2 = scmp.lt.u32.totalorder %s8567_s19, %s9633_s8 }
 0x196   : > { %p8571_p9 = pneg %p8570_p3  ;;  %p8575_p0 = por %p8574_p11, %p8573_p10 }
 0x198   : > { %p8577_p5 = por %p8576_p2, %p8575_p0 }
 0x19a   : > { %p8578_p13 = pnand %p8577_p5, %p8571_p9 }
 0x19c   : > { %8581 = shalt.err (!%p8578_p13)
}
 0x19d   : > { %s8582_s5 = scalar_lea.vmem %s9635_s12, 128  ;;  %s9191_s23 = smov [#allocation5]  }
 0x19e   : > { %p8583_p12 = scmp.ne.s32.totalorder %s9635_s12, %s8582_s5  ;;  %s8587_s26 = sshll.u32 %s9191_s23, 4  ;;  %s8588_s26 = int_to_ptr.vmem [resolvable:$false] %s8587_s26 }
 0x19f   : > { %s8589_s24 = scalar_lea.vmem %s8588_s26, 256  ;;  %p8590_p7 = scmp.lt.s32.totalorder %s9635_s12, %s8588_s26 }
 0x1a0   : > { %p8585_p6 = pnand %p8583_p12, %p9643_p1  ;;  %p8591_p3 = scmp.lt.s32.totalorder %s8589_s24, %s8582_s5 }
 0x1a2   : > { %p8586_p8 = pneg %p8585_p6  ;;  %p8592_p10 = por %p8591_p3, %p8590_p7 }
 0x1a4   : > { %p8593_p11 = pnand %p8592_p10, %p8586_p8 }
 0x1a6   : > { %8596 = shalt.err (!%p8593_p11)
}
 0x1a7   : > { %7756 = dma.hbm_to_vmem [thread:$0]  (!%p9626_p4), %s9633_s8, 128, %s9635_s12, %s9637_s14, %s10582_s22, %s10582_s22, %s10583_s2  }
 0x1a8   : > { %s9192_s19 = smov [#allocation10]   ;;  %s8597_s24 = scalar_lea.hbm %s10564_s21, 64 }
 0x1a9   : > { %s771_s6 = sshll.u32 %s9192_s19, 4  ;;  %p8598_p6 = scmp.ne.s32.totalorder %s10564_s21, %s8597_s24  ;;  %s772_s6 = int_to_ptr.vmem [resolvable:$true] %s771_s6 }
 0x1aa   : > { %p10590_p8 = scmp.ne.s32.totalorder %s10581_s29, 0  ;;  %p8604_p5 = scmp.lt.u32.totalorder %s8597_s24, %s10564_s21 }
 0x1ac   : > { %p8600_p12 = pnand %p8598_p6, %p10590_p8 }
 0x1ae   : > { %p8601_p13 = pneg %p8600_p12 }
 0x1b0   : > { %p8606_p9 = pnand %p8604_p5, %p8601_p13 }
 0x1b2   : > { %8609 = shalt.err (!%p8606_p9)
}
 0x1b3   : > { %s8610_s5 = scalar_lea.vmem %s772_s6, 64  ;;  %p8618_p3 = scmp.lt.s32.totalorder %s772_s6, %s772_s6 }
 0x1b4   : > { %p8611_p0 = scmp.ne.s32.totalorder %s772_s6, %s8610_s5  ;;  %p8619_p10 = scmp.lt.s32.totalorder %s8610_s5, %s8610_s5 }
 0x1b6   : > { %p8613_p2 = pnand %p8611_p0, %p10590_p8  ;;  %p8620_p11 = por %p8619_p10, %p8618_p3 }
 0x1b8   : > { %p8614_p7 = pneg %p8613_p2 }
 0x1ba   : > { %p8621_p4 = pnand %p8620_p11, %p8614_p7 }
 0x1bc   : > { %8624 = shalt.err (!%p8621_p4)
}
 0x1bd   : > { %s10525_s8 = smov 16   ;;  %s10591_s12 = sld [smem:[#allocation70_spill]] }
 0x1be   : > { %s10527_s22 = smov 1   ;;  %p10592_p6 = scmp.ne.s32.totalorder %s10580_s28, 0 }
 0x1bf   : > { %s9195_s2 = smov [#allocation13]   ;;  %s9196_s26 = smov [#allocation16]  }
 0x1c0   : > { %7677 = dma.hbm_to_vmem [thread:$0]  (!%p10592_p6), %s10564_s21, 64, %s772_s6, [#allocation9], %s10525_s8, %s10525_s8, %s10527_s22  }
 0x1c1   : > { %s797_s23 = sshll.u32 %s9195_s2, 4  ;;  %s823_s19 = sshll.u32 %s9196_s26, 4  ;;  %s798_s23 = int_to_ptr.vmem [resolvable:$true] %s797_s23  ;;  %s9679_s19 = int_to_ptr.vmem [resolvable:$true] %s823_s19 }
 0x1c3   : > { %s8625_s24 = scalar_lea.hbm %s10591_s12, 64 }
 0x1c4   : > { %p8626_p4 = scmp.ne.s32.totalorder %s10591_s12, %s8625_s24  ;;  %p8632_p5 = scmp.lt.u32.totalorder %s8625_s24, %s10591_s12 }
 0x1c6   : > { %p8628_p12 = pnand %p8626_p4, %p10590_p8 }
 0x1c8   : > { %p8629_p13 = pneg %p8628_p12 }
 0x1ca   : > { %p8634_p9 = pnand %p8632_p5, %p8629_p13 }
 0x1cc   : > { %8637 = shalt.err (!%p8634_p9)
}
 0x1cd   : > { %s8638_s5 = scalar_lea.vmem %s798_s23, 64  ;;  %p8646_p3 = scmp.lt.s32.totalorder %s798_s23, %s798_s23 }
 0x1ce   : > { %p8639_p0 = scmp.ne.s32.totalorder %s798_s23, %s8638_s5  ;;  %p8647_p10 = scmp.lt.s32.totalorder %s8638_s5, %s8638_s5 }
 0x1d0   : > { %p8641_p2 = pnand %p8639_p0, %p10590_p8  ;;  %p8648_p11 = por %p8647_p10, %p8646_p3 }
 0x1d2   : > { %p8642_p7 = pneg %p8641_p2 }
 0x1d4   : > { %p8649_p1 = pnand %p8648_p11, %p8642_p7 }
 0x1d6   : > { %8652 = shalt.err (!%p8649_p1)
}
 0x1d7   : > { %s10593_s6 = sld [smem:[#allocation72_spill]] }
 0x1d8   : > { %7683 = dma.hbm_to_vmem [thread:$0]  (!%p10592_p6), %s10591_s12, 64, %s798_s23, [#allocation12], %s10525_s8, %s10525_s8, %s10527_s22  }
 0x1dd   : > { %s8653_s2 = scalar_lea.hbm %s10593_s6, 64 }
 0x1de   : > { %p8654_p4 = scmp.ne.s32.totalorder %s10593_s6, %s8653_s2  ;;  %p8660_p5 = scmp.lt.u32.totalorder %s8653_s2, %s10593_s6 }
 0x1e0   : > { %p8656_p12 = pnand %p8654_p4, %p10590_p8 }
 0x1e2   : > { %p8657_p13 = pneg %p8656_p12 }
 0x1e4   : > { %p8662_p9 = pnand %p8660_p5, %p8657_p13 }
 0x1e6   : > { %8665 = shalt.err (!%p8662_p9)
}
 0x1e7   : > { %s8666_s26 = scalar_lea.vmem %s9679_s19, 64  ;;  %p8674_p7 = scmp.lt.s32.totalorder %s9679_s19, %s9679_s19 }
 0x1e8   : > { %p8667_p1 = scmp.ne.s32.totalorder %s9679_s19, %s8666_s26  ;;  %p8675_p3 = scmp.lt.s32.totalorder %s8666_s26, %s8666_s26 }
 0x1ea   : > { %p8669_p0 = pnand %p8667_p1, %p10590_p8  ;;  %p8676_p10 = por %p8675_p3, %p8674_p7 }
 0x1ec   : > { %p8670_p2 = pneg %p8669_p0 }
 0x1ee   : > { %p8677_p11 = pnand %p8676_p10, %p8670_p2 }
 0x1f0   : > { %8680 = shalt.err (!%p8677_p11)
}
 0x1f1   : > { %s10594_s23 = sld [smem:[#allocation74_spill]]  ;;  %s9197_s24 = smov [#allocation19]  }
 0x1f2   : > { %7689 = dma.hbm_to_vmem [thread:$0]  (!%p10592_p6), %s10593_s6, 64, %s9679_s19, [#allocation15], %s10525_s8, %s10525_s8, %s10527_s22  }
 0x1f3   : > { %s850_s5 = sshll.u32 %s9197_s24, 4  ;;  %s9198_s2 = smov [#allocation22]   ;;  %s851_s5 = int_to_ptr.vmem [resolvable:$true] %s850_s5 }
 0x1f4   : > { %s872_s9 = sshll.u32 %s9198_s2, 4  ;;  %s9712_s9 = int_to_ptr.vmem [resolvable:$true] %s872_s9 }
 0x1f7   : > { %s8681_s26 = scalar_lea.hbm %s10594_s23, 16 }
 0x1f8   : > { %p8682_p4 = scmp.ne.s32.totalorder %s10594_s23, %s8681_s26  ;;  %p8688_p5 = scmp.lt.u32.totalorder %s8681_s26, %s10594_s23 }
 0x1fa   : > { %p8684_p12 = pnand %p8682_p4, %p10590_p8 }
 0x1fc   : > { %p8685_p13 = pneg %p8684_p12 }
 0x1fe   : > { %p8690_p9 = pnand %p8688_p5, %p8685_p13 }
 0x200   : > { %8693 = shalt.err (!%p8690_p9)
}
 0x201   : > { %s8694_s12 = scalar_lea.vmem %s851_s5, 16  ;;  %s8701_s19 = scalar_lea.vmem %s851_s5, 32 }
 0x202   : > { %p8695_p1 = scmp.ne.s32.totalorder %s851_s5, %s8694_s12  ;;  %p8702_p7 = scmp.lt.s32.totalorder %s851_s5, %s851_s5 }
 0x203   : > { %p8703_p3 = scmp.lt.s32.totalorder %s8701_s19, %s8694_s12 }
 0x204   : > { %p8697_p0 = pnand %p8695_p1, %p10590_p8 }
 0x205   : > { %p8704_p10 = por %p8703_p3, %p8702_p7 }
 0x206   : > { %p8698_p2 = pneg %p8697_p0 }
 0x208   : > { %p8705_p11 = pnand %p8704_p10, %p8698_p2 }
 0x20a   : > { %8708 = shalt.err (!%p8705_p11)
}
 0x20b   : > { %s10595_s24 = sld [smem:[#allocation76_spill]] }
 0x20c   : > { %7695 = dma.hbm_to_vmem [thread:$0]  (!%p10592_p6), %s10594_s23, 16, %s851_s5, [#allocation18]  }
 0x211   : > { %s8709_s2 = scalar_lea.hbm %s10595_s24, 16 }
 0x212   : > { %p8710_p4 = scmp.ne.s32.totalorder %s10595_s24, %s8709_s2  ;;  %p8716_p5 = scmp.lt.u32.totalorder %s8709_s2, %s10595_s24 }
 0x214   : > { %p8712_p12 = pnand %p8710_p4, %p10590_p8 }
 0x216   : > { %p8713_p13 = pneg %p8712_p12 }
 0x218   : > { %p8718_p9 = pnand %p8716_p5, %p8713_p13 }
 0x21a   : > { %8721 = shalt.err (!%p8718_p9)
}
 0x21b   : > { %s8722_s12 = scalar_lea.vmem %s9712_s9, 16  ;;  %s8729_s26 = scalar_lea.vmem %s9712_s9, 32 }
 0x21c   : > { %p8723_p1 = scmp.ne.s32.totalorder %s9712_s9, %s8722_s12  ;;  %p8730_p7 = scmp.lt.s32.totalorder %s9712_s9, %s9712_s9 }
 0x21d   : > { %p8731_p3 = scmp.lt.s32.totalorder %s8729_s26, %s8722_s12 }
 0x21e   : > { %p8725_p0 = pnand %p8723_p1, %p10590_p8 }
 0x21f   : > { %p8732_p10 = por %p8731_p3, %p8730_p7 }
 0x220   : > { %p8726_p2 = pneg %p8725_p0 }
 0x222   : > { %p8733_p11 = pnand %p8732_p10, %p8726_p2 }
 0x224   : > { %8736 = shalt.err (!%p8733_p11)
}
 0x225   : > { %s10596_s5 = sld [smem:[#allocation78_spill]]  ;;  %s9199_s19 = smov [#allocation25]  }
 0x226   : > { %7701 = dma.hbm_to_vmem [thread:$0]  (!%p10592_p6), %s10595_s24, 16, %s9712_s9, [#allocation21]  }
 0x227   : > { %s895_s2 = sshll.u32 %s9199_s19, 4  ;;  %s9200_s8 = smov [#allocation28]   ;;  %s896_s2 = int_to_ptr.vmem [resolvable:$true] %s895_s2 }
 0x228   : > { %s921_s22 = sshll.u32 %s9200_s8, 4  ;;  %s9740_s22 = int_to_ptr.vmem [resolvable:$true] %s921_s22 }
 0x22b   : > { %s8737_s12 = scalar_lea.hbm %s10596_s5, 64 }
 0x22c   : > { %p8738_p4 = scmp.ne.s32.totalorder %s10596_s5, %s8737_s12  ;;  %p8744_p5 = scmp.lt.u32.totalorder %s8737_s12, %s10596_s5 }
 0x22e   : > { %p8740_p12 = pnand %p8738_p4, %p10590_p8 }
 0x230   : > { %p8741_p13 = pneg %p8740_p12 }
 0x232   : > { %p8746_p9 = pnand %p8744_p5, %p8741_p13 }
 0x234   : > { %8749 = shalt.err (!%p8746_p9)
}
 0x235   : > { %s8750_s26 = scalar_lea.vmem %s896_s2, 64  ;;  %p8758_p7 = scmp.lt.s32.totalorder %s896_s2, %s896_s2 }
 0x236   : > { %p8751_p1 = scmp.ne.s32.totalorder %s896_s2, %s8750_s26  ;;  %p8759_p3 = scmp.lt.s32.totalorder %s8750_s26, %s8750_s26 }
 0x238   : > { %p8753_p0 = pnand %p8751_p1, %p10590_p8  ;;  %p8760_p10 = por %p8759_p3, %p8758_p7 }
 0x23a   : > { %p8754_p2 = pneg %p8753_p0 }
 0x23c   : > { %p8761_p11 = pnand %p8760_p10, %p8754_p2 }
 0x23e   : > { %8764 = shalt.err (!%p8761_p11)
}
 0x23f   : > { %s10597_s9 = smov 1   ;;  %s10598_s8 = smov 16  }
 0x240   : > { %s10599_s19 = sld [smem:[#allocation80_spill]] }
 0x241   : > { %7707 = dma.hbm_to_vmem [thread:$0]  (!%p10592_p6), %s10596_s5, 64, %s896_s2, [#allocation24], %s10598_s8, %s10598_s8, %s10597_s9  }
 0x246   : > { %s8765_s12 = scalar_lea.hbm %s10599_s19, 64 }
 0x247   : > { %p8766_p4 = scmp.ne.s32.totalorder %s10599_s19, %s8765_s12  ;;  %p8772_p5 = scmp.lt.u32.totalorder %s8765_s12, %s10599_s19 }
 0x249   : > { %p8768_p12 = pnand %p8766_p4, %p10590_p8 }
 0x24b   : > { %p8769_p13 = pneg %p8768_p12 }
 0x24d   : > { %p8774_p9 = pnand %p8772_p5, %p8769_p13 }
 0x24f   : > { %8777 = shalt.err (!%p8774_p9)
}
 0x250   : > { %s8778_s26 = scalar_lea.vmem %s9740_s22, 64  ;;  %p8786_p7 = scmp.lt.s32.totalorder %s9740_s22, %s9740_s22 }
 0x251   : > { %p8779_p1 = scmp.ne.s32.totalorder %s9740_s22, %s8778_s26  ;;  %p8787_p3 = scmp.lt.s32.totalorder %s8778_s26, %s8778_s26 }
 0x253   : > { %p8781_p0 = pnand %p8779_p1, %p10590_p8  ;;  %p8788_p10 = por %p8787_p3, %p8786_p7 }
 0x255   : > { %p8782_p2 = pneg %p8781_p0 }
 0x257   : > { %p8789_p11 = pnand %p8788_p10, %p8782_p2 }
 0x259   : > { %8792 = shalt.err (!%p8789_p11)
}
 0x25a   : > { %s10600_s2 = sld [smem:[#allocation82_spill]]  ;;  %s9201_s12 = smov [#allocation31]  }
 0x25b   : > { %7713 = dma.hbm_to_vmem [thread:$0]  (!%p10592_p6), %s10599_s19, 64, %s9740_s22, [#allocation27], %s10598_s8, %s10598_s8, %s10597_s9  }
 0x25c   : > { %s947_s5 = sshll.u32 %s9201_s12, 4  ;;  %s9202_s6 = smov [#allocation34]   ;;  %s948_s5 = int_to_ptr.vmem [resolvable:$true] %s947_s5 }
 0x25d   : > { %s974_s21 = sshll.u32 %s9202_s6, 4  ;;  %s9773_s21 = int_to_ptr.vmem [resolvable:$true] %s974_s21 }
 0x260   : > { %s8793_s26 = scalar_lea.hbm %s10600_s2, 64 }
 0x261   : > { %p8794_p4 = scmp.ne.s32.totalorder %s10600_s2, %s8793_s26  ;;  %p8800_p5 = scmp.lt.u32.totalorder %s8793_s26, %s10600_s2 }
 0x263   : > { %p8796_p12 = pnand %p8794_p4, %p10590_p8 }
 0x265   : > { %p8797_p13 = pneg %p8796_p12 }
 0x267   : > { %p8802_p9 = pnand %p8800_p5, %p8797_p13 }
 0x269   : > { %8805 = shalt.err (!%p8802_p9)
}
 0x26a   : > { %s8806_s23 = scalar_lea.vmem %s948_s5, 64  ;;  %p8814_p7 = scmp.lt.s32.totalorder %s948_s5, %s948_s5 }
 0x26b   : > { %p8807_p1 = scmp.ne.s32.totalorder %s948_s5, %s8806_s23  ;;  %p8815_p3 = scmp.lt.s32.totalorder %s8806_s23, %s8806_s23 }
 0x26d   : > { %p8809_p0 = pnand %p8807_p1, %p10590_p8  ;;  %p8816_p10 = por %p8815_p3, %p8814_p7 }
 0x26f   : > { %p8810_p2 = pneg %p8809_p0 }
 0x271   : > { %p8817_p11 = pnand %p8816_p10, %p8810_p2 }
 0x273   : > { %8820 = shalt.err (!%p8817_p11)
}
 0x274   : > { %s10601_s22 = sld [smem:[#allocation84_spill]] }
 0x275   : > { %7719 = dma.hbm_to_vmem [thread:$0]  (!%p10592_p6), %s10600_s2, 64, %s948_s5, [#allocation30], %s10598_s8, %s10598_s8, %s10597_s9  }
 0x27a   : > { %s8821_s6 = scalar_lea.hbm %s10601_s22, 16 }
 0x27b   : > { %p8822_p4 = scmp.ne.s32.totalorder %s10601_s22, %s8821_s6  ;;  %p8828_p5 = scmp.lt.u32.totalorder %s8821_s6, %s10601_s22 }
 0x27d   : > { %p8824_p12 = pnand %p8822_p4, %p10590_p8 }
 0x27f   : > { %p8825_p13 = pneg %p8824_p12 }
 0x281   : > { %p8830_p9 = pnand %p8828_p5, %p8825_p13 }
 0x283   : > { %8833 = shalt.err (!%p8830_p9)
}
 0x284   : > { %s8834_s23 = scalar_lea.vmem %s9773_s21, 16  ;;  %s8841_s12 = scalar_lea.vmem %s9773_s21, 32 }
 0x285   : > { %p8835_p1 = scmp.ne.s32.totalorder %s9773_s21, %s8834_s23  ;;  %p8842_p7 = scmp.lt.s32.totalorder %s9773_s21, %s9773_s21 }
 0x286   : > { %p8843_p3 = scmp.lt.s32.totalorder %s8841_s12, %s8834_s23 }
 0x287   : > { %p8837_p0 = pnand %p8835_p1, %p10590_p8 }
 0x288   : > { %p8844_p10 = por %p8843_p3, %p8842_p7 }
 0x289   : > { %p8838_p2 = pneg %p8837_p0 }
 0x28b   : > { %p8845_p11 = pnand %p8844_p10, %p8838_p2 }
 0x28d   : > { %8848 = shalt.err (!%p8845_p11)
}
 0x28e   : > { %s10602_s5 = sld [smem:[#allocation86_spill]]  ;;  %s9203_s9 = smov [#allocation37]  }
 0x28f   : > { %7725 = dma.hbm_to_vmem [thread:$0]  (!%p10592_p6), %s10601_s22, 16, %s9773_s21, [#allocation33]  }
 0x290   : > { %s996_s8 = sshll.u32 %s9203_s9, 4  ;;  %s9204_s26 = smov [#allocation40]   ;;  %s997_s8 = int_to_ptr.vmem [resolvable:$true] %s996_s8 }
 0x291   : > { %s1020_s6 = sshll.u32 %s9204_s26, 4  ;;  %s9804_s6 = int_to_ptr.vmem [resolvable:$true] %s1020_s6 }
 0x294   : > { %s8849_s23 = scalar_lea.hbm %s10602_s5, 16 }
 0x295   : > { %p8850_p4 = scmp.ne.s32.totalorder %s10602_s5, %s8849_s23  ;;  %p8856_p5 = scmp.lt.u32.totalorder %s8849_s23, %s10602_s5 }
 0x297   : > { %p8852_p12 = pnand %p8850_p4, %p10590_p8 }
 0x299   : > { %p8853_p13 = pneg %p8852_p12 }
 0x29b   : > { %p8858_p9 = pnand %p8856_p5, %p8853_p13 }
 0x29d   : > { %8861 = shalt.err (!%p8858_p9)
}
 0x29e   : > { %s8862_s12 = scalar_lea.vmem %s997_s8, 16  ;;  %s8869_s21 = scalar_lea.vmem %s997_s8, 32 }
 0x29f   : > { %p8863_p1 = scmp.ne.s32.totalorder %s997_s8, %s8862_s12  ;;  %p8870_p7 = scmp.lt.s32.totalorder %s997_s8, %s997_s8 }
 0x2a0   : > { %p8871_p3 = scmp.lt.s32.totalorder %s8869_s21, %s8862_s12 }
 0x2a1   : > { %p8865_p0 = pnand %p8863_p1, %p10590_p8 }
 0x2a2   : > { %p8872_p10 = por %p8871_p3, %p8870_p7 }
 0x2a3   : > { %p8866_p2 = pneg %p8865_p0 }
 0x2a5   : > { %p8873_p11 = pnand %p8872_p10, %p8866_p2 }
 0x2a7   : > { %8876 = shalt.err (!%p8873_p11)
}
 0x2a8   : > { %s10603_s9 = sld [smem:[#allocation87_spill]] }
 0x2a9   : > { %7731 = dma.hbm_to_vmem [thread:$0]  (!%p10592_p6), %s10602_s5, 16, %s997_s8, [#allocation36]  }
 0x2ae   : > { %s8877_s26 = scalar_lea.hbm %s10603_s9, 32 }
 0x2af   : > { %p8878_p4 = scmp.ne.s32.totalorder %s10603_s9, %s8877_s26  ;;  %p8884_p5 = scmp.lt.u32.totalorder %s8877_s26, %s10603_s9 }
 0x2b1   : > { %p8880_p12 = pnand %p8878_p4, %p10590_p8 }
 0x2b3   : > { %p8881_p13 = pneg %p8880_p12 }
 0x2b5   : > { %p8886_p9 = pnand %p8884_p5, %p8881_p13 }
 0x2b7   : > { %8889 = shalt.err (!%p8886_p9)
}
 0x2b8   : > { %s8890_s23 = scalar_lea.vmem %s9804_s6, 32  ;;  %p8898_p7 = scmp.lt.s32.totalorder %s9804_s6, %s9804_s6 }
 0x2b9   : > { %p8891_p1 = scmp.ne.s32.totalorder %s9804_s6, %s8890_s23  ;;  %p8899_p3 = scmp.lt.s32.totalorder %s8890_s23, %s8890_s23 }
 0x2bb   : > { %p8893_p0 = pnand %p8891_p1, %p10590_p8  ;;  %p8900_p10 = por %p8899_p3, %p8898_p7 }
 0x2bd   : > { %p8894_p2 = pneg %p8893_p0 }
 0x2bf   : > { %p8901_p11 = pnand %p8900_p10, %p8894_p2 }
 0x2c1   : > { %8904 = shalt.err (!%p8901_p11)
}
 0x2c2   : > { %7737 = dma.hbm_to_vmem [thread:$0]  (!%p10592_p6), %s10603_s9, 32, %s9804_s6, [#allocation39]  }
 0x2c3   : > { %s9205_s8 = smov [#allocation43]   ;;  %s9206_s21 = smov [#allocation46]  }
 0x2c4   : > { %s1044_s12 = sshll.u32 %s9205_s8, 4  ;;  %s1066_s26 = sshll.u32 %s9206_s21, 4  ;;  %s1045_s12 = int_to_ptr.vmem [resolvable:$true] %s1044_s12  ;;  %s9831_s26 = int_to_ptr.vmem [resolvable:$true] %s1066_s26 }
 0x2c5   : > { %s8905_s23 = scalar_lea.hbm %s9351_s13, 16 }
 0x2c6   : > { %p8906_p4 = scmp.ne.s32.totalorder %s9351_s13, %s8905_s23  ;;  %p8912_p5 = scmp.lt.u32.totalorder %s8905_s23, %s9351_s13 }
 0x2c8   : > { %p8908_p12 = pnand %p8906_p4, %p10590_p8 }
 0x2ca   : > { %p8909_p13 = pneg %p8908_p12 }
 0x2cc   : > { %p8914_p9 = pnand %p8912_p5, %p8909_p13 }
 0x2ce   : > { %8917 = shalt.err (!%p8914_p9)
}
 0x2cf   : > { %s8918_s2 = scalar_lea.vmem %s1045_s12, 16  ;;  %s8925_s6 = scalar_lea.vmem %s1045_s12, 32 }
 0x2d0   : > { %p8919_p1 = scmp.ne.s32.totalorder %s1045_s12, %s8918_s2  ;;  %p8926_p7 = scmp.lt.s32.totalorder %s1045_s12, %s1045_s12 }
 0x2d1   : > { %p8927_p3 = scmp.lt.s32.totalorder %s8925_s6, %s8918_s2 }
 0x2d2   : > { %p8921_p0 = pnand %p8919_p1, %p10590_p8 }
 0x2d3   : > { %p8928_p10 = por %p8927_p3, %p8926_p7 }
 0x2d4   : > { %p8922_p2 = pneg %p8921_p0 }
 0x2d6   : > { %p8929_p11 = pnand %p8928_p10, %p8922_p2 }
 0x2d8   : > { %8932 = shalt.err (!%p8929_p11)
}
 0x2d9   : > { %7743 = dma.hbm_to_vmem [thread:$0]  (!%p10592_p6), %s9351_s13, 16, %s1045_s12, [#allocation42]  }
 0x2da   : > { %s8933_s8 = scalar_lea.hbm %s9361_s27, 16 }
 0x2db   : > { %p8934_p4 = scmp.ne.s32.totalorder %s9361_s27, %s8933_s8  ;;  %p8940_p5 = scmp.lt.u32.totalorder %s8933_s8, %s9361_s27 }
 0x2dd   : > { %p8936_p12 = pnand %p8934_p4, %p10590_p8 }
 0x2df   : > { %p8937_p13 = pneg %p8936_p12 }
 0x2e1   : > { %p8942_p9 = pnand %p8940_p5, %p8937_p13 }
 0x2e3   : > { %8945 = shalt.err (!%p8942_p9)
}
 0x2e4   : > { %s8946_s2 = scalar_lea.vmem %s9831_s26, 16  ;;  %s8953_s21 = scalar_lea.vmem %s9831_s26, 32 }
 0x2e5   : > { %p8947_p1 = scmp.ne.s32.totalorder %s9831_s26, %s8946_s2  ;;  %p8954_p7 = scmp.lt.s32.totalorder %s9831_s26, %s9831_s26 }
 0x2e6   : > { %p8955_p3 = scmp.lt.s32.totalorder %s8953_s21, %s8946_s2 }
 0x2e7   : > { %p8949_p0 = pnand %p8947_p1, %p10590_p8 }
 0x2e8   : > { %p8956_p10 = por %p8955_p3, %p8954_p7 }
 0x2e9   : > { %p8950_p2 = pneg %p8949_p0 }
 0x2eb   : > { %p8957_p11 = pnand %p8956_p10, %p8950_p2 }
 0x2ed   : > { %8960 = shalt.err (!%p8957_p11)
}
 0x2ee   : > { %s10604_s12 = sld [smem:[#allocation64_spill]]  ;;  %s6286_s29 = sshll.u32 %s9619_s17, 2 }
 0x2ef   : > { %7749 = dma.hbm_to_vmem [thread:$0]  (!%p10592_p6), %s9361_s27, 16, %s9831_s26, [#allocation45]  }
 0x2f0   : > { %s6287_s23 = sshll.u32 %s9143_s11, 6  ;;  %s1081_s8 = scalar_lea.vmem [#allocation2], %s6286_s29 }
 0x2f1   : > { %s1088_s28 = sshll.u32 %s1081_s8, 4  ;;  %s1078_s2 = scalar_lea.sflag [#allocation3], %s9619_s17  ;;  %s1089_s28 = int_to_ptr.vmem [resolvable:$true] %s1088_s28 }
 0x2f2   : > { %p10605_p4 = scmp.ne.s32.totalorder %s10589_s20, 0 }
 0x2f4   : > { %s9862_s6 = scalar_lea.hbm %s10604_s12, %s6287_s23  ;;  %s8966_s5 = scalar_lea.hbm %s10604_s12, 128 }
 0x2f5   : > { %s8961_s21 = scalar_lea.hbm %s9862_s6, 64  ;;  %p8967_p5 = scmp.lt.u32.totalorder %s9862_s6, %s10604_s12 }
 0x2f6   : > { %p8962_p8 = scmp.ne.s32.totalorder %s9862_s6, %s8961_s21  ;;  %p8968_p6 = scmp.lt.u32.totalorder %s8966_s5, %s8961_s21 }
 0x2f7   : > { %p8970_p1 = scmp.lt.u32.totalorder %s8961_s21, %s9862_s6 }
 0x2f8   : > { %p8964_p12 = pnand %p8962_p8, %p10605_p4  ;;  %p8969_p9 = por %p8968_p6, %p8967_p5 }
 0x2fa   : > { %p8965_p13 = pneg %p8964_p12  ;;  %p8971_p0 = por %p8970_p1, %p8969_p9 }
 0x2fc   : > { %p8972_p2 = pnand %p8971_p0, %p8965_p13 }
 0x2fe   : > { %8975 = shalt.err (!%p8972_p2)
}
 0x2ff   : > { %s8976_s26 = scalar_lea.vmem %s1089_s28, 64  ;;  %s9207_s29 = smov [#allocation2]  }
 0x300   : > { %p8977_p7 = scmp.ne.s32.totalorder %s1089_s28, %s8976_s26  ;;  %s8981_s23 = sshll.u32 %s9207_s29, 4  ;;  %s8982_s23 = int_to_ptr.vmem [resolvable:$false] %s8981_s23 }
 0x301   : > { %s8983_s8 = scalar_lea.vmem %s8982_s23, 128  ;;  %p8984_p11 = scmp.lt.s32.totalorder %s1089_s28, %s8982_s23 }
 0x302   : > { %p8979_p3 = pnand %p8977_p7, %p10605_p4  ;;  %p8985_p8 = scmp.lt.s32.totalorder %s8983_s8, %s8976_s26 }
 0x304   : > { %p8980_p10 = pneg %p8979_p3  ;;  %p8986_p12 = por %p8985_p8, %p8984_p11 }
 0x306   : > { %p8987_p5 = pnand %p8986_p12, %p8980_p10 }
 0x308   : > { %8990 = shalt.err (!%p8987_p5)
}
 0x309   : > { %p10606_p6 = scmp.ne.s32.totalorder %s10588_s4, 0  ;;  %s10607_s5 = sld [smem:[#allocation66_spill]] }
 0x30a   : > { %s6291_s21 = sshll.u32 %s9143_s11, 4  ;;  %s1119_s9 = scalar_lea.vmem [#allocation7], %s9619_s17 }
 0x30b   : > { %7753 = dma.hbm_to_vmem [thread:$0]  (!%p10606_p6), %s9862_s6, 64, %s1089_s28, %s1078_s2  }
 0x30c   : > { %s1126_s29 = sshll.u32 %s1119_s9, 4  ;;  %s1127_s29 = int_to_ptr.vmem [resolvable:$true] %s1126_s29 }
 0x30f   : > { %s1124_s12 = scalar_lea.hbm %s10607_s5, %s6291_s21  ;;  %s8996_s26 = scalar_lea.hbm %s10607_s5, 32 }
 0x310   : > { %s8991_s23 = scalar_lea.hbm %s1124_s12, 16  ;;  %p8997_p0 = scmp.lt.u32.totalorder %s1124_s12, %s10607_s5 }
 0x311   : > { %p8992_p13 = scmp.ne.s32.totalorder %s1124_s12, %s8991_s23  ;;  %p8998_p2 = scmp.lt.u32.totalorder %s8996_s26, %s8991_s23 }
 0x312   : > { %p9000_p3 = scmp.lt.u32.totalorder %s8991_s23, %s1124_s12 }
 0x313   : > { %p8994_p9 = pnand %p8992_p13, %p10605_p4  ;;  %p8999_p7 = por %p8998_p2, %p8997_p0 }
 0x315   : > { %p8995_p1 = pneg %p8994_p9  ;;  %p9001_p10 = por %p9000_p3, %p8999_p7 }
 0x317   : > { %p9002_p11 = pnand %p9001_p10, %p8995_p1 }
 0x319   : > { %9005 = shalt.err (!%p9002_p11)
}
 0x31a   : > { %s9006_s8 = scalar_lea.vmem %s1127_s29, 16  ;;  %s9208_s17 = smov [#allocation7]  }
 0x31b   : > { %p9007_p8 = scmp.ne.s32.totalorder %s1127_s29, %s9006_s8  ;;  %s9011_s9 = sshll.u32 %s9208_s17, 4  ;;  %s9012_s9 = int_to_ptr.vmem [resolvable:$false] %s9011_s9 }
 0x31c   : > { %s9013_s6 = scalar_lea.vmem %s9012_s9, 32  ;;  %p9014_p13 = scmp.lt.s32.totalorder %s1127_s29, %s9012_s9 }
 0x31d   : > { %p9009_p12 = pnand %p9007_p8, %p10605_p4  ;;  %p9015_p9 = scmp.lt.s32.totalorder %s9013_s6, %s9006_s8 }
 0x31f   : > { %p9010_p5 = pneg %p9009_p12  ;;  %p9016_p6 = por %p9015_p9, %p9014_p13 }
 0x321   : > { %p9017_p0 = pnand %p9016_p6, %p9010_p5 }
 0x323   : > { %9020 = shalt.err (!%p9017_p0)
}
 0x324   : > { %p10608_p2 = scmp.ne.s32.totalorder %s10588_s4, 0  ;;  %s10609_s28 = sld [smem:[#allocation91_spill]] }
 0x326   : > { %7759 = dma.hbm_to_vmem [thread:$0]  (!%p10608_p2), %s1124_s12, 16, %s1127_s29, %s9637_s14  }
 0x32a   : > { %p10610_p1 = scmp.ne.s32.totalorder %s10609_s28, 0 }
 0x32b   : > { %s9893_s20 = sand.u32 (!%p10610_p1), 1, %s9135_s7   ;;  %p10611_p4 = scmp.ne.s32.totalorder (!%p10610_p1), %s10585_s15, 0 }
 0x32c   : > { %1135 = sbr.rel (%p10610_p1) target bundleno = 10168 (0x27b8), region = 136  ;;  %s6293_s2 = sshll.u32 (!%p10610_p1), %s9893_s20, 2 }
 0x32d   : > { %s1138_s21 = scalar_lea.sflag (!%p10610_p1), [#allocation3], %s9893_s20  ;;  %s9899_s23 = scalar_lea.vmem (!%p10610_p1), [#allocation2], %s6293_s2 }
 0x333   : > { %9066 = dma.done.wait (%p10611_p4), %s1138_s21, 64  }
 0x334   : > { %9068 = vsyncadd (%p10611_p4), %s1138_s21, 4294967232  ;;  %s1146_s14 = sand.u32 1, %s9389_s18   ;;  %s6294_s4 = sshll.u32 %s9893_s20, 3 }
 0x335   : > { %s1147_s12 = scalar_lea.sflag [#allocation6], %s1146_s14  ;;  %s9907_s29 = scalar_lea.vmem [#allocation5], %s6294_s4 }
 0x336   : > { %9070 = dma.done.wait (%p10611_p4), %s1147_s12, 144  }
 0x337   : > { %9072 = vsyncadd (%p10611_p4), %s1147_s12, 4294967152  ;;  %s1158_s26 = scalar_lea.vmem [#allocation7], %s9893_s20  ;;  %p10612_p6 = scmp.eq.s32.totalorder %s9389_s18, 0 }
 0x339   : > { %9074 = dma.done.wait (%p10612_p6), [#allocation9], 4160   ;;  %p10613_p7 = pmov %p10612_p6 }
 0x33a   : > { %p10614_p3 = pmov %p10612_p6 }
 0x33b   : > { %9076 = vsyncadd (%p10613_p7), [#allocation9], 4294963136 }
 0x33c   : > { %9078 = dma.done.wait (%p10614_p3), [#allocation12], 4160   ;;  %p10615_p10 = pmov %p10614_p3 }
 0x33d   : > { %p10616_p11 = pmov %p10614_p3 }
 0x33e   : > { %9080 = vsyncadd (%p10615_p10), [#allocation12], 4294963136 }
 0x33f   : > { %9082 = dma.done.wait (%p10616_p11), [#allocation15], 4160   ;;  %p10617_p8 = pmov %p10614_p3 }
 0x340   : > { %p10618_p12 = pmov %p10614_p3 }
 0x341   : > { %9084 = vsyncadd (%p10617_p8), [#allocation15], 4294963136 }
 0x342   : > { %9086 = dma.done.wait (%p10618_p12), [#allocation18], 1040   ;;  %p10619_p5 = pmov %p10614_p3 }
 0x343   : > { %p10620_p13 = pmov %p10614_p3 }
 0x344   : > { %9088 = vsyncadd (%p10619_p5), [#allocation18], 4294966256 }
 0x345   : > { %9090 = dma.done.wait (%p10620_p13), [#allocation21], 32   ;;  %p10621_p9 = pmov %p10614_p3 }
 0x346   : > { %p10622_p0 = pmov %p10614_p3 }
 0x347   : > { %9092 = vsyncadd (%p10621_p9), [#allocation21], 4294967264 }
 0x348   : > { %9094 = dma.done.wait (%p10622_p0), [#allocation24], 4160   ;;  %p10623_p2 = pmov %p10622_p0 }
 0x349   : > { %p10624_p1 = pmov %p10622_p0 }
 0x34a   : > { %9096 = vsyncadd (%p10623_p2), [#allocation24], 4294963136 }
 0x34b   : > { %9098 = dma.done.wait (%p10624_p1), [#allocation27], 4160   ;;  %p10625_p4 = pmov %p10622_p0 }
 0x34c   : > { %p10626_p6 = pmov %p10622_p0 }
 0x34d   : > { %9100 = vsyncadd (%p10625_p4), [#allocation27], 4294963136 }
 0x34e   : > { %9102 = dma.done.wait (%p10626_p6), [#allocation30], 4160   ;;  %p10627_p7 = pmov %p10622_p0 }
 0x34f   : > { %p10628_p3 = pmov %p10622_p0 }
 0x350   : > { %9104 = vsyncadd (%p10627_p7), [#allocation30], 4294963136 }
 0x351   : > { %9106 = dma.done.wait (%p10628_p3), [#allocation33], 1040   ;;  %p10629_p10 = pmov %p10622_p0 }
 0x352   : > { %p10630_p11 = pmov %p10622_p0 }
 0x353   : > { %9108 = vsyncadd (%p10629_p10), [#allocation33], 4294966256 }
 0x354   : > { %9110 = dma.done.wait (%p10630_p11), [#allocation36], 32   ;;  %p10631_p8 = pmov %p10622_p0 }
 0x355   : > { %p10632_p12 = pmov %p10622_p0 }
 0x356   : > { %9112 = vsyncadd (%p10631_p8), [#allocation36], 4294967264 }
 0x357   : > { %9114 = dma.done.wait (%p10632_p12), [#allocation39], 2080   ;;  %p10633_p5 = pmov %p10622_p0 }
 0x358   : > { %p10634_p13 = pmov %p10622_p0 }
 0x359   : > { %9116 = vsyncadd (%p10633_p5), [#allocation39], 4294965216 }
 0x35a   : > { %9118 = dma.done.wait (%p10634_p13), [#allocation42], 2064   ;;  %p10635_p9 = pmov %p10622_p0 }
 0x35c   : > { %9120 = vsyncadd (%p10635_p9), [#allocation42], 4294965232 }
 0x35d   : > { %9122 = dma.done.wait (%p10622_p0), [#allocation45], 32   ;;  %p10636_p2 = pmov %p10622_p0 }
 0x35e   : > { %v9209_v0 = vmov 0.0   ;;  %vm9210_vm0 = vmmov 0   ;;  %v7914_v1 = vld [vmem:[#allocation11] sm:$0xff]   ;;  %v7915_v2 = vld [vmem:[#allocation11 + $0x8] sm:$0xff]   ;;  %v7917_v5 = vld [vmem:[#allocation11 + $0x10] sm:$0xff]   ;;  %vm1694_vm1 = vcmask 261120   ;;  %v1351_v41 = vlaneseq }
 0x35f   : > { %9124 = vsyncadd (%p10636_p2), [#allocation45], 4294967264  ;;  %6939 = vmatprep.subr.bf16.mxu1 %v9209_v0  ;;  %6919 = vmatprep.subr.bf16.mxu0 %v9209_v0  ;;  %v7916_v3 = vld [vmem:[#allocation8] sm:$0xff]   ;;  %v7918_v4 = vld [vmem:[#allocation8 + $0x8] sm:$0xff]   ;;  %vm1742_vm3 = vcmask 64512   ;;  %vm1758_vm4 = vcmask 1043456  }
 0x360   : > { %6955 = vmatprep.mubr.msk.bf16.mxu1 %vm9210_vm0, %v9209_v0  ;;  %6935 = vmatprep.mubr.msk.bf16.mxu0 %vm9210_vm0, %v9209_v0  ;;  %v7920_v6 = vld [vmem:[#allocation8 + $0x10] sm:$0xff]   ;;  %v7919_v7 = vld [vmem:[#allocation11 + $0x18] sm:$0xff]   ;;  %v7921_v9 = vld [vmem:[#allocation11 + $0x20] sm:$0xff]   ;;  %v10013_v42 = vshrl.u32 %v1351_v41, 7  ;;  %v10015_v43 = vand.u32 127, %v1351_v41  ;;  %vm3823_vm7 = vcmask 130048  }
 0x361   : > { %6940 = vmatpush3.bf16.msra.mxu1 %v7914_v1  ;;  %6920 = vmatpush3.bf16.msra.mxu0 %v7916_v3  ;;  %v7922_v8 = vld [vmem:[#allocation8 + $0x18] sm:$0xff]   ;;  %v7923_v10 = vld [vmem:[#allocation11 + $0x28] sm:$0xff]   ;;  %v7924_v11 = vld [vmem:[#allocation8 + $0x20] sm:$0xff]   ;;  %s10637_s15 = sld [smem:[#allocation90_spill]]  ;;  %s6621_s8 = sshll.u32 %s9389_s18, 6 }
 0x362   : > { %6941 = vmatprep.subr.bf16.mxu1 %v9209_v0  ;;  %6921 = vmatprep.subr.bf16.mxu0 %v9209_v0  ;;  %v7926_v12 = vld [vmem:[#allocation8 + $0x28] sm:$0xff]   ;;  %v7925_v13 = vld [vmem:[#allocation11 + $0x30] sm:$0xff]   ;;  %v7927_v15 = vld [vmem:[#allocation11 + $0x38] sm:$0xff]   ;;  %vm1355_vm2 = vcmp.ge.s32.totalorder %v10013_v42, %v10015_v43  ;;  %s1345_s17 = scalar_lea.vmem [#allocation47], %s6293_s2  ;;  %s5858_s28 = scalar_lea.sflag [#allocation4], %s9893_s20 }
 0x363   : > { %v7928_v14 = vld [vmem:[#allocation8 + $0x30] sm:$0xff]   ;;  %v7929_v16 = vld [vmem:[#allocation8 + $0x38] sm:$0xff]   ;;  %v9986_v17 = vld [vmem:[%s9899_s23] sm:$0xf]  ;;  %s5871_s9 = sshll.u32 %s1345_s17, 4  ;;  %p10638_p4 = scmp.ne.s32.totalorder %s10586_s16, 0  ;;  %s10442_s9 = int_to_ptr.vmem [resolvable:$true] %s5871_s9 }
 0x364   : > { %v6331_v18 = vld [vmem:[#allocation13] ss:$0 sm:$0xff]  ;;  %v6322_v23 = vld [vmem:[#allocation10] ss:$0 sm:$0xff]  ;;  %v7930_v33 = vld [vmem:[#allocation14] sm:$0xff]   ;;  %s9021_s21 = scalar_lea.vmem %s10442_s9, 64 }
 0x365   : > { %6942 = vmatpush3.bf16.msra.mxu1 %v7915_v2  ;;  %6922 = vmatpush3.bf16.msra.mxu0 %v7918_v4  ;;  %v7931_v34 = vld [vmem:[#allocation14 + $0x8] sm:$0xff]   ;;  %v7932_v35 = vld [vmem:[#allocation14 + $0x10] sm:$0xff]   ;;  %v7933_v36 = vld [vmem:[#allocation14 + $0x18] sm:$0xff]   ;;  %p9022_p1 = scmp.ne.s32.totalorder %s10442_s9, %s9021_s21  ;;  %s9212_s18 = smov [#allocation47]  }
 0x366   : > { %6943 = vmatprep.subr.bf16.mxu1 %v9209_v0  ;;  %6923 = vmatprep.subr.bf16.mxu0 %v9209_v0  ;;  %v7934_v37 = vld [vmem:[#allocation14 + $0x20] sm:$0xff]   ;;  %v7935_v38 = vld [vmem:[#allocation14 + $0x28] sm:$0xff]   ;;  %v7936_v39 = vld [vmem:[#allocation14 + $0x30] sm:$0xff]  }
 0x367   : > { %v7937_v40 = vld [vmem:[#allocation14 + $0x38] sm:$0xff]   ;;  %v6340_v59 = vld [vmem:[#allocation16] ss:$0 sm:$0xff]  ;;  %v7939_v62 = vld [vmem:[#allocation11 + $0x48] sm:$0xff]   ;;  %s10440_s6 = scalar_lea.hbm %s10637_s15, %s6621_s8  ;;  %p9023_p6 = pnand %p9022_p1, %p10638_p4 }
 0x368   : > { %v7938_v56 = vld [vmem:[#allocation11 + $0x40] sm:$0xff]   ;;  %v7940_v2 = vld [vmem:[#allocation11 + $0x50] sm:$0xff]   ;;  %v7942_v3 = vld [vmem:[#allocation11 + $0x58] sm:$0xff]  }
 0x369   : > { %6944 = vmatpush3.bf16.msra.mxu1 %v7917_v5  ;;  %6924 = vmatpush3.bf16.msra.mxu0 %v7920_v6  ;;  %v7944_v4 = vld [vmem:[#allocation11 + $0x60] sm:$0xff]   ;;  %v7946_v5 = vld [vmem:[#allocation11 + $0x68] sm:$0xff]   ;;  %v7948_v6 = vld [vmem:[#allocation11 + $0x70] sm:$0xff]   ;;  %p9024_p7 = pneg %p9023_p6 }
 0x36a   : > { %6945 = vmatprep.subr.bf16.mxu1 %v9209_v0  ;;  %6925 = vmatprep.subr.bf16.mxu0 %v9209_v0 }
 0x36d   : > { %6946 = vmatpush3.bf16.msra.mxu1 %v7919_v7  ;;  %6926 = vmatpush3.bf16.msra.mxu0 %v7922_v8  ;;  %v7950_v7 = vld [vmem:[#allocation11 + $0x78] sm:$0xff]  }
 0x36e   : > { %6947 = vmatprep.subr.bf16.mxu1 %v9209_v0  ;;  %6927 = vmatprep.subr.bf16.mxu0 %v9209_v0 }
 0x371   : > { %6948 = vmatpush3.bf16.msra.mxu1 %v7921_v9  ;;  %6928 = vmatpush3.bf16.msra.mxu0 %v7924_v11  ;;  %v7941_v11 = vld [vmem:[#allocation8 + $0x40] sm:$0xff]  }
 0x372   : > { %6949 = vmatprep.subr.bf16.mxu1 %v9209_v0  ;;  %6929 = vmatprep.subr.bf16.mxu0 %v9209_v0 }
 0x375   : > { %6950 = vmatpush3.bf16.msra.mxu1 %v7923_v10  ;;  %6930 = vmatpush3.bf16.msra.mxu0 %v7926_v12 }
 0x376   : > { %6951 = vmatprep.subr.bf16.mxu1 %v9209_v0  ;;  %6931 = vmatprep.subr.bf16.mxu0 %v9209_v0 }
 0x379   : > { %6952 = vmatpush3.bf16.msra.mxu1 %v7925_v13  ;;  %6932 = vmatpush3.bf16.msra.mxu0 %v7928_v14  ;;  %v7943_v13 = vld [vmem:[#allocation8 + $0x48] sm:$0xff]   ;;  %v7945_v14 = vld [vmem:[#allocation8 + $0x50] sm:$0xff]  }
 0x37a   : > { %6953 = vmatprep.subr.bf16.mxu1 %v9209_v0  ;;  %6933 = vmatprep.subr.bf16.mxu0 %v9209_v0 }
 0x37d   : > { %6954 = vmatpush3.bf16.msra.mxu1 %v7927_v15  ;;  %6934 = vmatpush3.bf16.msra.mxu0 %v7929_v16  ;;  %v7947_v15 = vld [vmem:[#allocation8 + $0x58] sm:$0xff]   ;;  %v7949_v16 = vld [vmem:[#allocation8 + $0x60] sm:$0xff]  }
 0x37e   : > { %6979 = vmatprep.subr.bf16.mxu1 %v9209_v0  ;;  %6959 = vmatprep.subr.bf16.mxu0 %v9209_v0 }
 0x380   : > { %6956 = vmatmul.mubr.bf16.vlgmr.msra.gmra.mrb[0].mxu1 %v9986_v17  ;;  %6936 = vmatmul.mubr.bf16.vlgmr.msra.gmra.mrb[0].mxu0 %v9986_v17 }
 0x381   : > { %6981 = vmatprep.mubr.msk.bf16.mxu1 %vm9210_vm0, %v9209_v0  ;;  %6975 = vmatprep.mubr.msk.bf16.mxu0 %vm9210_vm0, %v9209_v0 }
 0x382   : > { %6960 = vmatpush3.bf16.msra.mxu0 %v7930_v33 }
 0x383   : > { %6961 = vmatprep.subr.bf16.mxu0 %v9209_v0 }
 0x386   : > { %6962 = vmatpush3.bf16.msra.mxu0 %v7931_v34 }
 0x387   : > { %6963 = vmatprep.subr.bf16.mxu0 %v9209_v0 }
 0x38a   : > { %6964 = vmatpush3.bf16.msra.mxu0 %v7932_v35 }
 0x38b   : > { %6965 = vmatprep.subr.bf16.mxu0 %v9209_v0 }
 0x38e   : > { %6966 = vmatpush3.bf16.msra.mxu0 %v7933_v36 }
 0x38f   : > { %6967 = vmatprep.subr.bf16.mxu0 %v9209_v0 }
 0x392   : > { %6968 = vmatpush3.bf16.msra.mxu0 %v7934_v37 }
 0x393   : > { %6969 = vmatprep.subr.bf16.mxu0 %v9209_v0 }
 0x396   : > { %6970 = vmatpush3.bf16.msra.mxu0 %v7935_v38 }
 0x397   : > { %6971 = vmatprep.subr.bf16.mxu0 %v9209_v0 }
 0x39a   : > { %6972 = vmatpush3.bf16.msra.mxu0 %v7936_v39 }
 0x39b   : > { %6973 = vmatprep.subr.bf16.mxu0 %v9209_v0 }
 0x39e   : > { %6974 = vmatpush3.bf16.msra.mxu0 %v7937_v40 }
 0x39f   : > { %7011 = vmatprep.subr.bf16.mxu0 %v9209_v0 }
 0x3a1   : > { %6976 = vmatmul.mubr.bf16.vlgmr.msra.gmra.mrb[4].mxu0 %v9986_v17 }
 0x3a2   : > { %7027 = vmatprep.mubr.msk.bf16.mxu0 %vm9210_vm0, %v9209_v0  ;;  %7012 = vmatpush3.bf16.msra.mxu0 %v7938_v56 }
 0x3a3   : > { %7013 = vmatprep.subr.bf16.mxu0 %v9209_v0 }
 0x3a6   : > { %7014 = vmatpush3.bf16.msra.mxu0 %v7939_v62 }
 0x3a7   : > { %7015 = vmatprep.subr.bf16.mxu0 %v9209_v0 }
 0x3aa   : > { %7016 = vmatpush3.bf16.msra.mxu0 %v7940_v2 }
 0x3ab   : > { %7017 = vmatprep.subr.bf16.mxu0 %v9209_v0 }
 0x3ae   : > { %7018 = vmatpush3.bf16.msra.mxu0 %v7942_v3 }
 0x3af   : > { %7019 = vmatprep.subr.bf16.mxu0 %v9209_v0 }
 0x3b2   : > { %7020 = vmatpush3.bf16.msra.mxu0 %v7944_v4 }
 0x3b3   : > { %7021 = vmatprep.subr.bf16.mxu0 %v9209_v0 }
 0x3b6   : > { %7022 = vmatpush3.bf16.msra.mxu0 %v7946_v5 }
 0x3b7   : > { %7023 = vmatprep.subr.bf16.mxu0 %v9209_v0 }
 0x3ba   : > { %7024 = vmatpush3.bf16.msra.mxu0 %v7948_v6 }
 0x3bb   : > { %7025 = vmatprep.subr.bf16.mxu0 %v9209_v0 }
 0x3be   : > { %7026 = vmatpush3.bf16.msra.mxu0 %v7950_v7 }
 0x3bf   : > { %7051 = vmatprep.subr.bf16.mxu0 %v9209_v0 }
 0x3c1   : > { %7028 = vmatmul.mubr.bf16.vlgmr.msra.gmra.mrb[8].mxu0 %v9986_v17  ;;  %v7951_v17 = vld [vmem:[#allocation8 + $0x68] sm:$0xff]  }
 0x3c2   : > { %7053 = vmatprep.mubr.msk.bf16.mxu0 %vm9210_vm0, %v9209_v0 }
 0x453   : > { %v1575_v19 = vpop.f32.mrb[0].mxu1  ;;  %v1463_v24 = vpop.f32.mrb[0].mxu0 }
 0x454   : > { %v1576_v20 = vadd.f32 %v6331_v18, %v1575_v19  ;;  %v6957_v21 = vpop.f32.mrb[1].mxu1  ;;  %v6937_v27 = vpop.f32.mrb[1].mxu0  ;;  %v1464_v30 = vadd.f32 %v6322_v23, %v1463_v24  ;;  %v7952_v18 = vld [vmem:[#allocation8 + $0x70] sm:$0xff]   ;;  %v7953_v19 = vld [vmem:[#allocation8 + $0x78] sm:$0xff]   ;;  %v7957_v24 = vld [vmem:[#allocation14 + $0x58] sm:$0xff]  }
 0x455   : > { %v1578_v22 = vpop.f32.mrb[2].mxu1  ;;  %v1466_v28 = vpop.f32.mrb[2].mxu0  ;;  %v10049_v21 = vld [vmem:[%s9899_s23] sm:$0xf]  ;;  %v7956_v23 = vld [vmem:[#allocation14 + $0x50] sm:$0xff]   ;;  %s9025_s23 = sshll.u32 %s9212_s18, 4  ;;  %s9026_s23 = int_to_ptr.vmem [resolvable:$false] %s9025_s23 }
 0x456   : > { %v1581_v25 = vpack.c.bf16 %v1576_v20, %v1576_v20  ;;  %v6958_v26 = vpop.f32.mrb[3].mxu1  ;;  %v6938_v31 = vpop.f32.mrb[3].mxu0  ;;  %v1469_v32 = vpack.c.bf16 %v1464_v30, %v1464_v30  ;;  %v7954_v20 = vld [vmem:[#allocation14 + $0x40] sm:$0xff]   ;;  %v7955_v22 = vld [vmem:[#allocation14 + $0x48] sm:$0xff]   ;;  %v7960_v27 = vld [vmem:[#allocation14 + $0x70] sm:$0xff]   ;;  %s9027_s2 = scalar_lea.vmem %s9026_s23, 128  ;;  %p9028_p3 = scmp.lt.s32.totalorder %s10442_s9, %s9026_s23 }
 0x457   : > { %v7959_v26 = vld [vmem:[#allocation14 + $0x68] sm:$0xff]   ;;  %v7961_v28 = vld [vmem:[#allocation14 + $0x78] sm:$0xff]   ;;  %p9029_p10 = scmp.lt.s32.totalorder %s9027_s2, %s9021_s21 }
 0x458   : > { %v1699_v29 = vsel %vm1694_vm1, %v1581_v25, 0  ;;  %v7958_v25 = vld [vmem:[#allocation14 + $0x60] sm:$0xff]   ;;  %v7963_v30 = vld [vmem:[#allocation17 + $0x8] sm:$0xff]   ;;  %v6360_v31 = vld [vmem:[#allocation13 + $0x1] ss:$0 sm:$0xff] }
 0x459   : > { %6980 = vmatpush3.bf16.xpose.msra.mxu1 %v1699_v29  ;;  %v7962_v29 = vld [vmem:[#allocation17] sm:$0xff]   ;;  %p9030_p11 = por %p9029_p10, %p9028_p3 }
 0x45a   : > { %6985 = vmatprep.subr.bf16.mxu1 %v9209_v0 }
 0x45b   : > { %p9031_p8 = pnand %p9030_p11, %p9024_p7 }
 0x460   : > { %6982 = vmatmul.mubr.msk.bf16.vlgmr.msra.gmra.mrb[4].mxu1 %vm1694_vm1, %v1469_v32 }
 0x461   : > { %6987 = vmatprep.mubr.msk.bf16.mxu1 %vm9210_vm0, %v9209_v0 }
 0x474   : > { %v1687_v55 = vpop.f32.mrb[4].mxu0 }
 0x475   : > { %v6977_v57 = vpop.f32.mrb[5].mxu0  ;;  %v1688_v61 = vadd.f32 %v6340_v59, %v1687_v55 }
 0x476   : > { %v1690_v58 = vpop.f32.mrb[6].mxu0 }
 0x477   : > { %v6978_v60 = vpop.f32.mrb[7].mxu0  ;;  %v1693_v63 = vpack.c.bf16 %v1688_v61, %v1688_v61 }
 0x479   : > { %v1760_v1 = vsel %vm1758_vm4, %v1693_v63, 0 }
 0x47a   : > { %6986 = vmatpush3.bf16.msra.mxu1 %v1760_v1 }
 0x47b   : > { %6991 = vmatprep.subr.bf16.mxu1 %v9209_v0 }
 0x494   : > { %v2028_v32 = vpop.f32.mrb[8].mxu0 }
 0x495   : > { %v2029_v33 = vadd.f32 %v6360_v31, %v2028_v32  ;;  %v7029_v34 = vpop.f32.mrb[9].mxu0 }
 0x496   : > { %v2031_v35 = vpop.f32.mrb[10].mxu0  ;;  %v7971_v34 = vld [vmem:[#allocation8 + $0x88] sm:$0xff]  }
 0x497   : > { %v2034_v36 = vpack.c.bf16 %v2029_v33, %v2029_v33  ;;  %v7030_v37 = vpop.f32.mrb[11].mxu0  ;;  %v7973_v35 = vld [vmem:[#allocation8 + $0x90] sm:$0xff]  }
 0x498   : > { %v7977_v37 = vld [vmem:[#allocation8 + $0xa0] sm:$0xff]  }
 0x499   : > { %v2153_v38 = vsel %vm1694_vm1, %v2034_v36, 0  ;;  %v7975_v36 = vld [vmem:[#allocation8 + $0x98] sm:$0xff]  }
 0x49a   : > { %7052 = vmatpush3.bf16.xpose.msra.mxu0 %v2153_v38  ;;  %v7979_v38 = vld [vmem:[#allocation8 + $0xa8] sm:$0xff]  }
 0x49b   : > { %7057 = vmatprep.subr.bf16.mxu0 %v9209_v0 }
 0x533   : > { %v1735_v44 = vpop.f32.mrb[4].mxu1 }
 0x534   : > { %v1741_v45 = vsel %vm1355_vm2, %v1735_v44, -1e+10  ;;  %v6983_v46 = vpop.f32.mrb[5].mxu1 }
 0x535   : > { %v1738_v47 = vpop.f32.mrb[6].mxu1  ;;  %v1743_v48 = vsel %vm1742_vm3, %v1741_v45, -inf  ;;  %v6351_v46 = vld [vmem:[#allocation10 + $0x1] ss:$0 sm:$0xff] }
 0x536   : > { %1744 = vmax.xlane.f32.xlu0 %v1743_v48  ;;  %v6984_v49 = vpop.f32.mrb[7].mxu1 }
 0x5c3   : > { %v1745_v50 = vpop.xlane.xlu0 %1744 }
 0x5c4   : > { %v1746_v51 = vsub.f32 %v1741_v45, %v1745_v50 }
 0x5c6   : > { %v1747_v52 = vmul.f32 1.442695, %v1746_v51 }
 0x5c8   : > { %8163 = vpow2.f32 %v1747_v52 }
 0x5d2   : > { %v8164_v53 = vpop.eup %8163 }
 0x5d3   : > { %v1749_v54 = vsel %vm1742_vm3, %v8164_v53, 0.0 }
 0x5d4   : > { %1750 = vadd.xlane.f32.xlu0 %v1749_v54 }
 0x661   : > { %v1751_v8 = vpop.xlane.xlu0 %1750 }
 0x662   : > { %8165 = vrcp.f32 %v1751_v8 }
 0x66c   : > { %v8166_v9 = vpop.eup %8165 }
 0x66d   : > { %v1753_v10 = vmul.f32 %v8166_v9, %v8164_v53  ;;  %v6369_v53 = vld [vmem:[#allocation16 + $0x1] ss:$0 sm:$0xff] }
 0x66f   : > { %v1754_v12 = vpack.c.bf16 %v1753_v10, %v1753_v10 }
 0x671   : > { %6988 = vmatmul.mubr.msk.bf16.vlgmr.msra.gmra.mrb[8].mxu1 %vm1742_vm3, %v1754_v12 }
 0x672   : > { %6992 = vmatpush3.bf16.msra.mxu1 %v7941_v11  ;;  %7007 = vmatprep.mubr.msk.bf16.mxu1 %vm9210_vm0, %v9209_v0 }
 0x673   : > { %6993 = vmatprep.subr.bf16.mxu1 %v9209_v0 }
 0x676   : > { %6994 = vmatpush3.bf16.msra.mxu1 %v7943_v13  ;;  %v7964_v13 = vld [vmem:[#allocation11 + $0x80] sm:$0xff]  }
 0x677   : > { %6995 = vmatprep.subr.bf16.mxu1 %v9209_v0 }
 0x67a   : > { %6996 = vmatpush3.bf16.msra.mxu1 %v7945_v14  ;;  %v7966_v14 = vld [vmem:[#allocation11 + $0x88] sm:$0xff]  }
 0x67b   : > { %6997 = vmatprep.subr.bf16.mxu1 %v9209_v0 }
 0x67e   : > { %6998 = vmatpush3.bf16.msra.mxu1 %v7947_v15 }
 0x67f   : > { %6999 = vmatprep.subr.bf16.mxu1 %v9209_v0 }
 0x682   : > { %7000 = vmatpush3.bf16.msra.mxu1 %v7949_v16 }
 0x683   : > { %7001 = vmatprep.subr.bf16.mxu1 %v9209_v0 }
 0x686   : > { %7002 = vmatpush3.bf16.msra.mxu1 %v7951_v17 }
 0x687   : > { %7003 = vmatprep.subr.bf16.mxu1 %v9209_v0 }
 0x68a   : > { %7004 = vmatpush3.bf16.msra.mxu1 %v7952_v18  ;;  %v7965_v18 = vld [vmem:[#allocation17 + $0x10] sm:$0xff]  }
 0x68b   : > { %7005 = vmatprep.subr.bf16.mxu1 %v9209_v0 }
 0x68e   : > { %7006 = vmatpush3.bf16.msra.mxu1 %v7953_v19 }
 0x68f   : > { %7031 = vmatprep.subr.bf16.mxu1 %v9209_v0 }
 0x691   : > { %7008 = vmatmul.mubr.bf16.vlgmr.msra.gmra.mrb[12].mxu1 %v10049_v21 }
 0x692   : > { %7032 = vmatpush3.bf16.msra.mxu1 %v7954_v20  ;;  %7047 = vmatprep.mubr.msk.bf16.mxu1 %vm9210_vm0, %v9209_v0  ;;  %v7967_v20 = vld [vmem:[#allocation17 + $0x18] sm:$0xff]  }
 0x693   : > { %7033 = vmatprep.subr.bf16.mxu1 %v9209_v0 }
 0x696   : > { %7034 = vmatpush3.bf16.msra.mxu1 %v7955_v22  ;;  %v7968_v22 = vld [vmem:[#allocation11 + $0x90] sm:$0xff]  }
 0x697   : > { %7035 = vmatprep.subr.bf16.mxu1 %v9209_v0 }
 0x69a   : > { %7036 = vmatpush3.bf16.msra.mxu1 %v7956_v23  ;;  %v7970_v23 = vld [vmem:[#allocation11 + $0x98] sm:$0xff]  }
 0x69b   : > { %7037 = vmatprep.subr.bf16.mxu1 %v9209_v0 }
 0x69e   : > { %7038 = vmatpush3.bf16.msra.mxu1 %v7957_v24  ;;  %v7972_v24 = vld [vmem:[#allocation11 + $0xa0] sm:$0xff]  }
 0x69f   : > { %7039 = vmatprep.subr.bf16.mxu1 %v9209_v0 }
 0x6a2   : > { %7040 = vmatpush3.bf16.msra.mxu1 %v7958_v25  ;;  %v7974_v25 = vld [vmem:[#allocation11 + $0xa8] sm:$0xff]  }
 0x6a3   : > { %7041 = vmatprep.subr.bf16.mxu1 %v9209_v0 }
 0x6a6   : > { %7042 = vmatpush3.bf16.msra.mxu1 %v7959_v26  ;;  %v7976_v26 = vld [vmem:[#allocation11 + $0xb0] sm:$0xff]  }
 0x6a7   : > { %7043 = vmatprep.subr.bf16.mxu1 %v9209_v0 }
 0x6aa   : > { %7044 = vmatpush3.bf16.msra.mxu1 %v7960_v27  ;;  %v7978_v27 = vld [vmem:[#allocation11 + $0xb8] sm:$0xff]  }
 0x6ab   : > { %7045 = vmatprep.subr.bf16.mxu1 %v9209_v0 }
 0x6ae   : > { %7046 = vmatpush3.bf16.msra.mxu1 %v7961_v28 }
 0x6af   : > { %7071 = vmatprep.subr.bf16.mxu1 %v9209_v0 }
 0x6b1   : > { %7048 = vmatmul.mubr.bf16.vlgmr.msra.gmra.mrb[16].mxu1 %v10049_v21 }
 0x6b2   : > { %7072 = vmatpush3.bf16.msra.mxu1 %v7962_v29  ;;  %7075 = vmatprep.mubr.msk.bf16.mxu1 %vm9210_vm0, %v9209_v0  ;;  %v7969_v29 = vld [vmem:[#allocation8 + $0x80] sm:$0xff]  }
 0x6b3   : > { %7073 = vmatprep.subr.bf16.mxu1 %v9209_v0 }
 0x6b6   : > { %7074 = vmatpush3.bf16.msra.mxu1 %v7963_v30 }
 0x6b7   : > { %7099 = vmatprep.subr.bf16.mxu1 %v9209_v0 }
 0x744   : > { %v1796_v39 = vpop.f32.mrb[8].mxu1 }
 0x745   : > { %v1802_v40 = vpack.c.bf16 %v1796_v39, %v1796_v39  ;;  %v6989_v41 = vpop.f32.mrb[9].mxu1  ;;  %v7980_v39 = vld [vmem:[#allocation8 + $0xb0] sm:$0xff]  }
 0x746   : > { %v1799_v44 = vpop.f32.mrb[10].mxu1  ;;  %v6395_v41 = vld [vmem:[#allocation13 + $0x2] ss:$0 sm:$0xff] }
 0x747   : > { %v6990_v45 = vpop.f32.mrb[11].mxu1  ;;  %7076 = vmatmul.mubr.msk.bf16.vlgmr.msra.gmra.mrb[20].mxu1 %vm1694_vm1, %v1802_v40  ;;  %v7981_v40 = vld [vmem:[#allocation8 + $0xb8] sm:$0xff]  }
 0x748   : > { %7115 = vmatprep.mubr.msk.bf16.mxu1 %vm9210_vm0, %v9209_v0  ;;  %7100 = vmatpush3.bf16.msra.mxu1 %v7964_v13 }
 0x749   : > { %7101 = vmatprep.subr.bf16.mxu1 %v9209_v0 }
 0x74c   : > { %7102 = vmatpush3.bf16.msra.mxu1 %v7966_v14 }
 0x74d   : > { %7103 = vmatprep.subr.bf16.mxu1 %v9209_v0 }
 0x750   : > { %7104 = vmatpush3.bf16.msra.mxu1 %v7968_v22 }
 0x751   : > { %7105 = vmatprep.subr.bf16.mxu1 %v9209_v0 }
 0x754   : > { %7106 = vmatpush3.bf16.msra.mxu1 %v7970_v23  ;;  %v6404_v23 = vld [vmem:[#allocation16 + $0x2] ss:$0 sm:$0xff] }
 0x755   : > { %7107 = vmatprep.subr.bf16.mxu1 %v9209_v0 }
 0x758   : > { %7108 = vmatpush3.bf16.msra.mxu1 %v7972_v24 }
 0x759   : > { %7109 = vmatprep.subr.bf16.mxu1 %v9209_v0 }
 0x75c   : > { %7110 = vmatpush3.bf16.msra.mxu1 %v7974_v25 }
 0x75d   : > { %7111 = vmatprep.subr.bf16.mxu1 %v9209_v0 }
 0x760   : > { %7112 = vmatpush3.bf16.msra.mxu1 %v7976_v26 }
 0x761   : > { %7113 = vmatprep.subr.bf16.mxu1 %v9209_v0 }
 0x764   : > { %v1914_v47 = vpop.f32.mrb[12].mxu1  ;;  %7114 = vmatpush3.bf16.msra.mxu1 %v7978_v27 }
 0x765   : > { %v1915_v48 = vadd.f32 %v6351_v46, %v1914_v47  ;;  %v7009_v49 = vpop.f32.mrb[13].mxu1  ;;  %7139 = vmatprep.subr.bf16.mxu1 %v9209_v0 }
 0x766   : > { %v1917_v50 = vpop.f32.mrb[14].mxu1 }
 0x767   : > { %v1920_v51 = vpack.c.bf16 %v1915_v48, %v1915_v48  ;;  %v7010_v52 = vpop.f32.mrb[15].mxu1  ;;  %7116 = vmatmul.mubr.bf16.vlgmr.msra.gmra.mrb[24].mxu1 %v10049_v21 }
 0x768   : > { %7141 = vmatprep.mubr.msk.bf16.mxu1 %vm9210_vm0, %v9209_v0 }
 0x769   : > { %7054 = vmatmul.mubr.msk.bf16.vlgmr.msra.gmra.mrb[12].mxu0 %vm1694_vm1, %v1920_v51 }
 0x76a   : > { %7059 = vmatprep.mubr.msk.bf16.mxu0 %vm9210_vm0, %v9209_v0 }
 0x784   : > { %v2142_v54 = vpop.f32.mrb[16].mxu1 }
 0x785   : > { %v2143_v55 = vadd.f32 %v6369_v53, %v2142_v54  ;;  %v7049_v56 = vpop.f32.mrb[17].mxu1 }
 0x786   : > { %v2145_v57 = vpop.f32.mrb[18].mxu1  ;;  %v6386_v56 = vld [vmem:[#allocation10 + $0x2] ss:$0 sm:$0xff] }
 0x787   : > { %v2148_v58 = vpack.c.bf16 %v2143_v55, %v2143_v55  ;;  %v7050_v59 = vpop.f32.mrb[19].mxu1 }
 0x789   : > { %v2212_v60 = vsel %vm1758_vm4, %v2148_v58, 0 }
 0x78a   : > { %7058 = vmatpush3.bf16.msra.mxu0 %v2212_v60 }
 0x78b   : > { %7063 = vmatprep.subr.bf16.mxu0 %v9209_v0 }
 0x81a   : > { %v10077_v61 = vpop.f32.mrb[20].mxu1 }
 0x81b   : > { %v7077_v62 = vpop.f32.mrb[21].mxu1 }
 0x81c   : > { %v2367_v63 = vpop.f32.mrb[22].mxu1 }
 0x81d   : > { %v7078_v1 = vpop.f32.mrb[23].mxu1 }
 0x81e   : > { %v7982_v1 = vld [vmem:[#allocation14 + $0x80] sm:$0xff]  }
 0x83a   : > { %v2591_v44 = vpop.f32.mrb[24].mxu1 }
 0x83b   : > { %v2592_v45 = vadd.f32 %v6395_v41, %v2591_v44  ;;  %v7117_v46 = vpop.f32.mrb[25].mxu1  ;;  %v8004_v41 = vld [vmem:[#allocation11 + $0xf8] sm:$0xff]  }
 0x83c   : > { %v2189_v2 = vpop.f32.mrb[12].mxu0  ;;  %v2594_v47 = vpop.f32.mrb[26].mxu1 }
 0x83d   : > { %v2195_v3 = vsel %vm1355_vm2, %v2189_v2, -1e+10  ;;  %v7055_v4 = vpop.f32.mrb[13].mxu0  ;;  %v2597_v48 = vpack.c.bf16 %v2592_v45, %v2592_v45  ;;  %v7118_v49 = vpop.f32.mrb[27].mxu1  ;;  %v7983_v2 = vld [vmem:[#allocation14 + $0x88] sm:$0xff]   ;;  %v7995_v45 = vld [vmem:[#allocation8 + $0xc0] sm:$0xff]  }
 0x83e   : > { %v2192_v5 = vpop.f32.mrb[14].mxu0  ;;  %v2196_v6 = vsel %vm1742_vm3, %v2195_v3, -inf  ;;  %v7986_v4 = vld [vmem:[#allocation14 + $0xa0] sm:$0xff]  }
 0x83f   : > { %2197 = vmax.xlane.f32.xlu1 %v2196_v6  ;;  %v7056_v7 = vpop.f32.mrb[15].mxu0  ;;  %v2716_v50 = vsel %vm1694_vm1, %v2597_v48, 0  ;;  %v7987_v5 = vld [vmem:[#allocation14 + $0xa8] sm:$0xff]   ;;  %v7988_v6 = vld [vmem:[#allocation14 + $0xb0] sm:$0xff]  }
 0x840   : > { %7140 = vmatpush3.bf16.xpose.msra.mxu1 %v2716_v50  ;;  %v7989_v7 = vld [vmem:[#allocation14 + $0xb8] sm:$0xff]   ;;  %v7997_v50 = vld [vmem:[#allocation8 + $0xc8] sm:$0xff]  }
 0x841   : > { %7145 = vmatprep.subr.bf16.mxu1 %v9209_v0 }
 0x8cc   : > { %v2198_v8 = vpop.xlane.xlu1 %2197 }
 0x8cd   : > { %v2199_v9 = vsub.f32 %v2195_v3, %v2198_v8  ;;  %v7985_v3 = vld [vmem:[#allocation14 + $0x98] sm:$0xff]  }
 0x8cf   : > { %v2200_v10 = vmul.f32 1.442695, %v2199_v9 }
 0x8d1   : > { %8167 = vpow2.f32 %v2200_v10 }
 0x8db   : > { %v8168_v11 = vpop.eup %8167 }
 0x8dc   : > { %v2202_v12 = vsel %vm1742_vm3, %v8168_v11, 0.0 }
 0x8dd   : > { %2203 = vadd.xlane.f32.xlu1 %v2202_v12 }
 0x96a   : > { %v2204_v15 = vpop.xlane.xlu1 %2203 }
 0x96b   : > { %8169 = vrcp.f32 %v2204_v15 }
 0x975   : > { %v8170_v16 = vpop.eup %8169 }
 0x976   : > { %v2206_v17 = vmul.f32 %v8170_v16, %v8168_v11 }
 0x978   : > { %v2207_v19 = vpack.c.bf16 %v2206_v17, %v2206_v17 }
 0x97a   : > { %7060 = vmatmul.mubr.msk.bf16.vlgmr.msra.gmra.mrb[16].mxu0 %vm1742_vm3, %v2207_v19 }
 0x97b   : > { %7064 = vmatpush3.bf16.msra.mxu0 %v7965_v18  ;;  %7067 = vmatprep.mubr.msk.bf16.mxu0 %vm9210_vm0, %v9209_v0 }
 0x97c   : > { %7065 = vmatprep.subr.bf16.mxu0 %v9209_v0 }
 0x97f   : > { %7066 = vmatpush3.bf16.msra.mxu0 %v7967_v20 }
 0x980   : > { %7079 = vmatprep.subr.bf16.mxu0 %v9209_v0 }
 0xa4d   : > { %v2248_v28 = vpop.f32.mrb[16].mxu0 }
 0xa4e   : > { %v2254_v30 = vpack.c.bf16 %v2248_v28, %v2248_v28  ;;  %v7061_v31 = vpop.f32.mrb[17].mxu0  ;;  %v7990_v28 = vld [vmem:[#allocation11 + $0xc0] sm:$0xff]  }
 0xa4f   : > { %v2251_v32 = vpop.f32.mrb[18].mxu0 }
 0xa50   : > { %v7062_v33 = vpop.f32.mrb[19].mxu0  ;;  %7068 = vmatmul.mubr.msk.bf16.vlgmr.msra.gmra.mrb[20].mxu0 %vm1694_vm1, %v2254_v30 }
 0xa51   : > { %7080 = vmatpush3.bf16.msra.mxu0 %v7969_v29  ;;  %7095 = vmatprep.mubr.msk.bf16.mxu0 %vm9210_vm0, %v9209_v0  ;;  %v7992_v29 = vld [vmem:[#allocation11 + $0xc8] sm:$0xff]  }
 0xa52   : > { %7081 = vmatprep.subr.bf16.mxu0 %v9209_v0  ;;  %v7991_v33 = vld [vmem:[#allocation17 + $0x20] sm:$0xff]  }
 0xa55   : > { %7082 = vmatpush3.bf16.msra.mxu0 %v7971_v34 }
 0xa56   : > { %7083 = vmatprep.subr.bf16.mxu0 %v9209_v0 }
 0xa59   : > { %7084 = vmatpush3.bf16.msra.mxu0 %v7973_v35  ;;  %v7993_v35 = vld [vmem:[#allocation17 + $0x28] sm:$0xff]  }
 0xa5a   : > { %7085 = vmatprep.subr.bf16.mxu0 %v9209_v0 }
 0xa5d   : > { %7086 = vmatpush3.bf16.msra.mxu0 %v7975_v36  ;;  %v7994_v36 = vld [vmem:[#allocation11 + $0xd0] sm:$0xff]  }
 0xa5e   : > { %7087 = vmatprep.subr.bf16.mxu0 %v9209_v0 }
 0xa61   : > { %7088 = vmatpush3.bf16.msra.mxu0 %v7977_v37  ;;  %v7996_v37 = vld [vmem:[#allocation11 + $0xd8] sm:$0xff]  }
 0xa62   : > { %7089 = vmatprep.subr.bf16.mxu0 %v9209_v0 }
 0xa65   : > { %7090 = vmatpush3.bf16.msra.mxu0 %v7979_v38  ;;  %v7998_v38 = vld [vmem:[#allocation11 + $0xe0] sm:$0xff]  }
 0xa66   : > { %7091 = vmatprep.subr.bf16.mxu0 %v9209_v0 }
 0xa69   : > { %7092 = vmatpush3.bf16.msra.mxu0 %v7980_v39  ;;  %v8000_v39 = vld [vmem:[#allocation11 + $0xe8] sm:$0xff]  }
 0xa6a   : > { %7093 = vmatprep.subr.bf16.mxu0 %v9209_v0 }
 0xa6d   : > { %7094 = vmatpush3.bf16.msra.mxu0 %v7981_v40  ;;  %v8002_v40 = vld [vmem:[#allocation11 + $0xf0] sm:$0xff]  }
 0xa6e   : > { %7119 = vmatprep.subr.bf16.mxu0 %v9209_v0 }
 0xa70   : > { %7096 = vmatmul.mubr.bf16.vlgmr.msra.gmra.mrb[24].mxu0 %v10049_v21 }
 0xa71   : > { %7135 = vmatprep.mubr.msk.bf16.mxu0 %vm9210_vm0, %v9209_v0  ;;  %7120 = vmatpush3.bf16.msra.mxu0 %v7982_v1 }
 0xa72   : > { %7121 = vmatprep.subr.bf16.mxu0 %v9209_v0 }
 0xa75   : > { %7122 = vmatpush3.bf16.msra.mxu0 %v7983_v2 }
 0xa76   : > { %7123 = vmatprep.subr.bf16.mxu0 %v9209_v0 }
 0xb23   : > { %v2309_v51 = vpop.f32.mrb[20].mxu0 }
 0xb24   : > { %v10117_v52 = vadd.f32 %v10077_v61, %v2309_v51  ;;  %v7069_v53 = vpop.f32.mrb[21].mxu0  ;;  %v7984_v61 = vld [vmem:[#allocation14 + $0x90] sm:$0xff]   ;;  %v7999_v51 = vld [vmem:[#allocation8 + $0xd0] sm:$0xff]  }
 0xb25   : > { %v2312_v54 = vpop.f32.mrb[22].mxu0  ;;  %7124 = vmatpush3.bf16.msra.mxu0 %v7984_v61  ;;  %v8001_v53 = vld [vmem:[#allocation8 + $0xd8] sm:$0xff]  }
 0xb26   : > { %v7070_v55 = vpop.f32.mrb[23].mxu0  ;;  %7125 = vmatprep.subr.bf16.mxu0 %v9209_v0  ;;  %v8003_v54 = vld [vmem:[#allocation8 + $0xe0] sm:$0xff]  }
 0xb27   : > { %v8005_v55 = vld [vmem:[#allocation8 + $0xe8] sm:$0xff]  }
 0xb29   : > { %7126 = vmatpush3.bf16.msra.mxu0 %v7985_v3 }
 0xb2a   : > { %7127 = vmatprep.subr.bf16.mxu0 %v9209_v0 }
 0xb2d   : > { %7128 = vmatpush3.bf16.msra.mxu0 %v7986_v4 }
 0xb2e   : > { %7129 = vmatprep.subr.bf16.mxu0 %v9209_v0 }
 0xb31   : > { %7130 = vmatpush3.bf16.msra.mxu0 %v7987_v5 }
 0xb32   : > { %7131 = vmatprep.subr.bf16.mxu0 %v9209_v0 }
 0xb35   : > { %7132 = vmatpush3.bf16.msra.mxu0 %v7988_v6 }
 0xb36   : > { %7133 = vmatprep.subr.bf16.mxu0 %v9209_v0 }
 0xb39   : > { %7134 = vmatpush3.bf16.msra.mxu0 %v7989_v7 }
 0xb3a   : > { %7179 = vmatprep.subr.bf16.mxu0 %v9209_v0 }
 0xb3c   : > { %7136 = vmatmul.mubr.bf16.vlgmr.msra.gmra.mrb[28].mxu0 %v10049_v21 }
 0xb3d   : > { %7195 = vmatprep.mubr.msk.bf16.mxu0 %vm9210_vm0, %v9209_v0  ;;  %7180 = vmatpush3.bf16.msra.mxu0 %v7990_v28 }
 0xb3e   : > { %7181 = vmatprep.subr.bf16.mxu0 %v9209_v0 }
 0xb41   : > { %7182 = vmatpush3.bf16.msra.mxu0 %v7992_v29  ;;  %v6436_v29 = vld [vmem:[#allocation16 + $0x3] ss:$0 sm:$0xff] }
 0xb42   : > { %7183 = vmatprep.subr.bf16.mxu0 %v9209_v0 }
 0xb43   : > { %v2477_v57 = vpop.f32.mrb[24].mxu0 }
 0xb44   : > { %v2478_v58 = vadd.f32 %v6386_v56, %v2477_v57  ;;  %v7097_v59 = vpop.f32.mrb[25].mxu0  ;;  %v8006_v56 = vld [vmem:[#allocation8 + $0xf0] sm:$0xff]   ;;  %v8007_v57 = vld [vmem:[#allocation8 + $0xf8] sm:$0xff]  }
 0xb45   : > { %v2480_v60 = vpop.f32.mrb[26].mxu0  ;;  %7184 = vmatpush3.bf16.msra.mxu0 %v7994_v36 }
 0xb46   : > { %v2483_v62 = vpack.c.bf16 %v2478_v58, %v2478_v58  ;;  %v7098_v63 = vpop.f32.mrb[27].mxu0  ;;  %7185 = vmatprep.subr.bf16.mxu0 %v9209_v0  ;;  %v6427_v58 = vld [vmem:[#allocation13 + $0x3] ss:$0 sm:$0xff] }
 0xb48   : > { %7142 = vmatmul.mubr.msk.bf16.vlgmr.msra.gmra.mrb[28].mxu1 %vm1694_vm1, %v2483_v62 }
 0xb49   : > { %7147 = vmatprep.mubr.msk.bf16.mxu1 %vm9210_vm0, %v9209_v0  ;;  %7186 = vmatpush3.bf16.msra.mxu0 %v7996_v37 }
 0xb4a   : > { %7187 = vmatprep.subr.bf16.mxu0 %v9209_v0 }
 0xb4d   : > { %7188 = vmatpush3.bf16.msra.mxu0 %v7998_v38 }
 0xb4e   : > { %7189 = vmatprep.subr.bf16.mxu0 %v9209_v0 }
 0xb51   : > { %7190 = vmatpush3.bf16.msra.mxu0 %v8000_v39 }
 0xb52   : > { %7191 = vmatprep.subr.bf16.mxu0 %v9209_v0 }
 0xb55   : > { %7192 = vmatpush3.bf16.msra.mxu0 %v8002_v40 }
 0xb56   : > { %7193 = vmatprep.subr.bf16.mxu0 %v9209_v0 }
 0xb59   : > { %7194 = vmatpush3.bf16.msra.mxu0 %v8004_v41 }
 0xb5a   : > { %7219 = vmatprep.subr.bf16.mxu0 %v9209_v0 }
 0xb5c   : > { %7196 = vmatmul.mubr.bf16.vlgmr.msra.gmra.mrb[32].mxu0 %v10049_v21 }
 0xb5d   : > { %7221 = vmatprep.mubr.msk.bf16.mxu0 %vm9210_vm0, %v9209_v0 }
 0xc0f   : > { %v2705_v19 = vpop.f32.mrb[28].mxu0 }
 0xc10   : > { %v7137_v20 = vpop.f32.mrb[29].mxu0  ;;  %v2706_v25 = vadd.f32 %v6404_v23, %v2705_v19  ;;  %v8013_v19 = vld [vmem:[#allocation14 + $0xe8] sm:$0xff]  }
 0xc11   : > { %v2708_v22 = vpop.f32.mrb[30].mxu0  ;;  %v8014_v20 = vld [vmem:[#allocation14 + $0xf0] sm:$0xff]  }
 0xc12   : > { %v7138_v24 = vpop.f32.mrb[31].mxu0  ;;  %v2711_v26 = vpack.c.bf16 %v2706_v25, %v2706_v25  ;;  %v8015_v22 = vld [vmem:[#allocation14 + $0xf8] sm:$0xff]  }
 0xc14   : > { %v2775_v27 = vsel %vm1758_vm4, %v2711_v26, 0 }
 0xc15   : > { %7146 = vmatpush3.bf16.msra.mxu1 %v2775_v27 }
 0xc16   : > { %7151 = vmatprep.subr.bf16.mxu1 %v9209_v0 }
 0xc1b   : > { %v2752_v8 = vpop.f32.mrb[28].mxu1 }
 0xc1c   : > { %v2758_v9 = vsel %vm1355_vm2, %v2752_v8, -1e+10  ;;  %v7143_v10 = vpop.f32.mrb[29].mxu1  ;;  %v6418_v8 = vld [vmem:[#allocation10 + $0x3] ss:$0 sm:$0xff] }
 0xc1d   : > { %v2755_v11 = vpop.f32.mrb[30].mxu1  ;;  %v2759_v12 = vsel %vm1742_vm3, %v2758_v9, -inf }
 0xc1e   : > { %2760 = vmax.xlane.f32.xlu0 %v2759_v12  ;;  %v7144_v13 = vpop.f32.mrb[31].mxu1 }
 0xc2f   : > { %v3100_v59 = vpop.f32.mrb[32].mxu0 }
 0xc30   : > { %v3101_v60 = vadd.f32 %v6427_v58, %v3100_v59  ;;  %v7197_v62 = vpop.f32.mrb[33].mxu0  ;;  %v1348_v59 = vunpack.c.l.bf16 %v10049_v21 }
 0xc31   : > { %v3103_v63 = vpop.f32.mrb[34].mxu0 }
 0xc32   : > { %v3106_v1 = vpack.c.bf16 %v3101_v60, %v3101_v60  ;;  %v7198_v2 = vpop.f32.mrb[35].mxu0 }
 0xc33   : > { %v8018_v2 = vld [vmem:[#allocation26] sm:$0xff]  }
 0xc34   : > { %v3225_v61 = vsel %vm1694_vm1, %v3106_v1, 0 }
 0xc35   : > { %7220 = vmatpush3.bf16.xpose.msra.mxu0 %v3225_v61  ;;  %v8022_v61 = vld [vmem:[#allocation23] sm:$0xff]  }
 0xc36   : > { %7225 = vmatprep.subr.bf16.mxu0 %v9209_v0 }
 0xcab   : > { %v2761_v14 = vpop.xlane.xlu0 %2760 }
 0xcac   : > { %v2762_v15 = vsub.f32 %v2758_v9, %v2761_v14 }
 0xcae   : > { %v2763_v16 = vmul.f32 1.442695, %v2762_v15  ;;  %v8008_v15 = vld [vmem:[#allocation14 + $0xc0] sm:$0xff]  }
 0xcb0   : > { %8171 = vpow2.f32 %v2763_v16  ;;  %v8009_v16 = vld [vmem:[#allocation14 + $0xc8] sm:$0xff]  }
 0xcba   : > { %v8172_v17 = vpop.eup %8171 }
 0xcbb   : > { %v2765_v18 = vsel %vm1742_vm3, %v8172_v17, 0.0 }
 0xcbc   : > { %2766 = vadd.xlane.f32.xlu1 %v2765_v18  ;;  %v8012_v18 = vld [vmem:[#allocation14 + $0xe0] sm:$0xff]  }
 0xd49   : > { %v2767_v30 = vpop.xlane.xlu1 %2766 }
 0xd4a   : > { %8173 = vrcp.f32 %v2767_v30 }
 0xd54   : > { %v8174_v31 = vpop.eup %8173 }
 0xd55   : > { %v2769_v32 = vmul.f32 %v8174_v31, %v8172_v17  ;;  %v8011_v17 = vld [vmem:[#allocation14 + $0xd8] sm:$0xff]  }
 0xd57   : > { %v2770_v34 = vpack.c.bf16 %v2769_v32, %v2769_v32 }
 0xd59   : > { %7148 = vmatmul.mubr.msk.bf16.vlgmr.msra.gmra.mrb[32].mxu1 %vm1742_vm3, %v2770_v34 }
 0xd5a   : > { %7152 = vmatpush3.bf16.msra.mxu1 %v7991_v33  ;;  %7155 = vmatprep.mubr.msk.bf16.mxu1 %vm9210_vm0, %v9209_v0 }
 0xd5b   : > { %7153 = vmatprep.subr.bf16.mxu1 %v9209_v0 }
 0xd5e   : > { %7154 = vmatpush3.bf16.msra.mxu1 %v7993_v35 }
 0xd5f   : > { %7159 = vmatprep.subr.bf16.mxu1 %v9209_v0 }
 0xe2c   : > { %v2811_v44 = vpop.f32.mrb[32].mxu1 }
 0xe2d   : > { %v2817_v46 = vpack.c.bf16 %v2811_v44, %v2811_v44  ;;  %v7149_v47 = vpop.f32.mrb[33].mxu1 }
 0xe2e   : > { %v2814_v48 = vpop.f32.mrb[34].mxu1 }
 0xe2f   : > { %v7150_v49 = vpop.f32.mrb[35].mxu1  ;;  %7156 = vmatmul.mubr.msk.bf16.vlgmr.msra.gmra.mrb[36].mxu1 %vm1694_vm1, %v2817_v46  ;;  %v8016_v46 = vld [vmem:[#allocation17 + $0x30] sm:$0xff]   ;;  %v8017_v48 = vld [vmem:[#allocation17 + $0x38] sm:$0xff]  }
 0xe30   : > { %7160 = vmatpush3.bf16.msra.mxu1 %v7995_v45  ;;  %7175 = vmatprep.mubr.msk.bf16.mxu1 %vm9210_vm0, %v9209_v0 }
 0xe31   : > { %7161 = vmatprep.subr.bf16.mxu1 %v9209_v0 }
 0xe34   : > { %7162 = vmatpush3.bf16.msra.mxu1 %v7997_v50 }
 0xe35   : > { %7163 = vmatprep.subr.bf16.mxu1 %v9209_v0 }
 0xe38   : > { %7164 = vmatpush3.bf16.msra.mxu1 %v7999_v51 }
 0xe39   : > { %7165 = vmatprep.subr.bf16.mxu1 %v9209_v0 }
 0xe3c   : > { %7166 = vmatpush3.bf16.msra.mxu1 %v8001_v53 }
 0xe3d   : > { %7167 = vmatprep.subr.bf16.mxu1 %v9209_v0 }
 0xe40   : > { %7168 = vmatpush3.bf16.msra.mxu1 %v8003_v54 }
 0xe41   : > { %7169 = vmatprep.subr.bf16.mxu1 %v9209_v0 }
 0xe44   : > { %7170 = vmatpush3.bf16.msra.mxu1 %v8005_v55 }
 0xe45   : > { %7171 = vmatprep.subr.bf16.mxu1 %v9209_v0 }
 0xe48   : > { %7172 = vmatpush3.bf16.msra.mxu1 %v8006_v56  ;;  %v6450_v56 = vld [vmem:[#allocation19] ss:$0 sm:$0xff] }
 0xe49   : > { %7173 = vmatprep.subr.bf16.mxu1 %v9209_v0 }
 0xe4c   : > { %7174 = vmatpush3.bf16.msra.mxu1 %v8007_v57 }
 0xe4d   : > { %7199 = vmatprep.subr.bf16.mxu1 %v9209_v0 }
 0xe4f   : > { %7176 = vmatmul.mubr.bf16.vlgmr.msra.gmra.mrb[40].mxu1 %v10049_v21 }
 0xe50   : > { %7215 = vmatprep.mubr.msk.bf16.mxu1 %vm9210_vm0, %v9209_v0  ;;  %7200 = vmatpush3.bf16.msra.mxu1 %v8008_v15  ;;  %v8029_v15 = vld [vmem:[#allocation26 + $0x38] sm:$0xff]  }
 0xe51   : > { %7201 = vmatprep.subr.bf16.mxu1 %v9209_v0 }
 0xe54   : > { %7202 = vmatpush3.bf16.msra.mxu1 %v8009_v16  ;;  %v8030_v16 = vld [vmem:[#allocation23 + $0x20] sm:$0xff]  }
 0xe55   : > { %7203 = vmatprep.subr.bf16.mxu1 %v9209_v0 }
 0xf02   : > { %v2872_v3 = vpop.f32.mrb[36].mxu1 }
 0xf03   : > { %v10173_v4 = vadd.f32 %v2872_v3, %v10117_v52  ;;  %v7157_v5 = vpop.f32.mrb[37].mxu1  ;;  %v8010_v52 = vld [vmem:[#allocation14 + $0xd0] sm:$0xff]  }
 0xf04   : > { %v2875_v6 = vpop.f32.mrb[38].mxu1  ;;  %7204 = vmatpush3.bf16.msra.mxu1 %v8010_v52  ;;  %v8019_v3 = vld [vmem:[#allocation26 + $0x8] sm:$0xff]   ;;  %v10218_v52 = vld [vmem:[%s9907_s29] sm:$0xff]  }
 0xf05   : > { %v7158_v7 = vpop.f32.mrb[39].mxu1  ;;  %7205 = vmatprep.subr.bf16.mxu1 %v9209_v0  ;;  %v8024_v5 = vld [vmem:[#allocation23 + $0x8] sm:$0xff]  }
 0xf06   : > { %v8023_v6 = vld [vmem:[#allocation26 + $0x20] sm:$0xff]   ;;  %v8025_v7 = vld [vmem:[#allocation26 + $0x28] sm:$0xff]  }
 0xf08   : > { %7206 = vmatpush3.bf16.msra.mxu1 %v8011_v17  ;;  %v8032_v17 = vld [vmem:[#allocation23 + $0x28] sm:$0xff]  }
 0xf09   : > { %7207 = vmatprep.subr.bf16.mxu1 %v9209_v0 }
 0xf0c   : > { %7208 = vmatpush3.bf16.msra.mxu1 %v8012_v18  ;;  %v8033_v18 = vld [vmem:[#allocation23 + $0x30] sm:$0xff]  }
 0xf0d   : > { %7209 = vmatprep.subr.bf16.mxu1 %v9209_v0 }
 0xf10   : > { %7210 = vmatpush3.bf16.msra.mxu1 %v8013_v19  ;;  %v8034_v19 = vld [vmem:[#allocation23 + $0x38] sm:$0xff]  }
 0xf11   : > { %7211 = vmatprep.subr.bf16.mxu1 %v9209_v0 }
 0xf14   : > { %7212 = vmatpush3.bf16.msra.mxu1 %v8014_v20 }
 0xf15   : > { %7213 = vmatprep.subr.bf16.mxu1 %v9209_v0 }
 0xf18   : > { %7214 = vmatpush3.bf16.msra.mxu1 %v8015_v22 }
 0xf19   : > { %7259 = vmatprep.subr.bf16.mxu1 %v9209_v0 }
 0xf1b   : > { %7216 = vmatmul.mubr.bf16.vlgmr.msra.gmra.mrb[44].mxu1 %v10049_v21  ;;  %v8021_v21 = vld [vmem:[#allocation26 + $0x18] sm:$0xff]  }
 0xf1c   : > { %7275 = vmatprep.mubr.msk.bf16.mxu1 %vm9210_vm0, %v9209_v0  ;;  %7260 = vmatpush3.bf16.msra.mxu1 %v8018_v2 }
 0xf1d   : > { %7261 = vmatprep.subr.bf16.mxu1 %v9209_v0 }
 0xf20   : > { %7262 = vmatpush3.bf16.msra.mxu1 %v8019_v3 }
 0xf21   : > { %7263 = vmatprep.subr.bf16.mxu1 %v9209_v0 }
 0xf22   : > { %v2986_v9 = vpop.f32.mrb[40].mxu1 }
 0xf23   : > { %v2987_v10 = vadd.f32 %v6418_v8, %v2986_v9  ;;  %v7177_v11 = vpop.f32.mrb[41].mxu1 }
 0xf24   : > { %v2989_v12 = vpop.f32.mrb[42].mxu1 }
 0xf25   : > { %v2992_v13 = vpack.c.bf16 %v2987_v10, %v2987_v10  ;;  %v7178_v14 = vpop.f32.mrb[43].mxu1  ;;  %v8026_v12 = vld [vmem:[#allocation23 + $0x10] sm:$0xff]  }
 0xf26   : > { %v8028_v14 = vld [vmem:[#allocation23 + $0x18] sm:$0xff]  }
 0xf27   : > { %7222 = vmatmul.mubr.msk.bf16.vlgmr.msra.gmra.mrb[36].mxu0 %vm1694_vm1, %v2992_v13  ;;  %v8027_v13 = vld [vmem:[#allocation26 + $0x30] sm:$0xff]  }
 0xf28   : > { %7227 = vmatprep.mubr.msk.bf16.mxu0 %vm9210_vm0, %v9209_v0 }
 0xfee   : > { %v3214_v30 = vpop.f32.mrb[44].mxu1 }
 0xfef   : > { %v3215_v31 = vadd.f32 %v6436_v29, %v3214_v30  ;;  %v7217_v32 = vpop.f32.mrb[45].mxu1 }
 0xff0   : > { %v3217_v33 = vpop.f32.mrb[46].mxu1 }
 0xff1   : > { %v3220_v34 = vpack.c.bf16 %v3215_v31, %v3215_v31  ;;  %v7218_v35 = vpop.f32.mrb[47].mxu1  ;;  %v6462_v31 = vld [vmem:[#allocation28] ss:$0 sm:$0xff] }
 0xff3   : > { %v3284_v36 = vsel %vm1758_vm4, %v3220_v34, 0 }
 0xff4   : > { %7226 = vmatpush3.bf16.msra.mxu0 %v3284_v36 }
 0xff5   : > { %7231 = vmatprep.subr.bf16.mxu0 %v9209_v0 }
 0xffa   : > { %v3261_v23 = vpop.f32.mrb[36].mxu0 }
 0xffb   : > { %v3267_v24 = vsel %vm1355_vm2, %v3261_v23, -1e+10  ;;  %v7223_v25 = vpop.f32.mrb[37].mxu0 }
 0xffc   : > { %v3264_v26 = vpop.f32.mrb[38].mxu0  ;;  %v3268_v27 = vsel %vm1742_vm3, %v3267_v24, -inf  ;;  %v6451_v25 = vld [vmem:[#allocation20] ss:$0 sm:$0xff] }
 0xffd   : > { %3269 = vmax.xlane.f32.xlu0 %v3268_v27  ;;  %v7224_v28 = vpop.f32.mrb[39].mxu0  ;;  %v6452_v27 = vld [vmem:[#allocation22] ss:$0 sm:$0xff] }
0x108a   : > { %v3270_v43 = vpop.xlane.xlu0 %3269 }
0x108b   : > { %v3271_v37 = vsub.f32 %v3267_v24, %v3270_v43 }
0x108d   : > { %v3272_v38 = vmul.f32 1.442695, %v3271_v37 }
0x108f   : > { %8175 = vpow2.f32 %v3272_v38 }
0x1099   : > { %v8176_v39 = vpop.eup %8175 }
0x109a   : > { %v3274_v40 = vsel %vm1742_vm3, %v8176_v39, 0.0 }
0x109b   : > { %3275 = vadd.xlane.f32.xlu1 %v3274_v40 }
0x1128   : > { %v3276_v41 = vpop.xlane.xlu1 %3275 }
0x1129   : > { %8177 = vrcp.f32 %v3276_v41 }
0x1133   : > { %v8178_v44 = vpop.eup %8177 }
0x1134   : > { %v3278_v45 = vmul.f32 %v8178_v44, %v8176_v39  ;;  %v6453_v39 = vld [vmem:[#allocation25] ss:$0 sm:$0xff] }
0x1136   : > { %v3279_v47 = vpack.c.bf16 %v3278_v45, %v3278_v45 }
0x1138   : > { %7228 = vmatmul.mubr.msk.bf16.vlgmr.msra.gmra.mrb[40].mxu0 %vm1742_vm3, %v3279_v47 }
0x1139   : > { %7232 = vmatpush3.bf16.msra.mxu0 %v8016_v46  ;;  %7235 = vmatprep.mubr.msk.bf16.mxu0 %vm9210_vm0, %v9209_v0 }
0x113a   : > { %7233 = vmatprep.subr.bf16.mxu0 %v9209_v0 }
0x113d   : > { %7234 = vmatpush3.bf16.msra.mxu0 %v8017_v48  ;;  %v8035_v48 = vld [vmem:[#allocation29] sm:$0xff]  }
0x113e   : > { %7239 = vmatprep.subr.bf16.mxu0 %v9209_v0 }
0x120b   : > { %v3320_v49 = vpop.f32.mrb[40].mxu0 }
0x120c   : > { %v3326_v50 = vpack.c.bf16 %v3320_v49, %v3320_v49  ;;  %v7229_v51 = vpop.f32.mrb[41].mxu0  ;;  %v8036_v49 = vld [vmem:[#allocation29 + $0x8] sm:$0xff]  }
0x120d   : > { %v3323_v53 = vpop.f32.mrb[42].mxu0  ;;  %v8038_v51 = vld [vmem:[#allocation29 + $0x18] sm:$0xff]  }
0x120e   : > { %v7230_v54 = vpop.f32.mrb[43].mxu0  ;;  %7236 = vmatmul.mubr.msk.bf16.vlgmr.msra.gmra.mrb[44].mxu0 %vm1694_vm1, %v3326_v50  ;;  %v8037_v50 = vld [vmem:[#allocation29 + $0x10] sm:$0xff]   ;;  %v8039_v53 = vld [vmem:[#allocation29 + $0x20] sm:$0xff]  }
0x120f   : > { %7255 = vmatprep.mubr.msk.bf16.mxu0 %vm9210_vm0, %v9209_v0  ;;  %7240 = vmatpush3.bf16.msra.mxu0 %v8022_v61  ;;  %v8040_v54 = vld [vmem:[#allocation29 + $0x28] sm:$0xff]  }
0x1210   : > { %7241 = vmatprep.subr.bf16.mxu0 %v9209_v0 }
0x1213   : > { %7242 = vmatpush3.bf16.msra.mxu0 %v8024_v5 }
0x1214   : > { %7243 = vmatprep.subr.bf16.mxu0 %v9209_v0 }
0x1217   : > { %7244 = vmatpush3.bf16.msra.mxu0 %v8026_v12  ;;  %v8043_v12 = vld [vmem:[#allocation26 + $0x40] sm:$0xff]  }
0x1218   : > { %7245 = vmatprep.subr.bf16.mxu0 %v9209_v0 }
0x121b   : > { %7246 = vmatpush3.bf16.msra.mxu0 %v8028_v14 }
0x121c   : > { %7247 = vmatprep.subr.bf16.mxu0 %v9209_v0 }
0x121f   : > { %7248 = vmatpush3.bf16.msra.mxu0 %v8030_v16  ;;  %v8044_v16 = vld [vmem:[#allocation26 + $0x48] sm:$0xff]  }
0x1220   : > { %7249 = vmatprep.subr.bf16.mxu0 %v9209_v0 }
0x1223   : > { %7250 = vmatpush3.bf16.msra.mxu0 %v8032_v17 }
0x1224   : > { %7251 = vmatprep.subr.bf16.mxu0 %v9209_v0 }
0x1227   : > { %7252 = vmatpush3.bf16.msra.mxu0 %v8033_v18 }
0x1228   : > { %7253 = vmatprep.subr.bf16.mxu0 %v9209_v0 }
0x122b   : > { %7254 = vmatpush3.bf16.msra.mxu0 %v8034_v19  ;;  %v8045_v19 = vld [vmem:[#allocation26 + $0x50] sm:$0xff]  }
0x122c   : > { %7279 = vmatprep.subr.bf16.mxu0 %v9209_v0 }
0x12e1   : > { %v3381_v55 = vpop.f32.mrb[44].mxu0 }
0x12e2   : > { %v3387_v57 = vadd.f32 %v3381_v55, %v10173_v4  ;;  %v7237_v58 = vpop.f32.mrb[45].mxu0  ;;  %v8020_v4 = vld [vmem:[#allocation26 + $0x10] sm:$0xff]  }
0x12e3   : > { %v3384_v60 = vpop.f32.mrb[46].mxu0  ;;  %7264 = vmatpush3.bf16.msra.mxu1 %v8020_v4  ;;  %v8041_v55 = vld [vmem:[#allocation29 + $0x30] sm:$0xff]   ;;  %v3819_v58 = vsub.s32 0, %v10013_v42 }
0x12e4   : > { %v3395_v62 = vadd.f32 %v6450_v56, %v3387_v57  ;;  %v7238_v63 = vpop.f32.mrb[47].mxu0  ;;  %7265 = vmatprep.subr.bf16.mxu1 %v9209_v0  ;;  %v8042_v56 = vld [vmem:[#allocation29 + $0x38] sm:$0xff]   ;;  %v1356_v57 = vld [vmem:[%s1158_s26] sm:$0x1] }
0x12e5   : > { %vm1357_vm5 = vcmp.ne.f32.partialorder %v1356_v57, 0.0 }
0x12e6   : > { %v3396_v1 = vadd.f32 %v3395_v62, %v1348_v59  ;;  %v9211_v59 = vmov 0  }
0x12e7   : > { %7266 = vmatpush3.bf16.msra.mxu1 %v8021_v21  ;;  %v3816_v60 = vsel %vm1357_vm5, 1, %v9211_v59 }
0x12e8   : > { %3397 = vadd.xlane.f32.xlu0 %v3396_v1  ;;  %7267 = vmatprep.subr.bf16.mxu1 %v9209_v0  ;;  %v10259_v62 = vrot.slane %v3816_v60, %v3819_v58 }
0x12ea   : > { %vm3821_vm6 = vcmp.eq.s32.totalorder %v10259_v62, 1 }
0x12eb   : > { %7268 = vmatpush3.bf16.msra.mxu1 %v8023_v6 }
0x12ec   : > { %7269 = vmatprep.subr.bf16.mxu1 %v9209_v0 }
0x12ef   : > { %7270 = vmatpush3.bf16.msra.mxu1 %v8025_v7 }
0x12f0   : > { %7271 = vmatprep.subr.bf16.mxu1 %v9209_v0 }
0x12f3   : > { %7272 = vmatpush3.bf16.msra.mxu1 %v8027_v13 }
0x12f4   : > { %7273 = vmatprep.subr.bf16.mxu1 %v9209_v0 }
0x12f7   : > { %7274 = vmatpush3.bf16.msra.mxu1 %v8029_v15 }
0x12f8   : > { %7299 = vmatprep.subr.bf16.mxu1 %v9209_v0 }
0x12fa   : > { %7276 = vmatmul.mubr.bf16.vlgmr.msra.gmra.mrb[48].mxu1 %v10218_v52 }
0x12fb   : > { %7301 = vmatprep.mubr.msk.bf16.mxu1 %vm9210_vm0, %v9209_v0 }
0x1375   : > { %v3398_v8 = vpop.xlane.xlu0 %3397 }
0x1376   : > { %v3400_v9 = vmul.f32 0.0078125, %v3398_v8 }
0x1378   : > { %v3401_v10 = vsub.f32 %v3396_v1, %v3400_v9 }
0x137a   : > { %v3402_v11 = vmul.f32 %v3401_v10, %v3401_v10 }
0x137c   : > { %3403 = vadd.xlane.f32.xlu1 %v3402_v11  ;;  %v6472_v11 = vld [vmem:[#allocation31] ss:$0 sm:$0xff] }
0x13cd   : > { %v3649_v32 = vpop.f32.mrb[48].mxu1 }
0x13ce   : > { %v3650_v33 = vadd.f32 %v6462_v31, %v3649_v32  ;;  %v7277_v34 = vpop.f32.mrb[49].mxu1 }
0x13cf   : > { %v3652_v35 = vpop.f32.mrb[50].mxu1  ;;  %v8051_v34 = vld [vmem:[#allocation23 + $0x50] sm:$0xff]  }
0x13d0   : > { %v3653_v36 = vadd.f32 %v6462_v31, %v3652_v35  ;;  %v7278_v43 = vpop.f32.mrb[51].mxu1  ;;  %v8047_v31 = vld [vmem:[#allocation23 + $0x40] sm:$0xff]   ;;  %v8053_v35 = vld [vmem:[#allocation23 + $0x58] sm:$0xff]  }
0x13d1   : > { %v8056_v43 = vld [vmem:[#allocation23 + $0x68] sm:$0xff]  }
0x13d2   : > { %v3656_v37 = vpack.c.bf16 %v3653_v36, %v3650_v33  ;;  %v8049_v33 = vld [vmem:[#allocation23 + $0x48] sm:$0xff]   ;;  %v8055_v36 = vld [vmem:[#allocation23 + $0x60] sm:$0xff]  }
0x13d4   : > { %v3774_v38 = vsel %vm1694_vm1, %v3656_v37, 0  ;;  %v8057_v37 = vld [vmem:[#allocation23 + $0x70] sm:$0xff]  }
0x13d5   : > { %7300 = vmatpush3.bf16.xpose.msra.mxu1 %v3774_v38  ;;  %v8058_v38 = vld [vmem:[#allocation23 + $0x78] sm:$0xff]  }
0x13d6   : > { %7305 = vmatprep.subr.bf16.mxu1 %v9209_v0 }
0x1409   : > { %v3404_v20 = vpop.xlane.xlu1 %3403 }
0x140a   : > { %v3405_v22 = vmul.f32 0.0078125, %v3404_v20  ;;  %v8046_v20 = vld [vmem:[#allocation26 + $0x58] sm:$0xff]  }
0x140c   : > { %v3406_v23 = vadd.f32 1e-05, %v3405_v22  ;;  %v8048_v22 = vld [vmem:[#allocation26 + $0x60] sm:$0xff]  }
0x140e   : > { %8179 = vrsqrt.f32 %v3406_v23  ;;  %v8050_v23 = vld [vmem:[#allocation26 + $0x68] sm:$0xff]  }
0x1418   : > { %v8180_v24 = vpop.eup %8179 }
0x1419   : > { %v3408_v26 = vmul.f32 %v8180_v24, %v3401_v10  ;;  %v8052_v24 = vld [vmem:[#allocation26 + $0x70] sm:$0xff]  }
0x141b   : > { %v3416_v28 = vmul.f32 %v6451_v25, %v3408_v26  ;;  %v8054_v25 = vld [vmem:[#allocation26 + $0x78] sm:$0xff]  }
0x141d   : > { %v10228_v29 = vadd.f32 %v6452_v27, %v3416_v28 }
0x141f   : > { %v10232_v30 = vpack.c.bf16 %v10228_v29, %v10228_v29 }
0x1421   : > { %7256 = vmatmul.mubr.bf16.vlgmr.msra.gmra.mrb[48].mxu0 %v10232_v30 }
0x1422   : > { %7295 = vmatprep.mubr.msk.bf16.mxu0 %vm9210_vm0, %v9209_v0  ;;  %7280 = vmatpush3.bf16.msra.mxu0 %v8035_v48  ;;  %v8066_v48 = vld [vmem:[#allocation29 + $0x78] sm:$0xff]  }
0x1423   : > { %7281 = vmatprep.subr.bf16.mxu0 %v9209_v0 }
0x1426   : > { %7282 = vmatpush3.bf16.msra.mxu0 %v8036_v49  ;;  %v8067_v49 = vld [vmem:[#allocation32] sm:$0xff]  }
0x1427   : > { %7283 = vmatprep.subr.bf16.mxu0 %v9209_v0 }
0x142a   : > { %7284 = vmatpush3.bf16.msra.mxu0 %v8037_v50  ;;  %v8068_v50 = vld [vmem:[#allocation32 + $0x8] sm:$0xff]  }
0x142b   : > { %7285 = vmatprep.subr.bf16.mxu0 %v9209_v0 }
0x142e   : > { %7286 = vmatpush3.bf16.msra.mxu0 %v8038_v51  ;;  %v6492_v51 = vld [vmem:[#allocation28 + $0x1] ss:$0 sm:$0xff] }
0x142f   : > { %7287 = vmatprep.subr.bf16.mxu0 %v9209_v0 }
0x1432   : > { %7288 = vmatpush3.bf16.msra.mxu0 %v8039_v53 }
0x1433   : > { %7289 = vmatprep.subr.bf16.mxu0 %v9209_v0 }
0x1436   : > { %7290 = vmatpush3.bf16.msra.mxu0 %v8040_v54 }
0x1437   : > { %7291 = vmatprep.subr.bf16.mxu0 %v9209_v0 }
0x143a   : > { %7292 = vmatpush3.bf16.msra.mxu0 %v8041_v55 }
0x143b   : > { %7293 = vmatprep.subr.bf16.mxu0 %v9209_v0 }
0x143e   : > { %7294 = vmatpush3.bf16.msra.mxu0 %v8042_v56 }
0x143f   : > { %7331 = vmatprep.subr.bf16.mxu0 %v9209_v0 }
0x1441   : > { %7296 = vmatmul.mubr.bf16.vlgmr.msra.gmra.mrb[52].mxu0 %v10218_v52 }
0x1442   : > { %7347 = vmatprep.mubr.msk.bf16.mxu0 %vm9210_vm0, %v9209_v0  ;;  %7332 = vmatpush3.bf16.msra.mxu0 %v8043_v12  ;;  %v6501_v12 = vld [vmem:[#allocation31 + $0x1] ss:$0 sm:$0xff] }
0x1443   : > { %7333 = vmatprep.subr.bf16.mxu0 %v9209_v0 }
0x1446   : > { %7334 = vmatpush3.bf16.msra.mxu0 %v8044_v16 }
0x1447   : > { %7335 = vmatprep.subr.bf16.mxu0 %v9209_v0 }
0x144a   : > { %7336 = vmatpush3.bf16.msra.mxu0 %v8045_v19 }
0x144b   : > { %7337 = vmatprep.subr.bf16.mxu0 %v9209_v0 }
0x144e   : > { %7338 = vmatpush3.bf16.msra.mxu0 %v8046_v20 }
0x144f   : > { %7339 = vmatprep.subr.bf16.mxu0 %v9209_v0 }
0x1452   : > { %7340 = vmatpush3.bf16.msra.mxu0 %v8048_v22 }
0x1453   : > { %7341 = vmatprep.subr.bf16.mxu0 %v9209_v0 }
0x1456   : > { %7342 = vmatpush3.bf16.msra.mxu0 %v8050_v23 }
0x1457   : > { %7343 = vmatprep.subr.bf16.mxu0 %v9209_v0 }
0x145a   : > { %7344 = vmatpush3.bf16.msra.mxu0 %v8052_v24 }
0x145b   : > { %7345 = vmatprep.subr.bf16.mxu0 %v9209_v0 }
0x145e   : > { %7346 = vmatpush3.bf16.msra.mxu0 %v8054_v25 }
0x145f   : > { %7371 = vmatprep.subr.bf16.mxu0 %v9209_v0 }
0x1461   : > { %7348 = vmatmul.mubr.bf16.vlgmr.msra.gmra.mrb[56].mxu0 %v10218_v52 }
0x1462   : > { %7373 = vmatprep.mubr.msk.bf16.mxu0 %vm9210_vm0, %v9209_v0 }
0x14f4   : > { %v3531_v40 = vpop.f32.mrb[48].mxu0 }
0x14f5   : > { %v3532_v41 = vadd.f32 %v6453_v39, %v3531_v40  ;;  %v7257_v44 = vpop.f32.mrb[49].mxu0  ;;  %v8059_v39 = vld [vmem:[#allocation29 + $0x40] sm:$0xff]   ;;  %v8060_v40 = vld [vmem:[#allocation29 + $0x48] sm:$0xff]  }
0x14f6   : > { %v3534_v45 = vpop.f32.mrb[50].mxu0  ;;  %v8062_v44 = vld [vmem:[#allocation29 + $0x58] sm:$0xff]  }
0x14f7   : > { %v3537_v46 = vpack.c.bf16 %v3532_v41, %v3532_v41  ;;  %v7258_v47 = vpop.f32.mrb[51].mxu0  ;;  %v8061_v41 = vld [vmem:[#allocation29 + $0x50] sm:$0xff]   ;;  %v8063_v45 = vld [vmem:[#allocation29 + $0x60] sm:$0xff]  }
0x14f8   : > { %v8065_v47 = vld [vmem:[#allocation29 + $0x70] sm:$0xff]  }
0x14f9   : > { %7302 = vmatmul.mubr.msk.bf16.vlgmr.msra.gmra.mrb[52].mxu1 %vm1694_vm1, %v3537_v46  ;;  %v8064_v46 = vld [vmem:[#allocation29 + $0x68] sm:$0xff]  }
0x14fa   : > { %7307 = vmatprep.mubr.msk.bf16.mxu1 %vm9210_vm0, %v9209_v0 }
0x1514   : > { %v3762_v4 = vpop.f32.mrb[52].mxu0 }
0x1515   : > { %v7297_v21 = vpop.f32.mrb[53].mxu0  ;;  %v3763_v13 = vadd.f32 %v6472_v11, %v3762_v4 }
0x1516   : > { %v3765_v14 = vpop.f32.mrb[54].mxu0  ;;  %v6483_v21 = vld [vmem:[#allocation25 + $0x1] ss:$0 sm:$0xff] }
0x1517   : > { %v7298_v15 = vpop.f32.mrb[55].mxu0  ;;  %v3766_v17 = vadd.f32 %v6472_v11, %v3765_v14 }
0x1519   : > { %v3769_v18 = vpack.c.bf16 %v3766_v17, %v3763_v13 }
0x151b   : > { %7306 = vmatpush3.bf16.msra.mxu1 %v3769_v18 }
0x151c   : > { %7311 = vmatprep.subr.bf16.mxu1 %v9209_v0 }
0x1534   : > { %v4105_v53 = vpop.f32.mrb[56].mxu0 }
0x1535   : > { %v4106_v54 = vadd.f32 %v6492_v51, %v4105_v53  ;;  %v7349_v55 = vpop.f32.mrb[57].mxu0  ;;  %v8082_v53 = vld [vmem:[#allocation26 + $0xb8] sm:$0xff]  }
0x1536   : > { %v4108_v56 = vpop.f32.mrb[58].mxu0  ;;  %v8075_v55 = vld [vmem:[#allocation23 + $0x80] sm:$0xff]  }
0x1537   : > { %v4109_v57 = vadd.f32 %v6492_v51, %v4108_v56  ;;  %v7350_v60 = vpop.f32.mrb[59].mxu0  ;;  %v8080_v51 = vld [vmem:[#allocation26 + $0xb0] sm:$0xff]  }
0x15cc   : > { %v3810_v63 = vpop.f32.mrb[52].mxu1 }
0x15cd   : > { %v3822_v1 = vsel %vm3821_vm6, %v3810_v63, -1e+10  ;;  %v7303_v2 = vpop.f32.mrb[53].mxu1  ;;  %v4112_v63 = vpack.c.bf16 %v4109_v57, %v4106_v54 }
0x15ce   : > { %v3813_v61 = vpop.f32.mrb[54].mxu1  ;;  %v3824_v3 = vsel %vm3823_vm7, %v3822_v1, -inf }
0x15cf   : > { %3825 = vmax.xlane.f32.xlu0 %v3824_v3  ;;  %v7304_v5 = vpop.f32.mrb[55].mxu1 }
0x165c   : > { %v3826_v6 = vpop.xlane.xlu0 %3825 }
0x165d   : > { %v3827_v7 = vsub.f32 %v3822_v1, %v3826_v6  ;;  %v4232_v1 = vsel %vm1694_vm1, %v4112_v63, 0 }
0x165e   : > { %7372 = vmatpush3.bf16.xpose.msra.mxu0 %v4232_v1  ;;  %v8077_v1 = vld [vmem:[#allocation23 + $0x88] sm:$0xff]  }
0x165f   : > { %v3828_v8 = vmul.f32 1.442695, %v3827_v7  ;;  %7377 = vmatprep.subr.bf16.mxu0 %v9209_v0 }
0x1661   : > { %8181 = vpow2.f32 %v3828_v8 }
0x166b   : > { %v8182_v9 = vpop.eup %8181 }
0x166c   : > { %v3830_v10 = vsel %vm3823_vm7, %v8182_v9, 0.0 }
0x166d   : > { %3831 = vadd.xlane.f32.xlu1 %v3830_v10 }
0x16fa   : > { %v3832_v26 = vpop.xlane.xlu1 %3831 }
0x16fb   : > { %8183 = vrcp.f32 %v3832_v26 }
0x1705   : > { %v8184_v27 = vpop.eup %8183 }
0x1706   : > { %v3834_v28 = vmul.f32 %v8184_v27, %v8182_v9 }
0x1708   : > { %v3835_v32 = vpack.c.bf16 %v3834_v28, %v3834_v28 }
0x170a   : > { %7308 = vmatmul.mubr.msk.bf16.vlgmr.msra.gmra.mrb[56].mxu1 %vm3823_vm7, %v3835_v32 }
0x170b   : > { %7312 = vmatpush3.bf16.msra.mxu1 %v8047_v31  ;;  %7327 = vmatprep.mubr.msk.bf16.mxu1 %vm9210_vm0, %v9209_v0 }
0x170c   : > { %7313 = vmatprep.subr.bf16.mxu1 %v9209_v0 }
0x170f   : > { %7314 = vmatpush3.bf16.msra.mxu1 %v8049_v33 }
0x1710   : > { %7315 = vmatprep.subr.bf16.mxu1 %v9209_v0 }
0x1713   : > { %7316 = vmatpush3.bf16.msra.mxu1 %v8051_v34 }
0x1714   : > { %7317 = vmatprep.subr.bf16.mxu1 %v9209_v0 }
0x1717   : > { %7318 = vmatpush3.bf16.msra.mxu1 %v8053_v35 }
0x1718   : > { %7319 = vmatprep.subr.bf16.mxu1 %v9209_v0 }
0x171b   : > { %7320 = vmatpush3.bf16.msra.mxu1 %v8055_v36 }
0x171c   : > { %7321 = vmatprep.subr.bf16.mxu1 %v9209_v0 }
0x171f   : > { %7322 = vmatpush3.bf16.msra.mxu1 %v8056_v43 }
0x1720   : > { %7323 = vmatprep.subr.bf16.mxu1 %v9209_v0 }
0x1723   : > { %7324 = vmatpush3.bf16.msra.mxu1 %v8057_v37  ;;  %v8069_v37 = vld [vmem:[#allocation26 + $0x80] sm:$0xff]  }
0x1724   : > { %7325 = vmatprep.subr.bf16.mxu1 %v9209_v0 }
0x1727   : > { %7326 = vmatpush3.bf16.msra.mxu1 %v8058_v38  ;;  %v8070_v38 = vld [vmem:[#allocation26 + $0x88] sm:$0xff]  }
0x1728   : > { %7351 = vmatprep.subr.bf16.mxu1 %v9209_v0 }
0x172a   : > { %7328 = vmatmul.mubr.bf16.vlgmr.msra.gmra.mrb[60].mxu1 %v10232_v30 }
0x172b   : > { %7352 = vmatpush3.bf16.msra.mxu1 %v8059_v39  ;;  %7367 = vmatprep.mubr.msk.bf16.mxu1 %vm9210_vm0, %v9209_v0  ;;  %v8072_v39 = vld [vmem:[#allocation26 + $0x90] sm:$0xff]  }
0x172c   : > { %7353 = vmatprep.subr.bf16.mxu1 %v9209_v0 }
0x172f   : > { %7354 = vmatpush3.bf16.msra.mxu1 %v8060_v40 }
0x1730   : > { %7355 = vmatprep.subr.bf16.mxu1 %v9209_v0 }
0x1733   : > { %7356 = vmatpush3.bf16.msra.mxu1 %v8061_v41 }
0x1734   : > { %7357 = vmatprep.subr.bf16.mxu1 %v9209_v0 }
0x1737   : > { %7358 = vmatpush3.bf16.msra.mxu1 %v8062_v44 }
0x1738   : > { %7359 = vmatprep.subr.bf16.mxu1 %v9209_v0 }
0x173b   : > { %7360 = vmatpush3.bf16.msra.mxu1 %v8063_v45  ;;  %v8071_v45 = vld [vmem:[#allocation32 + $0x10] sm:$0xff]  }
0x173c   : > { %7361 = vmatprep.subr.bf16.mxu1 %v9209_v0 }
0x173f   : > { %7362 = vmatpush3.bf16.msra.mxu1 %v8064_v46 }
0x1740   : > { %7363 = vmatprep.subr.bf16.mxu1 %v9209_v0 }
0x1743   : > { %7364 = vmatpush3.bf16.msra.mxu1 %v8065_v47  ;;  %v8073_v47 = vld [vmem:[#allocation32 + $0x18] sm:$0xff]  }
0x1744   : > { %7365 = vmatprep.subr.bf16.mxu1 %v9209_v0 }
0x1747   : > { %7366 = vmatpush3.bf16.msra.mxu1 %v8066_v48  ;;  %v8074_v48 = vld [vmem:[#allocation26 + $0x98] sm:$0xff]  }
0x1748   : > { %7391 = vmatprep.subr.bf16.mxu1 %v9209_v0 }
0x174a   : > { %7368 = vmatmul.mubr.bf16.vlgmr.msra.gmra.mrb[64].mxu1 %v10218_v52 }
0x174b   : > { %7392 = vmatpush3.bf16.msra.mxu1 %v8067_v49  ;;  %7395 = vmatprep.mubr.msk.bf16.mxu1 %vm9210_vm0, %v9209_v0  ;;  %v8076_v49 = vld [vmem:[#allocation26 + $0xa0] sm:$0xff]  }
0x174c   : > { %7393 = vmatprep.subr.bf16.mxu1 %v9209_v0 }
0x174f   : > { %7394 = vmatpush3.bf16.msra.mxu1 %v8068_v50  ;;  %v8078_v50 = vld [vmem:[#allocation26 + $0xa8] sm:$0xff]  }
0x1750   : > { %7419 = vmatprep.subr.bf16.mxu1 %v9209_v0 }
0x17dd   : > { %v3873_v2 = vpop.f32.mrb[56].mxu1 }
0x17de   : > { %v3879_v61 = vpack.c.bf16 %v3873_v2, %v3873_v2  ;;  %v7309_v3 = vpop.f32.mrb[57].mxu1  ;;  %v8079_v2 = vld [vmem:[#allocation23 + $0x90] sm:$0xff]  }
0x17df   : > { %v3876_v5 = vpop.f32.mrb[58].mxu1  ;;  %v8083_v3 = vld [vmem:[#allocation23 + $0xa0] sm:$0xff]  }
0x17e0   : > { %v7310_v4 = vpop.f32.mrb[59].mxu1  ;;  %7396 = vmatmul.mubr.msk.bf16.vlgmr.msra.gmra.mrb[68].mxu1 %vm1694_vm1, %v3879_v61  ;;  %v8081_v61 = vld [vmem:[#allocation23 + $0x98] sm:$0xff]   ;;  %v8084_v5 = vld [vmem:[#allocation23 + $0xa8] sm:$0xff]  }
0x17e1   : > { %7435 = vmatprep.mubr.msk.bf16.mxu1 %vm9210_vm0, %v9209_v0  ;;  %7420 = vmatpush3.bf16.msra.mxu1 %v8069_v37  ;;  %v8085_v4 = vld [vmem:[#allocation23 + $0xb0] sm:$0xff]  }
0x17e2   : > { %7421 = vmatprep.subr.bf16.mxu1 %v9209_v0 }
0x17e5   : > { %7422 = vmatpush3.bf16.msra.mxu1 %v8070_v38 }
0x17e6   : > { %7423 = vmatprep.subr.bf16.mxu1 %v9209_v0 }
0x17e9   : > { %7424 = vmatpush3.bf16.msra.mxu1 %v8072_v39 }
0x17ea   : > { %7425 = vmatprep.subr.bf16.mxu1 %v9209_v0 }
0x17ed   : > { %7426 = vmatpush3.bf16.msra.mxu1 %v8074_v48 }
0x17ee   : > { %7427 = vmatprep.subr.bf16.mxu1 %v9209_v0 }
0x17f1   : > { %7428 = vmatpush3.bf16.msra.mxu1 %v8076_v49 }
0x17f2   : > { %7429 = vmatprep.subr.bf16.mxu1 %v9209_v0 }
0x17f5   : > { %7430 = vmatpush3.bf16.msra.mxu1 %v8078_v50 }
0x17f6   : > { %7431 = vmatprep.subr.bf16.mxu1 %v9209_v0 }
0x17f9   : > { %7432 = vmatpush3.bf16.msra.mxu1 %v8080_v51 }
0x17fa   : > { %7433 = vmatprep.subr.bf16.mxu1 %v9209_v0 }
0x17fd   : > { %v3991_v6 = vpop.f32.mrb[60].mxu1  ;;  %7434 = vmatpush3.bf16.msra.mxu1 %v8082_v53  ;;  %v6536_v53 = vld [vmem:[#allocation31 + $0x2] ss:$0 sm:$0xff] }
0x17fe   : > { %v3992_v7 = vadd.f32 %v6483_v21, %v3991_v6  ;;  %v7329_v8 = vpop.f32.mrb[61].mxu1  ;;  %7459 = vmatprep.subr.bf16.mxu1 %v9209_v0  ;;  %v8086_v21 = vld [vmem:[#allocation23 + $0xb8] sm:$0xff]   ;;  %v6527_v6 = vld [vmem:[#allocation28 + $0x2] ss:$0 sm:$0xff] }
0x17ff   : > { %v3994_v9 = vpop.f32.mrb[62].mxu1 }
0x1800   : > { %v3997_v10 = vpack.c.bf16 %v3992_v7, %v3992_v7  ;;  %v7330_v11 = vpop.f32.mrb[63].mxu1  ;;  %7436 = vmatmul.mubr.bf16.vlgmr.msra.gmra.mrb[72].mxu1 %v10218_v52 }
0x1801   : > { %7461 = vmatprep.mubr.msk.bf16.mxu1 %vm9210_vm0, %v9209_v0 }
0x1802   : > { %7374 = vmatmul.mubr.msk.bf16.vlgmr.msra.gmra.mrb[60].mxu0 %vm1694_vm1, %v3997_v10 }
0x1803   : > { %7379 = vmatprep.mubr.msk.bf16.mxu0 %vm9210_vm0, %v9209_v0 }
0x181d   : > { %v4220_v13 = vpop.f32.mrb[64].mxu1 }
0x181e   : > { %v4221_v14 = vadd.f32 %v6501_v12, %v4220_v13  ;;  %v7369_v15 = vpop.f32.mrb[65].mxu1 }
0x181f   : > { %v4223_v16 = vpop.f32.mrb[66].mxu1 }
0x1820   : > { %v4224_v17 = vadd.f32 %v6501_v12, %v4223_v16  ;;  %v7370_v18 = vpop.f32.mrb[67].mxu1 }
0x1822   : > { %v4227_v19 = vpack.c.bf16 %v4224_v17, %v4221_v14 }
0x1824   : > { %7378 = vmatpush3.bf16.msra.mxu0 %v4227_v19 }
0x1825   : > { %7383 = vmatprep.subr.bf16.mxu0 %v9209_v0 }
0x18b3   : > { %v10314_v20 = vpop.f32.mrb[68].mxu1 }
0x18b4   : > { %v7397_v22 = vpop.f32.mrb[69].mxu1 }
0x18b5   : > { %v4443_v23 = vpop.f32.mrb[70].mxu1  ;;  %v6518_v22 = vld [vmem:[#allocation25 + $0x2] ss:$0 sm:$0xff] }
0x18b6   : > { %v7398_v24 = vpop.f32.mrb[71].mxu1 }
0x18d3   : > { %v4667_v7 = vpop.f32.mrb[72].mxu1 }
0x18d4   : > { %v4668_v8 = vadd.f32 %v6527_v6, %v4667_v7  ;;  %v7437_v9 = vpop.f32.mrb[73].mxu1  ;;  %v8100_v7 = vld [vmem:[#allocation26 + $0xd8] sm:$0xff]  }
0x18d5   : > { %v4268_v25 = vpop.f32.mrb[60].mxu0  ;;  %v4670_v10 = vpop.f32.mrb[74].mxu1  ;;  %v8104_v9 = vld [vmem:[#allocation26 + $0xe8] sm:$0xff]  }
0x18d6   : > { %v4274_v26 = vsel %vm3821_vm6, %v4268_v25, -1e+10  ;;  %v7375_v27 = vpop.f32.mrb[61].mxu0  ;;  %v4671_v11 = vadd.f32 %v6527_v6, %v4670_v10  ;;  %v7438_v12 = vpop.f32.mrb[75].mxu1  ;;  %v8099_v6 = vld [vmem:[#allocation32 + $0x28] sm:$0xff]  }
0x18d7   : > { %v4271_v28 = vpop.f32.mrb[62].mxu0  ;;  %v4275_v31 = vsel %vm3823_vm7, %v4274_v26, -inf  ;;  %v8106_v10 = vld [vmem:[#allocation26 + $0xf0] sm:$0xff]  }
0x18d8   : > { %4276 = vmax.xlane.f32.xlu0 %v4275_v31  ;;  %v7376_v32 = vpop.f32.mrb[63].mxu0  ;;  %v4674_v13 = vpack.c.bf16 %v4671_v11, %v4668_v8  ;;  %v8087_v31 = vld [vmem:[#allocation29 + $0x80] sm:$0xff]   ;;  %v8108_v11 = vld [vmem:[#allocation26 + $0xf8] sm:$0xff]  }
0x18d9   : > { %v8088_v32 = vld [vmem:[#allocation29 + $0x88] sm:$0xff]   ;;  %v8102_v8 = vld [vmem:[#allocation26 + $0xe0] sm:$0xff]  }
0x18da   : > { %v4794_v14 = vsel %vm1694_vm1, %v4674_v13, 0  ;;  %v8101_v13 = vld [vmem:[#allocation23 + $0xc0] sm:$0xff]  }
0x18db   : > { %7460 = vmatpush3.bf16.xpose.msra.mxu1 %v4794_v14 }
0x18dc   : > { %7465 = vmatprep.subr.bf16.mxu1 %v9209_v0 }
0x1965   : > { %v4277_v33 = vpop.xlane.xlu0 %4276 }
0x1966   : > { %v4278_v34 = vsub.f32 %v4274_v26, %v4277_v33  ;;  %v8090_v33 = vld [vmem:[#allocation29 + $0x98] sm:$0xff]  }
0x1968   : > { %v4279_v35 = vmul.f32 1.442695, %v4278_v34  ;;  %v8091_v34 = vld [vmem:[#allocation29 + $0xa0] sm:$0xff]  }
0x196a   : > { %8185 = vpow2.f32 %v4279_v35  ;;  %v8092_v35 = vld [vmem:[#allocation29 + $0xa8] sm:$0xff]  }
0x1974   : > { %v8186_v36 = vpop.eup %8185 }
0x1975   : > { %v4281_v43 = vsel %vm3823_vm7, %v8186_v36, 0.0 }
0x1976   : > { %4282 = vadd.xlane.f32.xlu1 %v4281_v43  ;;  %v8094_v43 = vld [vmem:[#allocation29 + $0xb8] sm:$0xff]  }
0x1a03   : > { %v4283_v40 = vpop.xlane.xlu1 %4282 }
0x1a04   : > { %8187 = vrcp.f32 %v4283_v40 }
0x1a0e   : > { %v8188_v41 = vpop.eup %8187 }
0x1a0f   : > { %v4285_v44 = vmul.f32 %v8188_v41, %v8186_v36  ;;  %v8093_v36 = vld [vmem:[#allocation29 + $0xb0] sm:$0xff]  }
0x1a11   : > { %v4286_v46 = vpack.c.bf16 %v4285_v44, %v4285_v44 }
0x1a13   : > { %7380 = vmatmul.mubr.msk.bf16.vlgmr.msra.gmra.mrb[64].mxu0 %vm3823_vm7, %v4286_v46 }
0x1a14   : > { %7384 = vmatpush3.bf16.msra.mxu0 %v8071_v45  ;;  %7387 = vmatprep.mubr.msk.bf16.mxu0 %vm9210_vm0, %v9209_v0 }
0x1a15   : > { %7385 = vmatprep.subr.bf16.mxu0 %v9209_v0 }
0x1a18   : > { %7386 = vmatpush3.bf16.msra.mxu0 %v8073_v47 }
0x1a19   : > { %7399 = vmatprep.subr.bf16.mxu0 %v9209_v0 }
0x1ae6   : > { %v4324_v54 = vpop.f32.mrb[64].mxu0 }
0x1ae7   : > { %v4330_v56 = vpack.c.bf16 %v4324_v54, %v4324_v54  ;;  %v7381_v57 = vpop.f32.mrb[65].mxu0 }
0x1ae8   : > { %v4327_v60 = vpop.f32.mrb[66].mxu0 }
0x1ae9   : > { %v7382_v63 = vpop.f32.mrb[67].mxu0  ;;  %7388 = vmatmul.mubr.msk.bf16.vlgmr.msra.gmra.mrb[68].mxu0 %vm1694_vm1, %v4330_v56 }
0x1aea   : > { %7400 = vmatpush3.bf16.msra.mxu0 %v8075_v55  ;;  %7415 = vmatprep.mubr.msk.bf16.mxu0 %vm9210_vm0, %v9209_v0  ;;  %v8095_v63 = vld [vmem:[#allocation26 + $0xc0] sm:$0xff]  }
0x1aeb   : > { %7401 = vmatprep.subr.bf16.mxu0 %v9209_v0 }
0x1aee   : > { %7402 = vmatpush3.bf16.msra.mxu0 %v8077_v1  ;;  %v8096_v1 = vld [vmem:[#allocation26 + $0xc8] sm:$0xff]  }
0x1aef   : > { %7403 = vmatprep.subr.bf16.mxu0 %v9209_v0 }
0x1af2   : > { %7404 = vmatpush3.bf16.msra.mxu0 %v8079_v2  ;;  %v8098_v2 = vld [vmem:[#allocation26 + $0xd0] sm:$0xff]  }
0x1af3   : > { %7405 = vmatprep.subr.bf16.mxu0 %v9209_v0 }
0x1af6   : > { %7406 = vmatpush3.bf16.msra.mxu0 %v8081_v61 }
0x1af7   : > { %7407 = vmatprep.subr.bf16.mxu0 %v9209_v0 }
0x1afa   : > { %7408 = vmatpush3.bf16.msra.mxu0 %v8083_v3 }
0x1afb   : > { %7409 = vmatprep.subr.bf16.mxu0 %v9209_v0 }
0x1afe   : > { %7410 = vmatpush3.bf16.msra.mxu0 %v8084_v5 }
0x1aff   : > { %7411 = vmatprep.subr.bf16.mxu0 %v9209_v0 }
0x1b02   : > { %7412 = vmatpush3.bf16.msra.mxu0 %v8085_v4  ;;  %v8097_v4 = vld [vmem:[#allocation32 + $0x20] sm:$0xff]  }
0x1b03   : > { %7413 = vmatprep.subr.bf16.mxu0 %v9209_v0 }
0x1b06   : > { %7414 = vmatpush3.bf16.msra.mxu0 %v8086_v21 }
0x1b07   : > { %7439 = vmatprep.subr.bf16.mxu0 %v9209_v0 }
0x1b09   : > { %7416 = vmatmul.mubr.bf16.vlgmr.msra.gmra.mrb[72].mxu0 %v10232_v30 }
0x1b0a   : > { %7455 = vmatprep.mubr.msk.bf16.mxu0 %vm9210_vm0, %v9209_v0  ;;  %7440 = vmatpush3.bf16.msra.mxu0 %v8087_v31 }
0x1b0b   : > { %7441 = vmatprep.subr.bf16.mxu0 %v9209_v0 }
0x1b0e   : > { %7442 = vmatpush3.bf16.msra.mxu0 %v8088_v32 }
0x1b0f   : > { %7443 = vmatprep.subr.bf16.mxu0 %v9209_v0 }
0x1bbc   : > { %v4385_v15 = vpop.f32.mrb[68].mxu0 }
0x1bbd   : > { %v10353_v16 = vadd.f32 %v10314_v20, %v4385_v15  ;;  %v7389_v17 = vpop.f32.mrb[69].mxu0  ;;  %v8089_v20 = vld [vmem:[#allocation29 + $0x90] sm:$0xff]  }
0x1bbe   : > { %v4388_v18 = vpop.f32.mrb[70].mxu0  ;;  %7444 = vmatpush3.bf16.msra.mxu0 %v8089_v20 }
0x1bbf   : > { %v7390_v19 = vpop.f32.mrb[71].mxu0  ;;  %7445 = vmatprep.subr.bf16.mxu0 %v9209_v0 }
0x1bc0   : > { %v8103_v19 = vld [vmem:[#allocation23 + $0xc8] sm:$0xff]  }
0x1bc2   : > { %7446 = vmatpush3.bf16.msra.mxu0 %v8090_v33 }
0x1bc3   : > { %7447 = vmatprep.subr.bf16.mxu0 %v9209_v0 }
0x1bc6   : > { %7448 = vmatpush3.bf16.msra.mxu0 %v8091_v34 }
0x1bc7   : > { %7449 = vmatprep.subr.bf16.mxu0 %v9209_v0 }
0x1bca   : > { %7450 = vmatpush3.bf16.msra.mxu0 %v8092_v35 }
0x1bcb   : > { %7451 = vmatprep.subr.bf16.mxu0 %v9209_v0 }
0x1bce   : > { %7452 = vmatpush3.bf16.msra.mxu0 %v8093_v36 }
0x1bcf   : > { %7453 = vmatprep.subr.bf16.mxu0 %v9209_v0 }
0x1bd2   : > { %7454 = vmatpush3.bf16.msra.mxu0 %v8094_v43 }
0x1bd3   : > { %7499 = vmatprep.subr.bf16.mxu0 %v9209_v0 }
0x1bd5   : > { %7456 = vmatmul.mubr.bf16.vlgmr.msra.gmra.mrb[76].mxu0 %v10218_v52 }
0x1bd6   : > { %7515 = vmatprep.mubr.msk.bf16.mxu0 %vm9210_vm0, %v9209_v0  ;;  %7500 = vmatpush3.bf16.msra.mxu0 %v8095_v63 }
0x1bd7   : > { %7501 = vmatprep.subr.bf16.mxu0 %v9209_v0 }
0x1bda   : > { %7502 = vmatpush3.bf16.msra.mxu0 %v8096_v1 }
0x1bdb   : > { %7503 = vmatprep.subr.bf16.mxu0 %v9209_v0 }
0x1bdc   : > { %v4553_v23 = vpop.f32.mrb[72].mxu0 }
0x1bdd   : > { %v4554_v24 = vadd.f32 %v6518_v22, %v4553_v23  ;;  %v7417_v25 = vpop.f32.mrb[73].mxu0  ;;  %v8107_v22 = vld [vmem:[#allocation23 + $0xd8] sm:$0xff]   ;;  %v8109_v23 = vld [vmem:[#allocation23 + $0xe0] sm:$0xff]  }
0x1bde   : > { %v4556_v26 = vpop.f32.mrb[74].mxu0  ;;  %7504 = vmatpush3.bf16.msra.mxu0 %v8098_v2  ;;  %v8111_v25 = vld [vmem:[#allocation23 + $0xf0] sm:$0xff]  }
0x1bdf   : > { %v4559_v27 = vpack.c.bf16 %v4554_v24, %v4554_v24  ;;  %v7418_v28 = vpop.f32.mrb[75].mxu0  ;;  %7505 = vmatprep.subr.bf16.mxu0 %v9209_v0  ;;  %v8110_v24 = vld [vmem:[#allocation23 + $0xe8] sm:$0xff]   ;;  %v8112_v26 = vld [vmem:[#allocation23 + $0xf8] sm:$0xff]  }
0x1be1   : > { %7462 = vmatmul.mubr.msk.bf16.vlgmr.msra.gmra.mrb[76].mxu1 %vm1694_vm1, %v4559_v27  ;;  %v6559_v27 = vld [vmem:[#allocation28 + $0x3] ss:$0 sm:$0xff] }
0x1be2   : > { %7467 = vmatprep.mubr.msk.bf16.mxu1 %vm9210_vm0, %v9209_v0  ;;  %7506 = vmatpush3.bf16.msra.mxu0 %v8100_v7 }
0x1be3   : > { %7507 = vmatprep.subr.bf16.mxu0 %v9209_v0 }
0x1be6   : > { %7508 = vmatpush3.bf16.msra.mxu0 %v8102_v8 }
0x1be7   : > { %7509 = vmatprep.subr.bf16.mxu0 %v9209_v0 }
0x1bea   : > { %7510 = vmatpush3.bf16.msra.mxu0 %v8104_v9 }
0x1beb   : > { %7511 = vmatprep.subr.bf16.mxu0 %v9209_v0 }
0x1bee   : > { %7512 = vmatpush3.bf16.msra.mxu0 %v8106_v10  ;;  %v6568_v10 = vld [vmem:[#allocation31 + $0x3] ss:$0 sm:$0xff] }
0x1bef   : > { %7513 = vmatprep.subr.bf16.mxu0 %v9209_v0 }
0x1bf2   : > { %7514 = vmatpush3.bf16.msra.mxu0 %v8108_v11 }
0x1bf3   : > { %7539 = vmatprep.subr.bf16.mxu0 %v9209_v0 }
0x1bf5   : > { %7516 = vmatmul.mubr.bf16.vlgmr.msra.gmra.mrb[80].mxu0 %v10218_v52  ;;  %v8105_v52 = vld [vmem:[#allocation23 + $0xd0] sm:$0xff]  }
0x1bf6   : > { %7541 = vmatprep.mubr.msk.bf16.mxu0 %vm9210_vm0, %v9209_v0 }
0x1ca8   : > { %v4782_v45 = vpop.f32.mrb[76].mxu0 }
0x1ca9   : > { %v7457_v46 = vpop.f32.mrb[77].mxu0  ;;  %v4783_v54 = vadd.f32 %v6536_v53, %v4782_v45 }
0x1caa   : > { %v4785_v55 = vpop.f32.mrb[78].mxu0 }
0x1cab   : > { %v7458_v56 = vpop.f32.mrb[79].mxu0  ;;  %v4786_v57 = vadd.f32 %v6536_v53, %v4785_v55  ;;  %v8117_v53 = vld [vmem:[#allocation29 + $0xe0] sm:$0xff]   ;;  %v8119_v55 = vld [vmem:[#allocation29 + $0xf0] sm:$0xff]  }
0x1cac   : > { %v8120_v56 = vld [vmem:[#allocation29 + $0xf8] sm:$0xff]  }
0x1cad   : > { %v4789_v60 = vpack.c.bf16 %v4786_v57, %v4783_v54  ;;  %v8118_v54 = vld [vmem:[#allocation29 + $0xe8] sm:$0xff]   ;;  %v8202_v57 = vld [vmem:[%s9907_s29] sm:$0xff]  }
0x1caf   : > { %7466 = vmatpush3.bf16.msra.mxu1 %v4789_v60 }
0x1cb0   : > { %7471 = vmatprep.subr.bf16.mxu1 %v9209_v0 }
0x1cb4   : > { %v4830_v37 = vpop.f32.mrb[76].mxu1 }
0x1cb5   : > { %v4836_v38 = vsel %vm3821_vm6, %v4830_v37, -1e+10  ;;  %v7463_v39 = vpop.f32.mrb[77].mxu1 }
0x1cb6   : > { %v4833_v40 = vpop.f32.mrb[78].mxu1  ;;  %v4837_v41 = vsel %vm3823_vm7, %v4836_v38, -inf }
0x1cb7   : > { %4838 = vmax.xlane.f32.xlu0 %v4837_v41  ;;  %v7464_v44 = vpop.f32.mrb[79].mxu1  ;;  %v6550_v40 = vld [vmem:[#allocation25 + $0x3] ss:$0 sm:$0xff] }
0x1cc8   : > { %v5175_v28 = vpop.f32.mrb[80].mxu0 }
0x1cc9   : > { %v5176_v31 = vadd.f32 %v6559_v27, %v5175_v28  ;;  %v7517_v32 = vpop.f32.mrb[81].mxu0 }
0x1cca   : > { %v5178_v20 = vpop.f32.mrb[82].mxu0 }
0x1ccb   : > { %v5179_v33 = vadd.f32 %v6559_v27, %v5178_v20  ;;  %v7518_v34 = vpop.f32.mrb[83].mxu0 }
0x1ccd   : > { %v5182_v35 = vpack.c.bf16 %v5179_v33, %v5176_v31  ;;  %v6582_v31 = vld [vmem:[#allocation34] ss:$0 sm:$0xff] }
0x1ccf   : > { %v5302_v36 = vsel %vm1694_vm1, %v5182_v35, 0 }
0x1cd0   : > { %7540 = vmatpush3.bf16.xpose.msra.mxu0 %v5302_v36  ;;  %v8123_v36 = vld [vmem:[#allocation38] ss:$8 sps:$4 sm:$0xff]  }
0x1cd1   : > { %7545 = vmatprep.subr.bf16.mxu0 %v9209_v0 }
0x1d44   : > { %v4839_v47 = vpop.xlane.xlu0 %4838 }
0x1d45   : > { %v4840_v48 = vsub.f32 %v4836_v38, %v4839_v47 }
0x1d47   : > { %v4841_v49 = vmul.f32 1.442695, %v4840_v48 }
0x1d49   : > { %8189 = vpow2.f32 %v4841_v49  ;;  %v8113_v49 = vld [vmem:[#allocation29 + $0xc0] sm:$0xff]  }
0x1d53   : > { %v8190_v50 = vpop.eup %8189 }
0x1d54   : > { %v4843_v51 = vsel %vm3823_vm7, %v8190_v50, 0.0 }
0x1d55   : > { %4844 = vadd.xlane.f32.xlu1 %v4843_v51  ;;  %v8116_v51 = vld [vmem:[#allocation29 + $0xd8] sm:$0xff]  }
0x1de2   : > { %v4845_v61 = vpop.xlane.xlu1 %4844 }
0x1de3   : > { %8191 = vrcp.f32 %v4845_v61 }
0x1ded   : > { %v8192_v3 = vpop.eup %8191 }
0x1dee   : > { %v4847_v5 = vmul.f32 %v8192_v3, %v8190_v50  ;;  %v8114_v50 = vld [vmem:[#allocation29 + $0xc8] sm:$0xff]  }
0x1df0   : > { %v4848_v21 = vpack.c.bf16 %v4847_v5, %v4847_v5 }
0x1df2   : > { %7468 = vmatmul.mubr.msk.bf16.vlgmr.msra.gmra.mrb[80].mxu1 %vm3823_vm7, %v4848_v21 }
0x1df3   : > { %7472 = vmatpush3.bf16.msra.mxu1 %v8097_v4  ;;  %7475 = vmatprep.mubr.msk.bf16.mxu1 %vm9210_vm0, %v9209_v0 }
0x1df4   : > { %7473 = vmatprep.subr.bf16.mxu1 %v9209_v0 }
0x1df7   : > { %7474 = vmatpush3.bf16.msra.mxu1 %v8099_v6 }
0x1df8   : > { %7479 = vmatprep.subr.bf16.mxu1 %v9209_v0 }
0x1ec5   : > { %v4886_v12 = vpop.f32.mrb[80].mxu1 }
0x1ec6   : > { %v4892_v14 = vpack.c.bf16 %v4886_v12, %v4886_v12  ;;  %v7469_v15 = vpop.f32.mrb[81].mxu1 }
0x1ec7   : > { %v4889_v17 = vpop.f32.mrb[82].mxu1 }
0x1ec8   : > { %v7470_v18 = vpop.f32.mrb[83].mxu1  ;;  %7476 = vmatmul.mubr.msk.bf16.vlgmr.msra.gmra.mrb[84].mxu1 %vm1694_vm1, %v4892_v14 }
0x1ec9   : > { %7480 = vmatpush3.bf16.msra.mxu1 %v8101_v13  ;;  %7495 = vmatprep.mubr.msk.bf16.mxu1 %vm9210_vm0, %v9209_v0 }
0x1eca   : > { %7481 = vmatprep.subr.bf16.mxu1 %v9209_v0 }
0x1ecd   : > { %7482 = vmatpush3.bf16.msra.mxu1 %v8103_v19  ;;  %v8121_v19 = vld [vmem:[#allocation32 + $0x30] sm:$0xff]  }
0x1ece   : > { %7483 = vmatprep.subr.bf16.mxu1 %v9209_v0 }
0x1ed1   : > { %7484 = vmatpush3.bf16.msra.mxu1 %v8105_v52 }
0x1ed2   : > { %7485 = vmatprep.subr.bf16.mxu1 %v9209_v0 }
0x1ed5   : > { %7486 = vmatpush3.bf16.msra.mxu1 %v8107_v22  ;;  %v8122_v22 = vld [vmem:[#allocation32 + $0x38] sm:$0xff]  }
0x1ed6   : > { %7487 = vmatprep.subr.bf16.mxu1 %v9209_v0 }
0x1ed9   : > { %7488 = vmatpush3.bf16.msra.mxu1 %v8109_v23 }
0x1eda   : > { %7489 = vmatprep.subr.bf16.mxu1 %v9209_v0 }
0x1edd   : > { %7490 = vmatpush3.bf16.msra.mxu1 %v8110_v24 }
0x1ede   : > { %7491 = vmatprep.subr.bf16.mxu1 %v9209_v0 }
0x1ee1   : > { %7492 = vmatpush3.bf16.msra.mxu1 %v8111_v25 }
0x1ee2   : > { %7493 = vmatprep.subr.bf16.mxu1 %v9209_v0 }
0x1ee5   : > { %7494 = vmatpush3.bf16.msra.mxu1 %v8112_v26 }
0x1ee6   : > { %7519 = vmatprep.subr.bf16.mxu1 %v9209_v0 }
0x1ee8   : > { %7496 = vmatmul.mubr.bf16.vlgmr.msra.gmra.mrb[88].mxu1 %v10232_v30 }
0x1ee9   : > { %7535 = vmatprep.mubr.msk.bf16.mxu1 %vm9210_vm0, %v9209_v0  ;;  %7520 = vmatpush3.bf16.msra.mxu1 %v8113_v49  ;;  %v8138_v49 = vld [vmem:[#allocation38 + $0x50] ss:$8 sps:$4 sm:$0xff]  }
0x1eea   : > { %7521 = vmatprep.subr.bf16.mxu1 %v9209_v0 }
0x1eed   : > { %7522 = vmatpush3.bf16.msra.mxu1 %v8114_v50  ;;  %v8143_v50 = vld [vmem:[#allocation38 + $0x64] ss:$8 sps:$4 sm:$0xff]  }
0x1eee   : > { %7523 = vmatprep.subr.bf16.mxu1 %v9209_v0 }
0x1f9b   : > { %v4947_v43 = vpop.f32.mrb[84].mxu1 }
0x1f9c   : > { %v10407_v37 = vadd.f32 %v4947_v43, %v10353_v16  ;;  %v7477_v30 = vpop.f32.mrb[85].mxu1  ;;  %v8115_v16 = vld [vmem:[#allocation29 + $0xd0] sm:$0xff]  }
0x1f9d   : > { %v4950_v38 = vpop.f32.mrb[86].mxu1  ;;  %7524 = vmatpush3.bf16.msra.mxu1 %v8115_v16  ;;  %v8125_v43 = vld [vmem:[#allocation38 + $0x4] ss:$8 sps:$4 sm:$0xff]   ;;  %v8128_v30 = vld [vmem:[#allocation38 + $0x14] ss:$8 sps:$4 sm:$0xff]  }
0x1f9e   : > { %v7478_v39 = vpop.f32.mrb[87].mxu1  ;;  %7525 = vmatprep.subr.bf16.mxu1 %v9209_v0  ;;  %v8126_v38 = vld [vmem:[#allocation38 + $0x10] ss:$8 sps:$4 sm:$0xff]   ;;  %v8141_v16 = vld [vmem:[#allocation38 + $0x60] ss:$8 sps:$4 sm:$0xff]  }
0x1f9f   : > { %v8131_v39 = vld [vmem:[#allocation38 + $0x24] ss:$8 sps:$4 sm:$0xff]  }
0x1fa1   : > { %7526 = vmatpush3.bf16.msra.mxu1 %v8116_v51  ;;  %v8146_v51 = vld [vmem:[#allocation38 + $0x74] ss:$8 sps:$4 sm:$0xff]  }
0x1fa2   : > { %7527 = vmatprep.subr.bf16.mxu1 %v9209_v0 }
0x1fa5   : > { %7528 = vmatpush3.bf16.msra.mxu1 %v8117_v53  ;;  %v8144_v53 = vld [vmem:[#allocation38 + $0x70] ss:$8 sps:$4 sm:$0xff]  }
0x1fa6   : > { %7529 = vmatprep.subr.bf16.mxu1 %v9209_v0 }
0x1fa9   : > { %7530 = vmatpush3.bf16.msra.mxu1 %v8118_v54  ;;  %v8147_v54 = vld [vmem:[#allocation41 + $0x40] sm:$0xff]  }
0x1faa   : > { %7531 = vmatprep.subr.bf16.mxu1 %v9209_v0 }
0x1fad   : > { %7532 = vmatpush3.bf16.msra.mxu1 %v8119_v55  ;;  %v8148_v55 = vld [vmem:[#allocation41] sm:$0xff]  }
0x1fae   : > { %7533 = vmatprep.subr.bf16.mxu1 %v9209_v0 }
0x1fb1   : > { %7534 = vmatpush3.bf16.msra.mxu1 %v8120_v56  ;;  %v8149_v56 = vld [vmem:[#allocation41 + $0x48] sm:$0xff]  }
0x1fb2   : > { %6897 = vmatprep.subr.bf16.mxu1 %v8147_v54 }
0x1fb4   : > { %7536 = vmatmul.mubr.bf16.vlgmr.msra.gmra.mrb[92].mxu1 %v8202_v57  ;;  %v8150_v57 = vld [vmem:[#allocation41 + $0x8] sm:$0xff]  }
0x1fb5   : > { %6898 = vmatpush3.bf16.msra.mxu1 %v8148_v55 }
0x1fb6   : > { %6899 = vmatprep.subr.bf16.mxu1 %v8149_v56 }
0x1fb9   : > { %6900 = vmatpush3.bf16.msra.mxu1 %v8150_v57 }
0x1fbb   : > { %v5061_v41 = vpop.f32.mrb[88].mxu1 }
0x1fbc   : > { %v5062_v44 = vadd.f32 %v6550_v40, %v5061_v41  ;;  %v7497_v45 = vpop.f32.mrb[89].mxu1 }
0x1fbd   : > { %v5064_v46 = vpop.f32.mrb[90].mxu1  ;;  %v8134_v45 = vld [vmem:[#allocation38 + $0x34] ss:$8 sps:$4 sm:$0xff]  }
0x1fbe   : > { %v5067_v47 = vpack.c.bf16 %v5062_v44, %v5062_v44  ;;  %v7498_v48 = vpop.f32.mrb[91].mxu1  ;;  %v8137_v46 = vld [vmem:[#allocation38 + $0x44] ss:$8 sps:$4 sm:$0xff]  }
0x1fbf   : > { %v8140_v48 = vld [vmem:[#allocation38 + $0x54] ss:$8 sps:$4 sm:$0xff]  }
0x1fc0   : > { %7542 = vmatmul.mubr.msk.bf16.vlgmr.msra.gmra.mrb[84].mxu0 %vm1694_vm1, %v5067_v47  ;;  %v8135_v47 = vld [vmem:[#allocation38 + $0x40] ss:$8 sps:$4 sm:$0xff]  }
0x1fc1   : > { %7547 = vmatprep.mubr.msk.bf16.mxu0 %vm9210_vm0, %v9209_v0 }
0x2087   : > { %v5290_v5 = vpop.f32.mrb[92].mxu1 }
0x2088   : > { %v7537_v4 = vpop.f32.mrb[93].mxu1  ;;  %v5291_v11 = vadd.f32 %v6568_v10, %v5290_v5  ;;  %v8157_v5 = vld [vmem:[#allocation41 + $0x68] sm:$0xff]  }
0x2089   : > { %v5293_v62 = vpop.f32.mrb[94].mxu1  ;;  %v8158_v4 = vld [vmem:[#allocation41 + $0x28] sm:$0xff]  }
0x208a   : > { %v7538_v12 = vpop.f32.mrb[95].mxu1  ;;  %v5294_v13 = vadd.f32 %v6568_v10, %v5293_v62 }
0x208c   : > { %v5297_v14 = vpack.c.bf16 %v5294_v13, %v5291_v11  ;;  %v6584_v11 = vld [vmem:[#allocation37] ss:$0 sm:$0xff] }
0x208e   : > { %7546 = vmatpush3.bf16.msra.mxu0 %v5297_v14  ;;  %v8159_v14 = vld [vmem:[#allocation41 + $0x70] sm:$0xff]  }
0x208f   : > { %7551 = vmatprep.subr.bf16.mxu0 %v9209_v0 }
0x2093   : > { %v5338_v60 = vpop.f32.mrb[84].mxu0 }
0x2094   : > { %v5344_v63 = vsel %vm3821_vm6, %v5338_v60, -1e+10  ;;  %v7543_v1 = vpop.f32.mrb[85].mxu0  ;;  %v8151_v60 = vld [vmem:[#allocation41 + $0x50] sm:$0xff]  }
0x2095   : > { %v5341_v2 = vpop.f32.mrb[86].mxu0  ;;  %v5345_v61 = vsel %vm3823_vm7, %v5344_v63, -inf  ;;  %6901 = vmatprep.subr.bf16.mxu1 %v8151_v60  ;;  %v8153_v1 = vld [vmem:[#allocation41 + $0x58] sm:$0xff]  }
0x2096   : > { %5346 = vmax.xlane.f32.xlu0 %v5345_v61  ;;  %v7544_v3 = vpop.f32.mrb[87].mxu0  ;;  %v8154_v2 = vld [vmem:[#allocation41 + $0x18] sm:$0xff]   ;;  %v8155_v61 = vld [vmem:[#allocation41 + $0x60] sm:$0xff]  }
0x2097   : > { %v8156_v3 = vld [vmem:[#allocation41 + $0x20] sm:$0xff]  }
0x2123   : > { %v5347_v21 = vpop.xlane.xlu0 %5346 }
0x2124   : > { %v5348_v6 = vsub.f32 %v5344_v63, %v5347_v21  ;;  %v8152_v63 = vld [vmem:[#allocation41 + $0x10] sm:$0xff]  }
0x2125   : > { %6902 = vmatpush3.bf16.msra.mxu1 %v8152_v63 }
0x2126   : > { %v5349_v7 = vmul.f32 1.442695, %v5348_v6  ;;  %6903 = vmatprep.subr.bf16.mxu1 %v8153_v1 }
0x2128   : > { %8193 = vpow2.f32 %v5349_v7 }
0x2129   : > { %6904 = vmatpush3.bf16.msra.mxu1 %v8154_v2 }
0x212a   : > { %6905 = vmatprep.subr.bf16.mxu1 %v8155_v61 }
0x212d   : > { %6906 = vmatpush3.bf16.msra.mxu1 %v8156_v3 }
0x212e   : > { %6907 = vmatprep.subr.bf16.mxu1 %v8157_v5 }
0x2131   : > { %6908 = vmatpush3.bf16.msra.mxu1 %v8158_v4 }
0x2132   : > { %v8194_v8 = vpop.eup %8193  ;;  %6909 = vmatprep.subr.bf16.mxu1 %v8159_v14 }
0x2133   : > { %v5351_v9 = vsel %vm3823_vm7, %v8194_v8, 0.0 }
0x2134   : > { %5352 = vadd.xlane.f32.xlu1 %v5351_v9  ;;  %v6583_v9 = vld [vmem:[#allocation35] ss:$0 sm:$0xff] }
0x21c1   : > { %v5353_v15 = vpop.xlane.xlu1 %5352 }
0x21c2   : > { %8195 = vrcp.f32 %v5353_v15  ;;  %v8160_v15 = vld [vmem:[#allocation41 + $0x30] sm:$0xff]  }
0x21c3   : > { %6910 = vmatpush3.bf16.msra.mxu1 %v8160_v15 }
0x21cc   : > { %v8196_v17 = vpop.eup %8195 }
0x21cd   : > { %v5355_v18 = vmul.f32 %v8196_v17, %v8194_v8  ;;  %v8161_v17 = vld [vmem:[#allocation41 + $0x78] sm:$0xff]  }
0x21ce   : > { %6911 = vmatprep.subr.bf16.mxu1 %v8161_v17 }
0x21cf   : > { %v5356_v52 = vpack.c.bf16 %v5355_v18, %v5355_v18  ;;  %v8162_v18 = vld [vmem:[#allocation41 + $0x38] sm:$0xff]  }
0x21d0   : > { %6912 = vmatpush3.bf16.msra.mxu1 %v8162_v18 }
0x21d1   : > { %7548 = vmatmul.mubr.msk.bf16.vlgmr.msra.gmra.mrb[88].mxu0 %vm3823_vm7, %v5356_v52  ;;  %v5523_v52 = vsub.s32 1, %v10013_v42 }
0x21d2   : > { %7552 = vmatpush3.bf16.msra.mxu0 %v8121_v19  ;;  %7555 = vmatprep.mubr.msk.bf16.mxu0 %vm9210_vm0, %v9209_v0  ;;  %v5515_v19 = vld [vmem:[#allocation40] sm:$0x3] }
0x21d3   : > { %7553 = vmatprep.subr.bf16.mxu0 %v9209_v0 }
0x21d6   : > { %7554 = vmatpush3.bf16.msra.mxu0 %v8122_v22  ;;  %v5520_v22 = vrot.slane %v5515_v19, %v3819_v58 }
0x21d7   : > { %5607 = vmatprep.subr.bf16.mxu0 %v8125_v43 }
0x22a4   : > { %v5394_v23 = vpop.f32.mrb[88].mxu0 }
0x22a5   : > { %v5400_v24 = vpack.c.bf16 %v5394_v23, %v5394_v23  ;;  %v7549_v25 = vpop.f32.mrb[89].mxu0  ;;  %v5524_v23 = vrot.slane %v5515_v19, %v5523_v52 }
0x22a6   : > { %v5397_v26 = vpop.f32.mrb[90].mxu0 }
0x22a7   : > { %v7550_v27 = vpop.f32.mrb[91].mxu0  ;;  %7556 = vmatmul.mubr.msk.bf16.vlgmr.msra.gmra.mrb[92].mxu0 %vm1694_vm1, %v5400_v24 }
0x22a8   : > { %5639 = vmatprep.mubr.bf16.mxu0 %v9211_v59  ;;  %5608 = vmatpush1.bf16.msra.mxu0 %v8123_v36  ;;  %v8129_v59 = vld [vmem:[#allocation38 + $0x20] ss:$8 sps:$4 sm:$0xff]  }
0x22a9   : > { %5609 = vmatprep.subr.bf16.mxu0 %v8128_v30 }
0x22ac   : > { %5610 = vmatpush1.bf16.msra.mxu0 %v8126_v38 }
0x22ad   : > { %5611 = vmatprep.subr.bf16.mxu0 %v8131_v39 }
0x22b0   : > { %5612 = vmatpush1.bf16.msra.mxu0 %v8129_v59 }
0x22b1   : > { %5613 = vmatprep.subr.bf16.mxu0 %v8134_v45 }
0x237a   : > { %v5455_v28 = vpop.f32.mrb[92].mxu0 }
0x237b   : > { %v5461_v32 = vadd.f32 %v5455_v28, %v10407_v37  ;;  %v7557_v20 = vpop.f32.mrb[93].mxu0 }
0x237c   : > { %v5458_v33 = vpop.f32.mrb[94].mxu0 }
0x237d   : > { %v5469_v34 = vadd.f32 %v6582_v31, %v5461_v32  ;;  %v7558_v35 = vpop.f32.mrb[95].mxu0 }
0x237f   : > { %v5470_v0 = vadd.f32 %v5469_v34, %v10228_v29  ;;  %v8132_v29 = vld [vmem:[#allocation38 + $0x30] ss:$8 sps:$4 sm:$0xff]  }
0x2380   : > { %5614 = vmatpush1.bf16.msra.mxu0 %v8132_v29 }
0x2381   : > { %5471 = vadd.xlane.f32.xlu0 %v5470_v0  ;;  %5615 = vmatprep.subr.bf16.mxu0 %v8137_v46  ;;  %v6618_v46 = vld [vmem:[#allocation44] ss:$0 sm:$0xff] }
0x2384   : > { %5616 = vmatpush1.bf16.msra.mxu0 %v8135_v47 }
0x2385   : > { %5617 = vmatprep.subr.bf16.mxu0 %v8140_v48  ;;  %v6619_v48 = vld [vmem:[#allocation46] ss:$0 sm:$0xff] }
0x2388   : > { %5618 = vmatpush1.bf16.msra.mxu0 %v8138_v49 }
0x2389   : > { %5619 = vmatprep.subr.bf16.mxu0 %v8143_v50 }
0x238c   : > { %5620 = vmatpush1.bf16.msra.mxu0 %v8141_v16 }
0x238d   : > { %5621 = vmatprep.subr.bf16.mxu0 %v8146_v51 }
0x2390   : > { %5622 = vmatpush1.bf16.msra.mxu0 %v8144_v53 }
0x240e   : > { %v5472_v37 = vpop.xlane.xlu0 %5471 }
0x240f   : > { %v5473_v40 = vmul.f32 0.0078125, %v5472_v37 }
0x2411   : > { %v5474_v41 = vsub.f32 %v5470_v0, %v5473_v40  ;;  %v6601_v0 = vld [vmem:[#allocation43] ss:$0 sm:$0xff] }
0x2413   : > { %v5475_v44 = vmul.f32 %v5474_v41, %v5474_v41 }
0x2415   : > { %5476 = vadd.xlane.f32.xlu1 %v5475_v44 }
0x24a2   : > { %v5477_v21 = vpop.xlane.xlu1 %5476 }
0x24a3   : > { %v5478_v6 = vmul.f32 0.0078125, %v5477_v21 }
0x24a5   : > { %v5479_v7 = vadd.f32 1e-05, %v5478_v6 }
0x24a7   : > { %8197 = vrsqrt.f32 %v5479_v7 }
0x24b1   : > { %v8198_v8 = vpop.eup %8197 }
0x24b2   : > { %v5481_v10 = vmul.f32 %v8198_v8, %v5474_v41 }
0x24b4   : > { %v5489_v62 = vmul.f32 %v6583_v9, %v5481_v10 }
0x24b6   : > { %v5497_v12 = vadd.f32 %v6584_v11, %v5489_v62 }
0x24b8   : > { %v5498_v13 = vpack.c.bf16 %v5497_v12, %v5497_v12 }
0x24ba   : > { %5640 = vmatmul.mubr.bf16.vlgmr.msra.gmra.mrb[96].mxu0 %v5498_v13 }
0x258d   : > { %v5641_v24 = vpop.f32.mrb[96].mxu0 }
0x258e   : > { %v5642_v25 = vadd.f32 %v5641_v24, %v5520_v22  ;;  %v5643_v26 = vpop.f32.mrb[97].mxu0 }
0x258f   : > { %v5644_v27 = vadd.f32 %v5643_v26, %v5524_v23  ;;  %v5645_v28 = vpop.f32.mrb[98].mxu0 }
0x2590   : > { %v5648_v31 = vmax.f32 %v5642_v25, 0.0  ;;  %v5646_v32 = vpop.f32.mrb[99].mxu0 }
0x2591   : > { %v5649_v20 = vmax.f32 %v5644_v27, 0.0 }
0x2592   : > { %v5650_v34 = vpack.c.bf16 %v5648_v31, %v5648_v31 }
0x2593   : > { %v5651_v33 = vpack.c.bf16 %v5649_v20, %v5649_v20 }
0x2595   : > { %5819 = vmatprep.mubr.bf16.mxu1 %v5651_v33 }
0x2596   : > { %5820 = vmatmul.mubr.bf16.vlgmr.msra.gmra.mrb[96].mxu1 %v5650_v34 }
0x2669   : > { %v6913_v35 = vpop.f32.mrb[96].mxu1 }
0x266a   : > { %v6914_v36 = vpop.f32.mrb[97].mxu1 }
0x266b   : > { %v6915_v43 = vadd.f32 %v6914_v36, %v6913_v35  ;;  %v6916_v30 = vpop.f32.mrb[98].mxu1 }
0x266c   : > { %v6917_v42 = vpop.f32.mrb[99].mxu1 }
0x266d   : > { %v5822_v58 = vadd.f32 %v6915_v43, %v6601_v0 }
0x266f   : > { %v5827_v38 = vadd.f32 %v5822_v58, %v5497_v12 }
0x2671   : > { %5828 = vadd.xlane.f32.xlu0 %v5827_v38 }
0x26fe   : > { %v5829_v39 = vpop.xlane.xlu0 %5828 }
0x26ff   : > { %v5830_v59 = vmul.f32 0.0078125, %v5829_v39 }
0x2701   : > { %v5831_v37 = vsub.f32 %v5827_v38, %v5830_v59 }
0x2703   : > { %v5832_v40 = vmul.f32 %v5831_v37, %v5831_v37 }
0x2705   : > { %5833 = vadd.xlane.f32.xlu1 %v5832_v40 }
0x2792   : > { %v5834_v41 = vpop.xlane.xlu1 %5833 }
0x2793   : > { %v5835_v44 = vmul.f32 0.0078125, %v5834_v41 }
0x2795   : > { %v5836_v45 = vadd.f32 1e-05, %v5835_v44 }
0x2797   : > { %8199 = vrsqrt.f32 %v5836_v45 }
0x27a1   : > { %v8200_v29 = vpop.eup %8199 }
0x27a2   : > { %v5838_v47 = vmul.f32 %v8200_v29, %v5831_v37 }
0x27a4   : > { %v5846_v49 = vmul.f32 %v6618_v46, %v5838_v47 }
0x27a6   : > { %v5854_v50 = vadd.f32 %v6619_v48, %v5846_v49 }
0x27a8   : > { %v5855_v16 = vpack.c.bf16 %v5854_v50, %v5854_v50 }
0x27aa   : > { %5856 = vst [vmem:[%s1345_s17] sm:$0xf] %v5855_v16 }
0x27ab   : > { %9034 = shalt.err (!%p9031_p8)
}
0x27ac   : > { %s9035_s20 = scalar_lea.hbm %s10440_s6, 64  ;;  %s9039_s14 = scalar_lea.hbm %s10637_s15, 128 }
0x27ad   : > { %p9036_p12 = scmp.ne.s32.totalorder %s10440_s6, %s9035_s20  ;;  %p9040_p9 = scmp.lt.u32.totalorder %s10440_s6, %s10637_s15 }
0x27ae   : > { %p9041_p0 = scmp.lt.u32.totalorder %s9039_s14, %s9035_s20  ;;  %p9043_p1 = scmp.lt.u32.totalorder %s9035_s20, %s10440_s6 }
0x27af   : > { %p9037_p5 = pnand %p9036_p12, %p10638_p4 }
0x27b0   : > { %p9042_p2 = por %p9041_p0, %p9040_p9 }
0x27b1   : > { %p9038_p13 = pneg %p9037_p5 }
0x27b2   : > { %p9044_p6 = por %p9043_p1, %p9042_p2 }
0x27b4   : > { %p9045_p7 = pnand %p9044_p6, %p9038_p13 }
0x27b6   : > { %9048 = shalt.err (!%p9045_p7)
}
0x27b7   : > { %7669 = dma.vmem_to_hbm [thread:$0]  (%p10638_p4), %s10442_s9, 64, %s10440_s6, %s5858_s28  }
0x27b8 PF: > { %s5883_s4 = sand.u32 1, %s9131_s0   ;;  %p10639_p3 = scmp.ne.s32.totalorder %s10587_s1, 0 }
0x27b9   : > { %p10640_p10 = scmp.ge.s32.totalorder %s9143_s11, 2  ;;  %s5884_s12 = scalar_lea.sflag [#allocation4], %s5883_s4 }
0x27bb   : > { %p7761_p11 = pnand %p10640_p10, %p10639_p3 }
0x27bd   : > { %9126 = dma.done.wait (!%p7761_p11), %s5884_s12, 64  }
0x27be   : > { %9128 = vsyncadd (!%p7761_p11), %s5884_s12, 4294967232  ;;  %p88_p8 = scmp.ge.s32.totalorder %s9593_s25, 4   ;;  %s10641_s0 = smov %s9135_s7 }
0x27bf   : > { %s10642_s7 = smov %s9139_s10  ;;  %s10643_s10 = smov %s9605_s3 }
0x27c0   : > { %s10644_s11 = smov %s9593_s25  ;;  %90 = sbr.rel (!%p88_p8) target bundleno = 79 (0x4f), region = 380 }
0x27c7   :  { %5889 = vsyncpa [#allocation3], 1 }
0x27c8   :  { %5891 = vsyncpa [#allocation3 + $0x1], 1 }
0x27c9   :  { %5892 = vsyncpa [#allocation6], 1 }
0x27ca   :  { %5894 = vsyncpa [#allocation6 + $0x1], 1 }
0x27cb   :  { %5895 = vsyncpa [#allocation9], 1 }
0x27cc   :  { %5896 = vsyncpa [#allocation12], 1 }
0x27cd   :  { %5897 = vsyncpa [#allocation15], 1 }
0x27ce   :  { %5898 = vsyncpa [#allocation18], 1 }
0x27cf   :  { %5899 = vsyncpa [#allocation21], 1 }
0x27d0   :  { %5900 = vsyncpa [#allocation24], 1 }
0x27d1   :  { %5901 = vsyncpa [#allocation27], 1 }
0x27d2   :  { %5902 = vsyncpa [#allocation30], 1 }
0x27d3   :  { %5903 = vsyncpa [#allocation33], 1 }
0x27d4   :  { %5904 = vsyncpa [#allocation36], 1 }
0x27d5   :  { %5905 = vsyncpa [#allocation39], 1 }
0x27d6   :  { %5906 = vsyncpa [#allocation42], 1 }
0x27d7   :  { %5907 = vsyncpa [#allocation45], 1 }
0x27d8   :  { %5908 = vsyncpa [#allocation4], 1 }
0x27d9   :  { %5910 = vsyncpa [#allocation4 + $0x1], 1 }

</bundles_post_ra>
